<compile_context>
chip_gen: v7x
topology: tpu7x:2x2x1
jax: 0.10.0
libtpu: 0.0.40
codegen_flags: <defaults>
</compile_context>

<pallas_src>
import functools

import jax
import jax.numpy as jnp
from jax.experimental import pallas as pl
from jax.experimental.pallas import tpu as pltpu


# ----------------------------------------------------------------------------
# Tiling helpers
# ----------------------------------------------------------------------------
def _round_up(x, m):
    return (x + m - 1) // m * m


def _m_tile(m):
    if m <= 256:
        return _round_up(m, 8)
    if _round_up(m, 256) - m <= 64:
        return 256
    return 128


def _mn_tile(n):
    return 256 if (n >= 256 and n % 256 == 0) else 128


def _k_tile(k):
    for c in (512, 384, 256, 128):
        if k >= c and k % c == 0:
            return c
    return 128


def _full_spec(shape):
    rank = len(shape)
    return pl.BlockSpec(shape, lambda i, _r=rank: (0,) * _r)


# ----------------------------------------------------------------------------
# Tiled matmul + bias (+ReLU) kernel  (MXU hot path for all convolutions)
# ----------------------------------------------------------------------------
def _mm_bias_kernel(x_ref, w_ref, b_ref, o_ref, acc_ref, *, relu):
    @pl.when(pl.program_id(2) == 0)
    def _():
        acc_ref[...] = jnp.zeros_like(acc_ref)

    acc_ref[...] += jnp.dot(x_ref[...], w_ref[...],
                            preferred_element_type=jnp.float32)

    @pl.when(pl.program_id(2) == pl.num_programs(2) - 1)
    def _():
        out = acc_ref[...] + b_ref[...]
        if relu:
            out = jnp.maximum(out, 0.0)
        o_ref[...] = out.astype(o_ref.dtype)


def matmul_bias(x, w_pad, b_pad, *, relu, out_dtype=jnp.bfloat16):
    """x: (M, K); w_pad: (Kp, Np) bf16 pre-padded; b_pad: (1, Np) f32. -> (M, Np)."""
    M, K = x.shape
    Kp, Np = w_pad.shape
    assert K <= Kp and b_pad.shape == (1, Np)

    tm = _m_tile(M)
    tn = _mn_tile(Np)
    tk = _k_tile(Kp)
    Mp = _round_up(M, tm)

    if (Mp, Kp) != (M, K):
        x = jnp.pad(x, ((0, Mp - M), (0, Kp - K)))
    x = x.astype(jnp.bfloat16)

    grid = (Mp // tm, Np // tn, Kp // tk)
    out_bytes = jnp.dtype(out_dtype).itemsize

    cost = pl.CostEstimate(
        flops=2 * Mp * Np * Kp,
        transcendentals=0,
        bytes_accessed=Mp * Kp * 2 + Kp * Np * 2 + Np * 4 + Mp * Np * out_bytes,
    )
    # double-buffered bf16 input tiles + double-buffered output + f32 accumulator
    tile_bytes = (2 * (tm * tk + tk * tn) * 2 + 2 * tn * 4
                  + 2 * tm * tn * out_bytes + tm * tn * 4)
    vmem_limit = int(min(64 * 1024 * 1024, max(4 * tile_bytes, 16 * 1024 * 1024)))

    out = pl.pallas_call(
        functools.partial(_mm_bias_kernel, relu=relu),
        out_shape=jax.ShapeDtypeStruct((Mp, Np), out_dtype),
        grid_spec=pltpu.PrefetchScalarGridSpec(
            num_scalar_prefetch=0,
            grid=grid,
            in_specs=[
                pl.BlockSpec((tm, tk), lambda i, j, k: (i, k)),
                pl.BlockSpec((tk, tn), lambda i, j, k: (k, j)),
                pl.BlockSpec((1, tn), lambda i, j, k: (0, j)),
            ],
            out_specs=pl.BlockSpec((tm, tn), lambda i, j, k: (i, j)),
            scratch_shapes=[pltpu.VMEM((tm, tn), jnp.float32)],
        ),
        compiler_params=pltpu.CompilerParams(
            dimension_semantics=("parallel", "parallel", "arbitrary"),
            vmem_limit_bytes=vmem_limit,
        ),
        cost_estimate=cost,
    )(x, w_pad, b_pad)
    return out[:M]


# ----------------------------------------------------------------------------
# 2x2 max pool (stride 2, floor mode) -- single-pass, lane-dense
# ----------------------------------------------------------------------------
def _maxpool_kernel(x_ref, o_ref, *, C):
    top = x_ref[:, 0, :, :]          # even H rows, (BHo, Wo, 2C)
    bot = x_ref[:, 1, :, :]          # odd  H rows
    m = jnp.maximum(top, bot)
    o_ref[...] = jnp.maximum(m[..., :C], m[..., C:])


def maxpool2x2(x):
    """x: (B, H, W, C) NHWC, C a multiple of 128. Floor-mode 2x2/2 max pool."""
    B, H, W, C = x.shape
    Ho, Wo = H // 2, W // 2
    xc = x[:, : 2 * Ho, : 2 * Wo, :]
    # Contiguous reshape: (B, 2Ho, 2Wo, C) -> (B*Ho, 2, Wo, 2C); lane dim 2C stays
    # a multiple of 128 and the input is read from HBM exactly once.
    xr = xc.reshape(B * Ho, 2, Wo, 2 * C)
    out = pl.pallas_call(
        functools.partial(_maxpool_kernel, C=C),
        out_shape=jax.ShapeDtypeStruct((B * Ho, Wo, C), x.dtype),
        grid=(1,),
        in_specs=[_full_spec((B * Ho, 2, Wo, 2 * C))],
        out_specs=_full_spec((B * Ho, Wo, C)),
    )(xr)
    return out.reshape(B, Ho, Wo, C)


# ----------------------------------------------------------------------------
# Conv2d = im2col (JAX glue, bf16) + tiled Pallas matmul
# ----------------------------------------------------------------------------
def conv2d(x, w_pad, b_pad, *, kh, kw, stride, padding, relu=True):
    """x: (B, H, W, Cin_arr) NHWC bf16 (channel-padded); w_pad: (Kp, Np) bf16."""
    B, H, W, C = x.shape
    _, Np = w_pad.shape
    xp = jnp.pad(x, ((0, 0), (padding, padding), (padding, padding), (0, 0)))
    Hp, Wp = H + 2 * padding, W + 2 * padding
    Ho = (Hp - kh) // stride + 1
    Wo = (Wp - kw) // stride + 1
    pats = []
    for i in range(kh):
        for j in range(kw):
            pats.append(
                xp[:, i: i + (Ho - 1) * stride + 1: stride,
                      j: j + (Wo - 1) * stride + 1: stride, :]
            )
    # (B, Ho, Wo, kh*kw, C) with (kh, kw, cin) ordering matching the weight prep.
    patches = jnp.stack(pats, axis=3).reshape(B * Ho * Wo, kh * kw * C)
    out = matmul_bias(patches, w_pad, b_pad, relu=relu, out_dtype=jnp.bfloat16)
    return out.reshape(B, Ho, Wo, Np)


# ----------------------------------------------------------------------------
# Fused classifier head: (flattened) x -> Linear+ReLU -> Linear+ReLU -> Linear
# ----------------------------------------------------------------------------
def _fc_head_kernel(x_ref, w1_ref, b1_ref, w2_ref, b2_ref, w3_ref, b3_ref, o_ref):
    h = jnp.dot(x_ref[...], w1_ref[...], preferred_element_type=jnp.float32)
    h = jnp.maximum(h + b1_ref[...], 0.0).astype(jnp.bfloat16)
    h = jnp.dot(h, w2_ref[...], preferred_element_type=jnp.float32)
    h = jnp.maximum(h + b2_ref[...], 0.0).astype(jnp.bfloat16)
    out = jnp.dot(h, w3_ref[...], preferred_element_type=jnp.float32) + b3_ref[...]
    o_ref[...] = out


def fc_head(x, fc, num_classes):
    """x: (B, 1024). All three FC weights stay VMEM-resident in one kernel."""
    B, F = x.shape
    Mp = _round_up(B, 8)
    xp = jnp.pad(x, ((0, Mp - B), (0, 0))).astype(jnp.bfloat16)
    w1, b1 = fc["w1"], fc["b1"]
    w2, b2 = fc["w2"], fc["b2"]
    w3, b3 = fc["w3"], fc["b3"]
    Np = w3.shape[1]
    out = pl.pallas_call(
        _fc_head_kernel,
        out_shape=jax.ShapeDtypeStruct((Mp, Np), jnp.float32),
        grid=(1,),
        in_specs=[
            _full_spec((Mp, F)),
            _full_spec(w1.shape), _full_spec(b1.shape),
            _full_spec(w2.shape), _full_spec(b2.shape),
            _full_spec(w3.shape), _full_spec(b3.shape),
        ],
        out_specs=_full_spec((Mp, Np)),
    )(xp, w1, b1, w2, b2, w3, b3)
    return out[:B, :num_classes]


# ----------------------------------------------------------------------------
# Parameter init (PyTorch layout, synthetic) + one-time layout preparation
# ----------------------------------------------------------------------------
def init_params(key, num_classes=4):
    shapes = {
        "c1w": (64, 4, 4, 4),    "c1b": (64,),
        "c2w": (192, 64, 5, 5),  "c2b": (192,),
        "c3w": (384, 192, 3, 3), "c3b": (384,),
        "c4w": (256, 384, 3, 3), "c4b": (256,),
        "c5w": (256, 256, 3, 3), "c5b": (256,),
        "f1w": (256, 256 * 2 * 2), "f1b": (256,),
        "f2w": (256, 256),         "f2b": (256,),
        "f3w": (num_classes, 256), "f3b": (num_classes,),
    }
    params = {}
    keys = jax.random.split(key, len(shapes))
    for k_rng, (name, shp) in zip(keys, sorted(shapes.items())):
        fan_in = 1
        for d in shp[1:]:
            fan_in *= d
        scale = 0.05 if len(shp) == 1 else (1.0 / jnp.sqrt(float(max(fan_in, 1))))
        params[name] = scale * jax.random.normal(k_rng, shp, dtype=jnp.float32)
    return params


# (kernel_size, stride, padding) for conv1..conv5 -- static config.
_CONV_CFGS = ((4, 2, 2), (5, 1, 2), (3, 1, 1), (3, 1, 1), (3, 1, 1))


def prepare_params(raw, num_classes=4):
    """Hoist all layout work out of the forward pass (bf16, matmul layout, padded)."""
    prepared = {"conv": []}
    cin_arr = 4  # raw input channels (unpadded for conv1)
    for li, (ks, _, _) in enumerate(_CONV_CFGS):
        w = raw[f"c{li + 1}w"]
        b = raw[f"c{li + 1}b"]
        cout, cin, kh, kw = w.shape
        wc = jnp.pad(w, ((0, 0), (0, cin_arr - cin), (0, 0), (0, 0)))
        wm = jnp.transpose(wc, (2, 3, 1, 0)).reshape(kh * kw * cin_arr, cout)
        K, N = wm.shape
        Kp = _round_up(K, _k_tile(K))
        Np = _round_up(N, _mn_tile(N))
        wm = jnp.pad(wm, ((0, Kp - K), (0, Np - N))).astype(jnp.bfloat16)
        bp = jnp.pad(b, (0, Np - N)).reshape(1, Np).astype(jnp.float32)
        prepared["conv"].append({"w": wm, "b": bp})
        cin_arr = Np  # next layer consumes the channel-padded activation

    def prep_linear(w, b):
        n, _ = w.shape
        np_ = _round_up(n, 128)
        wt = jnp.pad(w.T, ((0, 0), (0, np_ - n))).astype(jnp.bfloat16)
        bp = jnp.pad(b, (0, np_ - n)).reshape(1, np_).astype(jnp.float32)
        return wt, bp

    w1, b1 = prep_linear(raw["f1w"], raw["f1b"])
    w2, b2 = prep_linear(raw["f2w"], raw["f2b"])
    w3, b3 = prep_linear(raw["f3w"], raw["f3b"])
    prepared["fc"] = {"w1": w1, "b1": b1, "w2": w2, "b2": b2, "w3": w3, "b3": b3}
    return prepared


# ----------------------------------------------------------------------------
# Forward pass
# ----------------------------------------------------------------------------
def alexnet_forward(params, x_nchw, num_classes=4):
    # layout: x_nchw is (B, C, H, W); convert to NHWC (channels on lanes), bf16.
    x = jnp.transpose(x_nchw, (0, 2, 3, 1)).astype(jnp.bfloat16)
    conv = params["conv"]

    x = conv2d(x, conv[0]["w"], conv[0]["b"], kh=4, kw=4, stride=2, padding=2)
    x = maxpool2x2(x)
    x = conv2d(x, conv[1]["w"], conv[1]["b"], kh=5, kw=5, stride=1, padding=2)
    x = maxpool2x2(x)
    x = conv2d(x, conv[2]["w"], conv[2]["b"], kh=3, kw=3, stride=1, padding=1)
    x = conv2d(x, conv[3]["w"], conv[3]["b"], kh=3, kw=3, stride=1, padding=1)
    x = conv2d(x, conv[4]["w"], conv[4]["b"], kh=3, kw=3, stride=1, padding=1)
    x = maxpool2x2(x)

    # PyTorch x.view(B, 256*2*2) flattens in (C, H, W) order; conv5 Cout == 256
    # exactly (no channel padding on the final feature map).
    B = x.shape[0]
    x = jnp.transpose(x, (0, 3, 1, 2)).reshape(B, 256 * 2 * 2)

    # classifier (Dropout == identity in eval mode), fused into one kernel.
    return fc_head(x, params["fc"], num_classes)


if __name__ == "__main__":
    key = jax.random.PRNGKey(0)
    pkey, xkey = jax.random.split(key)
    raw = init_params(pkey, num_classes=4)
    params = prepare_params(raw, num_classes=4)

    # Input must be (B, 4, 32, 32) so the feature extractor yields 256 x 2 x 2.
    x = jax.random.normal(xkey, (2, 4, 32, 32), dtype=jnp.float32)

    fwd = jax.jit(alexnet_forward)
    out = fwd(params, x)
    out = jax.block_until_ready(out)
    assert out.shape == (2, 4), out.shape
    print("KERNEL_OK")
</pallas_src>

<mosaic_0001>
module attributes {stable_mosaic.version = 11 : i64} {
  func.func @_mm_bias_kernel(%arg0: i32, %arg1: i32, %arg2: i32, %arg3: memref<128x128xbf16, #tpu.memory_space<vmem>>, %arg4: memref<128x128xbf16, #tpu.memory_space<vmem>>, %arg5: memref<1x128xf32, #tpu.memory_space<vmem>>, %arg6: memref<128x128xbf16, #tpu.memory_space<vmem>>, %arg7: memref<128x128xf32, #tpu.memory_space<vmem>>) attributes {dimension_semantics = [#tpu.dimension_semantics<parallel>, #tpu.dimension_semantics<parallel>, #tpu.dimension_semantics<arbitrary>], iteration_bounds = array<i64: 5, 1, 1>, scalar_prefetch = 0 : i64, scratch_operands = 1 : i64, tpu.core_type = #tpu.core_type<tc>, window_params = [{transform_indices = @transform_0, window_bounds = array<i64: 128, 128>}, {transform_indices = @transform_1, window_bounds = array<i64: 128, 128>}, {transform_indices = @transform_2, window_bounds = array<i64: 1, 128>}, {transform_indices = @transform_3, window_bounds = array<i64: 128, 128>}]} {
    %c0_i32 = arith.constant 0 : i32
    %0 = arith.cmpi eq, %arg2, %c0_i32 : i32
    %1 = arith.extui %0 : i1 to i32
    %c0_i32_0 = arith.constant 0 : i32
    %2 = arith.cmpi ne, %1, %c0_i32_0 : i32
    scf.if %2 {
      %cst_10 = arith.constant 0.000000e+00 : f32
      %12 = vector.broadcast %cst_10 : f32 to vector<128x128xf32>
      %c0_11 = arith.constant 0 : index
      %c0_12 = arith.constant 0 : index
      %13 = vector.load %arg7[%c0_11, %c0_12] : memref<128x128xf32, #tpu.memory_space<vmem>>, vector<128x128xf32>
      tpu.vector_store %arg7[%c0_11, %c0_12], %12 {strides = array<i32>} : memref<128x128xf32, #tpu.memory_space<vmem>>, vector<128x128xf32>,
    } else {
    }
    %c0 = arith.constant 0 : index
    %c0_1 = arith.constant 0 : index
    %3 = vector.load %arg7[%c0, %c0_1] : memref<128x128xf32, #tpu.memory_space<vmem>>, vector<128x128xf32>
    %c0_2 = arith.constant 0 : index
    %c0_3 = arith.constant 0 : index
    %4 = vector.load %arg3[%c0_2, %c0_3] : memref<128x128xbf16, #tpu.memory_space<vmem>>, vector<128x128xbf16>
    %c0_4 = arith.constant 0 : index
    %c0_5 = arith.constant 0 : index
    %5 = vector.load %arg4[%c0_4, %c0_5] : memref<128x128xbf16, #tpu.memory_space<vmem>>, vector<128x128xbf16>
    %cst = arith.constant dense<0.000000e+00> : vector<128x128xf32>
    %6 = tpu.matmul %4, %5, %cst {dimension_numbers = #tpu.dot_dimension_numbers<[1], [0], [0], [1], [0, 0, 1, 1], [], []>} : vector<128x128xbf16>, vector<128x128xbf16>, vector<128x128xf32> -> vector<128x128xf32>
    %7 = arith.addf %3, %6 : vector<128x128xf32>
    %c0_6 = arith.constant 0 : index
    %c0_7 = arith.constant 0 : index
    %8 = vector.load %arg7[%c0_6, %c0_7] : memref<128x128xf32, #tpu.memory_space<vmem>>, vector<128x128xf32>
    tpu.vector_store %arg7[%c0_6, %c0_7], %7 {strides = array<i32>} : memref<128x128xf32, #tpu.memory_space<vmem>>, vector<128x128xf32>,
    %c0_i32_8 = arith.constant 0 : i32
    %9 = arith.cmpi eq, %arg2, %c0_i32_8 : i32
    %10 = arith.extui %9 : i1 to i32
    %c0_i32_9 = arith.constant 0 : i32
    %11 = arith.cmpi ne, %10, %c0_i32_9 : i32
    scf.if %11 {
      %c0_10 = arith.constant 0 : index
      %c0_11 = arith.constant 0 : index
      %12 = vector.load %arg7[%c0_10, %c0_11] : memref<128x128xf32, #tpu.memory_space<vmem>>, vector<128x128xf32>
      %c0_12 = arith.constant 0 : index
      %c0_13 = arith.constant 0 : index
      %13 = vector.load %arg5[%c0_12, %c0_13] : memref<1x128xf32, #tpu.memory_space<vmem>>, vector<1x128xf32>
      %14 = vector.broadcast %13 : vector<1x128xf32> to vector<128x128xf32>
      %15 = arith.addf %12, %14 : vector<128x128xf32>
      %cst_14 = arith.constant 0.000000e+00 : f32
      %16 = vector.broadcast %cst_14 : f32 to vector<128x128xf32>
      %17 = arith.maximumf %15, %16 : vector<128x128xf32>
      %18 = arith.truncf %17 : vector<128x128xf32> to vector<128x128xbf16>
      %c0_15 = arith.constant 0 : index
      %c0_16 = arith.constant 0 : index
      %19 = vector.load %arg6[%c0_15, %c0_16] : memref<128x128xbf16, #tpu.memory_space<vmem>>, vector<128x128xbf16>
      tpu.vector_store %arg6[%c0_15, %c0_16], %18 {strides = array<i32>} : memref<128x128xbf16, #tpu.memory_space<vmem>>, vector<128x128xbf16>,
    } else {
    }
    return
  }
  func.func @transform_0(%arg0: i32, %arg1: i32, %arg2: i32) -> (i32, i32) {
    %c0_i32 = arith.constant 0 : i32
    return %arg0, %arg2 : i32, i32
  }
  func.func @transform_1(%arg0: i32, %arg1: i32, %arg2: i32) -> (i32, i32) {
    %c0_i32 = arith.constant 0 : i32
    return %arg2, %arg1 : i32, i32
  }
  func.func @transform_2(%arg0: i32, %arg1: i32, %arg2: i32) -> (i32, i32) {
    %c0_i32 = arith.constant 0 : i32
    %c0_i32_0 = arith.constant 0 : i32
    return %c0_i32, %arg1 : i32, i32
  }
  func.func @transform_3(%arg0: i32, %arg1: i32, %arg2: i32) -> (i32, i32) {
    %c0_i32 = arith.constant 0 : i32
    return %arg0, %arg1 : i32, i32
  }
}

module attributes {stable_mosaic.version = 11 : i64} {
  func.func @_maxpool_kernel(%arg0: i32, %arg1: memref<16x2x8x256xbf16, #tpu.memory_space<vmem>>, %arg2: memref<16x8x128xbf16, #tpu.memory_space<vmem>>) attributes {dimension_semantics = [#tpu.dimension_semantics<arbitrary>], iteration_bounds = array<i64: 1>, scalar_prefetch = 0 : i64, scratch_operands = 0 : i64, tpu.core_type = #tpu.core_type<tc>, window_params = [{pipeline_mode = #tpu.pipeline_mode<synchronous>, transform_indices = @transform_0, window_bounds = array<i64: 16, 2, 8, 256>}, {pipeline_mode = #tpu.pipeline_mode<synchronous>, transform_indices = @transform_1, window_bounds = array<i64: 16, 8, 128>}]} {
    %c0 = arith.constant 0 : index
    %c0_0 = arith.constant 0 : index
    %c0_1 = arith.constant 0 : index
    %c0_2 = arith.constant 0 : index
    %0 = vector.load %arg1[%c0, %c0_0, %c0_1, %c0_2] : memref<16x2x8x256xbf16, #tpu.memory_space<vmem>>, vector<16x1x8x256xbf16>
    %1 = vector.shape_cast %0 : vector<16x1x8x256xbf16> to vector<16x8x256xbf16>
    %c0_3 = arith.constant 0 : index
    %c1 = arith.constant 1 : index
    %c0_4 = arith.constant 0 : index
    %c0_5 = arith.constant 0 : index
    %2 = vector.load %arg1[%c0_3, %c1, %c0_4, %c0_5] : memref<16x2x8x256xbf16, #tpu.memory_space<vmem>>, vector<16x1x8x256xbf16>
    %3 = vector.shape_cast %2 : vector<16x1x8x256xbf16> to vector<16x8x256xbf16>
    %4 = arith.maximumf %1, %3 : vector<16x8x256xbf16>
    %5 = vector.extract_strided_slice %4 {offsets = [0, 0, 0], sizes = [16, 8, 128], strides = [1, 1, 1]} : vector<16x8x256xbf16> to vector<16x8x128xbf16>
    %6 = vector.extract_strided_slice %4 {offsets = [0, 0, 128], sizes = [16, 8, 128], strides = [1, 1, 1]} : vector<16x8x256xbf16> to vector<16x8x128xbf16>
    %7 = arith.maximumf %5, %6 : vector<16x8x128xbf16>
    %c0_6 = arith.constant 0 : index
    %c0_7 = arith.constant 0 : index
    %c0_8 = arith.constant 0 : index
    %8 = vector.load %arg2[%c0_6, %c0_7, %c0_8] : memref<16x8x128xbf16, #tpu.memory_space<vmem>>, vector<16x8x128xbf16>
    tpu.vector_store %arg2[%c0_6, %c0_7, %c0_8], %7 {strides = array<i32>} : memref<16x8x128xbf16, #tpu.memory_space<vmem>>, vector<16x8x128xbf16>,
    return
  }
  func.func @transform_0(%arg0: i32) -> (i32, i32, i32, i32) {
    %c0_i32 = arith.constant 0 : i32
    %c0_i32_0 = arith.constant 0 : i32
    %c0_i32_1 = arith.constant 0 : i32
    %c0_i32_2 = arith.constant 0 : i32
    %c0_i32_3 = arith.constant 0 : i32
    return %c0_i32, %c0_i32_0, %c0_i32_1, %c0_i32_2 : i32, i32, i32, i32
  }
  func.func @transform_1(%arg0: i32) -> (i32, i32, i32) {
    %c0_i32 = arith.constant 0 : i32
    %c0_i32_0 = arith.constant 0 : i32
    %c0_i32_1 = arith.constant 0 : i32
    %c0_i32_2 = arith.constant 0 : i32
    return %c0_i32, %c0_i32_0, %c0_i32_1 : i32, i32, i32
  }
}

module attributes {stable_mosaic.version = 11 : i64} {
  func.func @_maxpool_kernel(%arg0: i32, %arg1: memref<8x2x4x512xbf16, #tpu.memory_space<vmem>>, %arg2: memref<8x4x256xbf16, #tpu.memory_space<vmem>>) attributes {dimension_semantics = [#tpu.dimension_semantics<arbitrary>], iteration_bounds = array<i64: 1>, scalar_prefetch = 0 : i64, scratch_operands = 0 : i64, tpu.core_type = #tpu.core_type<tc>, window_params = [{pipeline_mode = #tpu.pipeline_mode<synchronous>, transform_indices = @transform_0, window_bounds = array<i64: 8, 2, 4, 512>}, {pipeline_mode = #tpu.pipeline_mode<synchronous>, transform_indices = @transform_1, window_bounds = array<i64: 8, 4, 256>}]} {
    %c0 = arith.constant 0 : index
    %c0_0 = arith.constant 0 : index
    %c0_1 = arith.constant 0 : index
    %c0_2 = arith.constant 0 : index
    %0 = vector.load %arg1[%c0, %c0_0, %c0_1, %c0_2] : memref<8x2x4x512xbf16, #tpu.memory_space<vmem>>, vector<8x1x4x512xbf16>
    %1 = vector.shape_cast %0 : vector<8x1x4x512xbf16> to vector<8x4x512xbf16>
    %c0_3 = arith.constant 0 : index
    %c1 = arith.constant 1 : index
    %c0_4 = arith.constant 0 : index
    %c0_5 = arith.constant 0 : index
    %2 = vector.load %arg1[%c0_3, %c1, %c0_4, %c0_5] : memref<8x2x4x512xbf16, #tpu.memory_space<vmem>>, vector<8x1x4x512xbf16>
    %3 = vector.shape_cast %2 : vector<8x1x4x512xbf16> to vector<8x4x512xbf16>
    %4 = arith.maximumf %1, %3 : vector<8x4x512xbf16>
    %5 = vector.extract_strided_slice %4 {offsets = [0, 0, 0], sizes = [8, 4, 256], strides = [1, 1, 1]} : vector<8x4x512xbf16> to vector<8x4x256xbf16>
    %6 = vector.extract_strided_slice %4 {offsets = [0, 0, 256], sizes = [8, 4, 256], strides = [1, 1, 1]} : vector<8x4x512xbf16> to vector<8x4x256xbf16>
    %7 = arith.maximumf %5, %6 : vector<8x4x256xbf16>
    %c0_6 = arith.constant 0 : index
    %c0_7 = arith.constant 0 : index
    %c0_8 = arith.constant 0 : index
    %8 = vector.load %arg2[%c0_6, %c0_7, %c0_8] : memref<8x4x256xbf16, #tpu.memory_space<vmem>>, vector<8x4x256xbf16>
    tpu.vector_store %arg2[%c0_6, %c0_7, %c0_8], %7 {strides = array<i32>} : memref<8x4x256xbf16, #tpu.memory_space<vmem>>, vector<8x4x256xbf16>,
    return
  }
  func.func @transform_0(%arg0: i32) -> (i32, i32, i32, i32) {
    %c0_i32 = arith.constant 0 : i32
    %c0_i32_0 = arith.constant 0 : i32
    %c0_i32_1 = arith.constant 0 : i32
    %c0_i32_2 = arith.constant 0 : i32
    %c0_i32_3 = arith.constant 0 : i32
    return %c0_i32, %c0_i32_0, %c0_i32_1, %c0_i32_2 : i32, i32, i32, i32
  }
  func.func @transform_1(%arg0: i32) -> (i32, i32, i32) {
    %c0_i32 = arith.constant 0 : i32
    %c0_i32_0 = arith.constant 0 : i32
    %c0_i32_1 = arith.constant 0 : i32
    %c0_i32_2 = arith.constant 0 : i32
    return %c0_i32, %c0_i32_0, %c0_i32_1 : i32, i32, i32
  }
}

module attributes {stable_mosaic.version = 11 : i64} {
  func.func @_mm_bias_kernel(%arg0: i32, %arg1: i32, %arg2: i32, %arg3: memref<128x128xbf16, #tpu.memory_space<vmem>>, %arg4: memref<128x256xbf16, #tpu.memory_space<vmem>>, %arg5: memref<1x256xf32, #tpu.memory_space<vmem>>, %arg6: memref<128x256xbf16, #tpu.memory_space<vmem>>, %arg7: memref<128x256xf32, #tpu.memory_space<vmem>>) attributes {dimension_semantics = [#tpu.dimension_semantics<parallel>, #tpu.dimension_semantics<parallel>, #tpu.dimension_semantics<arbitrary>], iteration_bounds = array<i64: 1, 1, 25>, scalar_prefetch = 0 : i64, scratch_operands = 1 : i64, tpu.core_type = #tpu.core_type<tc>, window_params = [{transform_indices = @transform_0, window_bounds = array<i64: 128, 128>}, {transform_indices = @transform_1, window_bounds = array<i64: 128, 256>}, {transform_indices = @transform_2, window_bounds = array<i64: 1, 256>}, {transform_indices = @transform_3, window_bounds = array<i64: 128, 256>}]} {
    %c0_i32 = arith.constant 0 : i32
    %0 = arith.cmpi eq, %arg2, %c0_i32 : i32
    %1 = arith.extui %0 : i1 to i32
    %c0_i32_0 = arith.constant 0 : i32
    %2 = arith.cmpi ne, %1, %c0_i32_0 : i32
    scf.if %2 {
      %cst_9 = arith.constant 0.000000e+00 : f32
      %12 = vector.broadcast %cst_9 : f32 to vector<128x256xf32>
      %c0_10 = arith.constant 0 : index
      %c0_11 = arith.constant 0 : index
      %13 = vector.load %arg7[%c0_10, %c0_11] : memref<128x256xf32, #tpu.memory_space<vmem>>, vector<128x256xf32>
      tpu.vector_store %arg7[%c0_10, %c0_11], %12 {strides = array<i32>} : memref<128x256xf32, #tpu.memory_space<vmem>>, vector<128x256xf32>,
    } else {
    }
    %c0 = arith.constant 0 : index
    %c0_1 = arith.constant 0 : index
    %3 = vector.load %arg7[%c0, %c0_1] : memref<128x256xf32, #tpu.memory_space<vmem>>, vector<128x256xf32>
    %c0_2 = arith.constant 0 : index
    %c0_3 = arith.constant 0 : index
    %4 = vector.load %arg3[%c0_2, %c0_3] : memref<128x128xbf16, #tpu.memory_space<vmem>>, vector<128x128xbf16>
    %c0_4 = arith.constant 0 : index
    %c0_5 = arith.constant 0 : index
    %5 = vector.load %arg4[%c0_4, %c0_5] : memref<128x256xbf16, #tpu.memory_space<vmem>>, vector<128x256xbf16>
    %cst = arith.constant dense<0.000000e+00> : vector<128x256xf32>
    %6 = tpu.matmul %4, %5, %cst {dimension_numbers = #tpu.dot_dimension_numbers<[1], [0], [0], [1], [0, 0, 1, 1], [], []>} : vector<128x128xbf16>, vector<128x256xbf16>, vector<128x256xf32> -> vector<128x256xf32>
    %7 = arith.addf %3, %6 : vector<128x256xf32>
    %c0_6 = arith.constant 0 : index
    %c0_7 = arith.constant 0 : index
    %8 = vector.load %arg7[%c0_6, %c0_7] : memref<128x256xf32, #tpu.memory_space<vmem>>, vector<128x256xf32>
    tpu.vector_store %arg7[%c0_6, %c0_7], %7 {strides = array<i32>} : memref<128x256xf32, #tpu.memory_space<vmem>>, vector<128x256xf32>,
    %c24_i32 = arith.constant 24 : i32
    %9 = arith.cmpi eq, %arg2, %c24_i32 : i32
    %10 = arith.extui %9 : i1 to i32
    %c0_i32_8 = arith.constant 0 : i32
    %11 = arith.cmpi ne, %10, %c0_i32_8 : i32
    scf.if %11 {
      %c0_9 = arith.constant 0 : index
      %c0_10 = arith.constant 0 : index
      %12 = vector.load %arg7[%c0_9, %c0_10] : memref<128x256xf32, #tpu.memory_space<vmem>>, vector<128x256xf32>
      %c0_11 = arith.constant 0 : index
      %c0_12 = arith.constant 0 : index
      %13 = vector.load %arg5[%c0_11, %c0_12] : memref<1x256xf32, #tpu.memory_space<vmem>>, vector<1x256xf32>
      %14 = vector.broadcast %13 : vector<1x256xf32> to vector<128x256xf32>
      %15 = arith.addf %12, %14 : vector<128x256xf32>
      %cst_13 = arith.constant 0.000000e+00 : f32
      %16 = vector.broadcast %cst_13 : f32 to vector<128x256xf32>
      %17 = arith.maximumf %15, %16 : vector<128x256xf32>
      %18 = arith.truncf %17 : vector<128x256xf32> to vector<128x256xbf16>
      %c0_14 = arith.constant 0 : index
      %c0_15 = arith.constant 0 : index
      %19 = vector.load %arg6[%c0_14, %c0_15] : memref<128x256xbf16, #tpu.memory_space<vmem>>, vector<128x256xbf16>
      tpu.vector_store %arg6[%c0_14, %c0_15], %18 {strides = array<i32>} : memref<128x256xbf16, #tpu.memory_space<vmem>>, vector<128x256xbf16>,
    } else {
    }
    return
  }
  func.func @transform_0(%arg0: i32, %arg1: i32, %arg2: i32) -> (i32, i32) {
    %c0_i32 = arith.constant 0 : i32
    return %arg0, %arg2 : i32, i32
  }
  func.func @transform_1(%arg0: i32, %arg1: i32, %arg2: i32) -> (i32, i32) {
    %c0_i32 = arith.constant 0 : i32
    return %arg2, %arg1 : i32, i32
  }
  func.func @transform_2(%arg0: i32, %arg1: i32, %arg2: i32) -> (i32, i32) {
    %c0_i32 = arith.constant 0 : i32
    %c0_i32_0 = arith.constant 0 : i32
    return %c0_i32, %arg1 : i32, i32
  }
  func.func @transform_3(%arg0: i32, %arg1: i32, %arg2: i32) -> (i32, i32) {
    %c0_i32 = arith.constant 0 : i32
    return %arg0, %arg1 : i32, i32
  }
}

module attributes {stable_mosaic.version = 11 : i64} {
  func.func @_mm_bias_kernel(%arg0: i32, %arg1: i32, %arg2: i32, %arg3: memref<32x384xbf16, #tpu.memory_space<vmem>>, %arg4: memref<384x128xbf16, #tpu.memory_space<vmem>>, %arg5: memref<1x128xf32, #tpu.memory_space<vmem>>, %arg6: memref<32x128xbf16, #tpu.memory_space<vmem>>, %arg7: memref<32x128xf32, #tpu.memory_space<vmem>>) attributes {dimension_semantics = [#tpu.dimension_semantics<parallel>, #tpu.dimension_semantics<parallel>, #tpu.dimension_semantics<arbitrary>], iteration_bounds = array<i64: 1, 3, 6>, scalar_prefetch = 0 : i64, scratch_operands = 1 : i64, tpu.core_type = #tpu.core_type<tc>, window_params = [{transform_indices = @transform_0, window_bounds = array<i64: 32, 384>}, {transform_indices = @transform_1, window_bounds = array<i64: 384, 128>}, {transform_indices = @transform_2, window_bounds = array<i64: 1, 128>}, {transform_indices = @transform_3, window_bounds = array<i64: 32, 128>}]} {
    %c0_i32 = arith.constant 0 : i32
    %0 = arith.cmpi eq, %arg2, %c0_i32 : i32
    %1 = arith.extui %0 : i1 to i32
    %c0_i32_0 = arith.constant 0 : i32
    %2 = arith.cmpi ne, %1, %c0_i32_0 : i32
    scf.if %2 {
      %cst_9 = arith.constant 0.000000e+00 : f32
      %12 = vector.broadcast %cst_9 : f32 to vector<32x128xf32>
      %c0_10 = arith.constant 0 : index
      %c0_11 = arith.constant 0 : index
      %13 = vector.load %arg7[%c0_10, %c0_11] : memref<32x128xf32, #tpu.memory_space<vmem>>, vector<32x128xf32>
      tpu.vector_store %arg7[%c0_10, %c0_11], %12 {strides = array<i32>} : memref<32x128xf32, #tpu.memory_space<vmem>>, vector<32x128xf32>,
    } else {
    }
    %c0 = arith.constant 0 : index
    %c0_1 = arith.constant 0 : index
    %3 = vector.load %arg7[%c0, %c0_1] : memref<32x128xf32, #tpu.memory_space<vmem>>, vector<32x128xf32>
    %c0_2 = arith.constant 0 : index
    %c0_3 = arith.constant 0 : index
    %4 = vector.load %arg3[%c0_2, %c0_3] : memref<32x384xbf16, #tpu.memory_space<vmem>>, vector<32x384xbf16>
    %c0_4 = arith.constant 0 : index
    %c0_5 = arith.constant 0 : index
    %5 = vector.load %arg4[%c0_4, %c0_5] : memref<384x128xbf16, #tpu.memory_space<vmem>>, vector<384x128xbf16>
    %cst = arith.constant dense<0.000000e+00> : vector<32x128xf32>
    %6 = tpu.matmul %4, %5, %cst {dimension_numbers = #tpu.dot_dimension_numbers<[1], [0], [0], [1], [0, 0, 1, 1], [], []>} : vector<32x384xbf16>, vector<384x128xbf16>, vector<32x128xf32> -> vector<32x128xf32>
    %7 = arith.addf %3, %6 : vector<32x128xf32>
    %c0_6 = arith.constant 0 : index
    %c0_7 = arith.constant 0 : index
    %8 = vector.load %arg7[%c0_6, %c0_7] : memref<32x128xf32, #tpu.memory_space<vmem>>, vector<32x128xf32>
    tpu.vector_store %arg7[%c0_6, %c0_7], %7 {strides = array<i32>} : memref<32x128xf32, #tpu.memory_space<vmem>>, vector<32x128xf32>,
    %c5_i32 = arith.constant 5 : i32
    %9 = arith.cmpi eq, %arg2, %c5_i32 : i32
    %10 = arith.extui %9 : i1 to i32
    %c0_i32_8 = arith.constant 0 : i32
    %11 = arith.cmpi ne, %10, %c0_i32_8 : i32
    scf.if %11 {
      %c0_9 = arith.constant 0 : index
      %c0_10 = arith.constant 0 : index
      %12 = vector.load %arg7[%c0_9, %c0_10] : memref<32x128xf32, #tpu.memory_space<vmem>>, vector<32x128xf32>
      %c0_11 = arith.constant 0 : index
      %c0_12 = arith.constant 0 : index
      %13 = vector.load %arg5[%c0_11, %c0_12] : memref<1x128xf32, #tpu.memory_space<vmem>>, vector<1x128xf32>
      %14 = vector.broadcast %13 : vector<1x128xf32> to vector<32x128xf32>
      %15 = arith.addf %12, %14 : vector<32x128xf32>
      %cst_13 = arith.constant 0.000000e+00 : f32
      %16 = vector.broadcast %cst_13 : f32 to vector<32x128xf32>
      %17 = arith.maximumf %15, %16 : vector<32x128xf32>
      %18 = arith.truncf %17 : vector<32x128xf32> to vector<32x128xbf16>
      %c0_14 = arith.constant 0 : index
      %c0_15 = arith.constant 0 : index
      %19 = vector.load %arg6[%c0_14, %c0_15] : memref<32x128xbf16, #tpu.memory_space<vmem>>, vector<32x128xbf16>
      tpu.vector_store %arg6[%c0_14, %c0_15], %18 {strides = array<i32>} : memref<32x128xbf16, #tpu.memory_space<vmem>>, vector<32x128xbf16>,
    } else {
    }
    return
  }
  func.func @transform_0(%arg0: i32, %arg1: i32, %arg2: i32) -> (i32, i32) {
    %c0_i32 = arith.constant 0 : i32
    return %arg0, %arg2 : i32, i32
  }
  func.func @transform_1(%arg0: i32, %arg1: i32, %arg2: i32) -> (i32, i32) {
    %c0_i32 = arith.constant 0 : i32
    return %arg2, %arg1 : i32, i32
  }
  func.func @transform_2(%arg0: i32, %arg1: i32, %arg2: i32) -> (i32, i32) {
    %c0_i32 = arith.constant 0 : i32
    %c0_i32_0 = arith.constant 0 : i32
    return %c0_i32, %arg1 : i32, i32
  }
  func.func @transform_3(%arg0: i32, %arg1: i32, %arg2: i32) -> (i32, i32) {
    %c0_i32 = arith.constant 0 : i32
    return %arg0, %arg1 : i32, i32
  }
}

module attributes {stable_mosaic.version = 11 : i64} {
  func.func @_mm_bias_kernel(%arg0: i32, %arg1: i32, %arg2: i32, %arg3: memref<32x384xbf16, #tpu.memory_space<vmem>>, %arg4: memref<384x256xbf16, #tpu.memory_space<vmem>>, %arg5: memref<1x256xf32, #tpu.memory_space<vmem>>, %arg6: memref<32x256xbf16, #tpu.memory_space<vmem>>, %arg7: memref<32x256xf32, #tpu.memory_space<vmem>>) attributes {dimension_semantics = [#tpu.dimension_semantics<parallel>, #tpu.dimension_semantics<parallel>, #tpu.dimension_semantics<arbitrary>], iteration_bounds = array<i64: 1, 1, 6>, scalar_prefetch = 0 : i64, scratch_operands = 1 : i64, tpu.core_type = #tpu.core_type<tc>, window_params = [{transform_indices = @transform_0, window_bounds = array<i64: 32, 384>}, {transform_indices = @transform_1, window_bounds = array<i64: 384, 256>}, {transform_indices = @transform_2, window_bounds = array<i64: 1, 256>}, {transform_indices = @transform_3, window_bounds = array<i64: 32, 256>}]} {
    %c0_i32 = arith.constant 0 : i32
    %0 = arith.cmpi eq, %arg2, %c0_i32 : i32
    %1 = arith.extui %0 : i1 to i32
    %c0_i32_0 = arith.constant 0 : i32
    %2 = arith.cmpi ne, %1, %c0_i32_0 : i32
    scf.if %2 {
      %cst_9 = arith.constant 0.000000e+00 : f32
      %12 = vector.broadcast %cst_9 : f32 to vector<32x256xf32>
      %c0_10 = arith.constant 0 : index
      %c0_11 = arith.constant 0 : index
      %13 = vector.load %arg7[%c0_10, %c0_11] : memref<32x256xf32, #tpu.memory_space<vmem>>, vector<32x256xf32>
      tpu.vector_store %arg7[%c0_10, %c0_11], %12 {strides = array<i32>} : memref<32x256xf32, #tpu.memory_space<vmem>>, vector<32x256xf32>,
    } else {
    }
    %c0 = arith.constant 0 : index
    %c0_1 = arith.constant 0 : index
    %3 = vector.load %arg7[%c0, %c0_1] : memref<32x256xf32, #tpu.memory_space<vmem>>, vector<32x256xf32>
    %c0_2 = arith.constant 0 : index
    %c0_3 = arith.constant 0 : index
    %4 = vector.load %arg3[%c0_2, %c0_3] : memref<32x384xbf16, #tpu.memory_space<vmem>>, vector<32x384xbf16>
    %c0_4 = arith.constant 0 : index
    %c0_5 = arith.constant 0 : index
    %5 = vector.load %arg4[%c0_4, %c0_5] : memref<384x256xbf16, #tpu.memory_space<vmem>>, vector<384x256xbf16>
    %cst = arith.constant dense<0.000000e+00> : vector<32x256xf32>
    %6 = tpu.matmul %4, %5, %cst {dimension_numbers = #tpu.dot_dimension_numbers<[1], [0], [0], [1], [0, 0, 1, 1], [], []>} : vector<32x384xbf16>, vector<384x256xbf16>, vector<32x256xf32> -> vector<32x256xf32>
    %7 = arith.addf %3, %6 : vector<32x256xf32>
    %c0_6 = arith.constant 0 : index
    %c0_7 = arith.constant 0 : index
    %8 = vector.load %arg7[%c0_6, %c0_7] : memref<32x256xf32, #tpu.memory_space<vmem>>, vector<32x256xf32>
    tpu.vector_store %arg7[%c0_6, %c0_7], %7 {strides = array<i32>} : memref<32x256xf32, #tpu.memory_space<vmem>>, vector<32x256xf32>,
    %c5_i32 = arith.constant 5 : i32
    %9 = arith.cmpi eq, %arg2, %c5_i32 : i32
    %10 = arith.extui %9 : i1 to i32
    %c0_i32_8 = arith.constant 0 : i32
    %11 = arith.cmpi ne, %10, %c0_i32_8 : i32
    scf.if %11 {
      %c0_9 = arith.constant 0 : index
      %c0_10 = arith.constant 0 : index
      %12 = vector.load %arg7[%c0_9, %c0_10] : memref<32x256xf32, #tpu.memory_space<vmem>>, vector<32x256xf32>
      %c0_11 = arith.constant 0 : index
      %c0_12 = arith.constant 0 : index
      %13 = vector.load %arg5[%c0_11, %c0_12] : memref<1x256xf32, #tpu.memory_space<vmem>>, vector<1x256xf32>
      %14 = vector.broadcast %13 : vector<1x256xf32> to vector<32x256xf32>
      %15 = arith.addf %12, %14 : vector<32x256xf32>
      %cst_13 = arith.constant 0.000000e+00 : f32
      %16 = vector.broadcast %cst_13 : f32 to vector<32x256xf32>
      %17 = arith.maximumf %15, %16 : vector<32x256xf32>
      %18 = arith.truncf %17 : vector<32x256xf32> to vector<32x256xbf16>
      %c0_14 = arith.constant 0 : index
      %c0_15 = arith.constant 0 : index
      %19 = vector.load %arg6[%c0_14, %c0_15] : memref<32x256xbf16, #tpu.memory_space<vmem>>, vector<32x256xbf16>
      tpu.vector_store %arg6[%c0_14, %c0_15], %18 {strides = array<i32>} : memref<32x256xbf16, #tpu.memory_space<vmem>>, vector<32x256xbf16>,
    } else {
    }
    return
  }
  func.func @transform_0(%arg0: i32, %arg1: i32, %arg2: i32) -> (i32, i32) {
    %c0_i32 = arith.constant 0 : i32
    return %arg0, %arg2 : i32, i32
  }
  func.func @transform_1(%arg0: i32, %arg1: i32, %arg2: i32) -> (i32, i32) {
    %c0_i32 = arith.constant 0 : i32
    return %arg2, %arg1 : i32, i32
  }
  func.func @transform_2(%arg0: i32, %arg1: i32, %arg2: i32) -> (i32, i32) {
    %c0_i32 = arith.constant 0 : i32
    %c0_i32_0 = arith.constant 0 : i32
    return %c0_i32, %arg1 : i32, i32
  }
  func.func @transform_3(%arg0: i32, %arg1: i32, %arg2: i32) -> (i32, i32) {
    %c0_i32 = arith.constant 0 : i32
    return %arg0, %arg1 : i32, i32
  }
}

module attributes {stable_mosaic.version = 11 : i64} {
  func.func @_mm_bias_kernel(%arg0: i32, %arg1: i32, %arg2: i32, %arg3: memref<32x384xbf16, #tpu.memory_space<vmem>>, %arg4: memref<384x256xbf16, #tpu.memory_space<vmem>>, %arg5: memref<1x256xf32, #tpu.memory_space<vmem>>, %arg6: memref<32x256xbf16, #tpu.memory_space<vmem>>, %arg7: memref<32x256xf32, #tpu.memory_space<vmem>>) attributes {dimension_semantics = [#tpu.dimension_semantics<parallel>, #tpu.dimension_semantics<parallel>, #tpu.dimension_semantics<arbitrary>], iteration_bounds = array<i64: 1, 1, 9>, scalar_prefetch = 0 : i64, scratch_operands = 1 : i64, tpu.core_type = #tpu.core_type<tc>, window_params = [{transform_indices = @transform_0, window_bounds = array<i64: 32, 384>}, {transform_indices = @transform_1, window_bounds = array<i64: 384, 256>}, {transform_indices = @transform_2, window_bounds = array<i64: 1, 256>}, {transform_indices = @transform_3, window_bounds = array<i64: 32, 256>}]} {
    %c0_i32 = arith.constant 0 : i32
    %0 = arith.cmpi eq, %arg2, %c0_i32 : i32
    %1 = arith.extui %0 : i1 to i32
    %c0_i32_0 = arith.constant 0 : i32
    %2 = arith.cmpi ne, %1, %c0_i32_0 : i32
    scf.if %2 {
      %cst_9 = arith.constant 0.000000e+00 : f32
      %12 = vector.broadcast %cst_9 : f32 to vector<32x256xf32>
      %c0_10 = arith.constant 0 : index
      %c0_11 = arith.constant 0 : index
      %13 = vector.load %arg7[%c0_10, %c0_11] : memref<32x256xf32, #tpu.memory_space<vmem>>, vector<32x256xf32>
      tpu.vector_store %arg7[%c0_10, %c0_11], %12 {strides = array<i32>} : memref<32x256xf32, #tpu.memory_space<vmem>>, vector<32x256xf32>,
    } else {
    }
    %c0 = arith.constant 0 : index
    %c0_1 = arith.constant 0 : index
    %3 = vector.load %arg7[%c0, %c0_1] : memref<32x256xf32, #tpu.memory_space<vmem>>, vector<32x256xf32>
    %c0_2 = arith.constant 0 : index
    %c0_3 = arith.constant 0 : index
    %4 = vector.load %arg3[%c0_2, %c0_3] : memref<32x384xbf16, #tpu.memory_space<vmem>>, vector<32x384xbf16>
    %c0_4 = arith.constant 0 : index
    %c0_5 = arith.constant 0 : index
    %5 = vector.load %arg4[%c0_4, %c0_5] : memref<384x256xbf16, #tpu.memory_space<vmem>>, vector<384x256xbf16>
    %cst = arith.constant dense<0.000000e+00> : vector<32x256xf32>
    %6 = tpu.matmul %4, %5, %cst {dimension_numbers = #tpu.dot_dimension_numbers<[1], [0], [0], [1], [0, 0, 1, 1], [], []>} : vector<32x384xbf16>, vector<384x256xbf16>, vector<32x256xf32> -> vector<32x256xf32>
    %7 = arith.addf %3, %6 : vector<32x256xf32>
    %c0_6 = arith.constant 0 : index
    %c0_7 = arith.constant 0 : index
    %8 = vector.load %arg7[%c0_6, %c0_7] : memref<32x256xf32, #tpu.memory_space<vmem>>, vector<32x256xf32>
    tpu.vector_store %arg7[%c0_6, %c0_7], %7 {strides = array<i32>} : memref<32x256xf32, #tpu.memory_space<vmem>>, vector<32x256xf32>,
    %c8_i32 = arith.constant 8 : i32
    %9 = arith.cmpi eq, %arg2, %c8_i32 : i32
    %10 = arith.extui %9 : i1 to i32
    %c0_i32_8 = arith.constant 0 : i32
    %11 = arith.cmpi ne, %10, %c0_i32_8 : i32
    scf.if %11 {
      %c0_9 = arith.constant 0 : index
      %c0_10 = arith.constant 0 : index
      %12 = vector.load %arg7[%c0_9, %c0_10] : memref<32x256xf32, #tpu.memory_space<vmem>>, vector<32x256xf32>
      %c0_11 = arith.constant 0 : index
      %c0_12 = arith.constant 0 : index
      %13 = vector.load %arg5[%c0_11, %c0_12] : memref<1x256xf32, #tpu.memory_space<vmem>>, vector<1x256xf32>
      %14 = vector.broadcast %13 : vector<1x256xf32> to vector<32x256xf32>
      %15 = arith.addf %12, %14 : vector<32x256xf32>
      %cst_13 = arith.constant 0.000000e+00 : f32
      %16 = vector.broadcast %cst_13 : f32 to vector<32x256xf32>
      %17 = arith.maximumf %15, %16 : vector<32x256xf32>
      %18 = arith.truncf %17 : vector<32x256xf32> to vector<32x256xbf16>
      %c0_14 = arith.constant 0 : index
      %c0_15 = arith.constant 0 : index
      %19 = vector.load %arg6[%c0_14, %c0_15] : memref<32x256xbf16, #tpu.memory_space<vmem>>, vector<32x256xbf16>
      tpu.vector_store %arg6[%c0_14, %c0_15], %18 {strides = array<i32>} : memref<32x256xbf16, #tpu.memory_space<vmem>>, vector<32x256xbf16>,
    } else {
    }
    return
  }
  func.func @transform_0(%arg0: i32, %arg1: i32, %arg2: i32) -> (i32, i32) {
    %c0_i32 = arith.constant 0 : i32
    return %arg0, %arg2 : i32, i32
  }
  func.func @transform_1(%arg0: i32, %arg1: i32, %arg2: i32) -> (i32, i32) {
    %c0_i32 = arith.constant 0 : i32
    return %arg2, %arg1 : i32, i32
  }
  func.func @transform_2(%arg0: i32, %arg1: i32, %arg2: i32) -> (i32, i32) {
    %c0_i32 = arith.constant 0 : i32
    %c0_i32_0 = arith.constant 0 : i32
    return %c0_i32, %arg1 : i32, i32
  }
  func.func @transform_3(%arg0: i32, %arg1: i32, %arg2: i32) -> (i32, i32) {
    %c0_i32 = arith.constant 0 : i32
    return %arg0, %arg1 : i32, i32
  }
}

module attributes {stable_mosaic.version = 11 : i64} {
  func.func @_maxpool_kernel(%arg0: i32, %arg1: memref<4x2x2x512xbf16, #tpu.memory_space<vmem>>, %arg2: memref<4x2x256xbf16, #tpu.memory_space<vmem>>) attributes {dimension_semantics = [#tpu.dimension_semantics<arbitrary>], iteration_bounds = array<i64: 1>, scalar_prefetch = 0 : i64, scratch_operands = 0 : i64, tpu.core_type = #tpu.core_type<tc>, window_params = [{pipeline_mode = #tpu.pipeline_mode<synchronous>, transform_indices = @transform_0, window_bounds = array<i64: 4, 2, 2, 512>}, {pipeline_mode = #tpu.pipeline_mode<synchronous>, transform_indices = @transform_1, window_bounds = array<i64: 4, 2, 256>}]} {
    %c0 = arith.constant 0 : index
    %c0_0 = arith.constant 0 : index
    %c0_1 = arith.constant 0 : index
    %c0_2 = arith.constant 0 : index
    %0 = vector.load %arg1[%c0, %c0_0, %c0_1, %c0_2] : memref<4x2x2x512xbf16, #tpu.memory_space<vmem>>, vector<4x1x2x512xbf16>
    %1 = vector.shape_cast %0 : vector<4x1x2x512xbf16> to vector<4x2x512xbf16>
    %c0_3 = arith.constant 0 : index
    %c1 = arith.constant 1 : index
    %c0_4 = arith.constant 0 : index
    %c0_5 = arith.constant 0 : index
    %2 = vector.load %arg1[%c0_3, %c1, %c0_4, %c0_5] : memref<4x2x2x512xbf16, #tpu.memory_space<vmem>>, vector<4x1x2x512xbf16>
    %3 = vector.shape_cast %2 : vector<4x1x2x512xbf16> to vector<4x2x512xbf16>
    %4 = arith.maximumf %1, %3 : vector<4x2x512xbf16>
    %5 = vector.extract_strided_slice %4 {offsets = [0, 0, 0], sizes = [4, 2, 256], strides = [1, 1, 1]} : vector<4x2x512xbf16> to vector<4x2x256xbf16>
    %6 = vector.extract_strided_slice %4 {offsets = [0, 0, 256], sizes = [4, 2, 256], strides = [1, 1, 1]} : vector<4x2x512xbf16> to vector<4x2x256xbf16>
    %7 = arith.maximumf %5, %6 : vector<4x2x256xbf16>
    %c0_6 = arith.constant 0 : index
    %c0_7 = arith.constant 0 : index
    %c0_8 = arith.constant 0 : index
    %8 = vector.load %arg2[%c0_6, %c0_7, %c0_8] : memref<4x2x256xbf16, #tpu.memory_space<vmem>>, vector<4x2x256xbf16>
    tpu.vector_store %arg2[%c0_6, %c0_7, %c0_8], %7 {strides = array<i32>} : memref<4x2x256xbf16, #tpu.memory_space<vmem>>, vector<4x2x256xbf16>,
    return
  }
  func.func @transform_0(%arg0: i32) -> (i32, i32, i32, i32) {
    %c0_i32 = arith.constant 0 : i32
    %c0_i32_0 = arith.constant 0 : i32
    %c0_i32_1 = arith.constant 0 : i32
    %c0_i32_2 = arith.constant 0 : i32
    %c0_i32_3 = arith.constant 0 : i32
    return %c0_i32, %c0_i32_0, %c0_i32_1, %c0_i32_2 : i32, i32, i32, i32
  }
  func.func @transform_1(%arg0: i32) -> (i32, i32, i32) {
    %c0_i32 = arith.constant 0 : i32
    %c0_i32_0 = arith.constant 0 : i32
    %c0_i32_1 = arith.constant 0 : i32
    %c0_i32_2 = arith.constant 0 : i32
    return %c0_i32, %c0_i32_0, %c0_i32_1 : i32, i32, i32
  }
}

module attributes {stable_mosaic.version = 11 : i64} {
  func.func @_fc_head_kernel(%arg0: i32, %arg1: memref<8x1024xbf16, #tpu.memory_space<vmem>>, %arg2: memref<1024x256xbf16, #tpu.memory_space<vmem>>, %arg3: memref<1x256xf32, #tpu.memory_space<vmem>>, %arg4: memref<256x256xbf16, #tpu.memory_space<vmem>>, %arg5: memref<1x256xf32, #tpu.memory_space<vmem>>, %arg6: memref<256x128xbf16, #tpu.memory_space<vmem>>, %arg7: memref<1x128xf32, #tpu.memory_space<vmem>>, %arg8: memref<8x128xf32, #tpu.memory_space<vmem>>) attributes {dimension_semantics = [#tpu.dimension_semantics<arbitrary>], iteration_bounds = array<i64: 1>, scalar_prefetch = 0 : i64, scratch_operands = 0 : i64, tpu.core_type = #tpu.core_type<tc>, window_params = [{pipeline_mode = #tpu.pipeline_mode<synchronous>, transform_indices = @transform_0, window_bounds = array<i64: 8, 1024>}, {pipeline_mode = #tpu.pipeline_mode<synchronous>, transform_indices = @transform_1, window_bounds = array<i64: 1024, 256>}, {pipeline_mode = #tpu.pipeline_mode<synchronous>, transform_indices = @transform_2, window_bounds = array<i64: 1, 256>}, {pipeline_mode = #tpu.pipeline_mode<synchronous>, transform_indices = @transform_3, window_bounds = array<i64: 256, 256>}, {pipeline_mode = #tpu.pipeline_mode<synchronous>, transform_indices = @transform_4, window_bounds = array<i64: 1, 256>}, {pipeline_mode = #tpu.pipeline_mode<synchronous>, transform_indices = @transform_5, window_bounds = array<i64: 256, 128>}, {pipeline_mode = #tpu.pipeline_mode<synchronous>, transform_indices = @transform_6, window_bounds = array<i64: 1, 128>}, {pipeline_mode = #tpu.pipeline_mode<synchronous>, transform_indices = @transform_7, window_bounds = array<i64: 8, 128>}]} {
    %c0 = arith.constant 0 : index
    %c0_0 = arith.constant 0 : index
    %0 = vector.load %arg1[%c0, %c0_0] : memref<8x1024xbf16, #tpu.memory_space<vmem>>, vector<8x1024xbf16>
    %c0_1 = arith.constant 0 : index
    %c0_2 = arith.constant 0 : index
    %1 = vector.load %arg2[%c0_1, %c0_2] : memref<1024x256xbf16, #tpu.memory_space<vmem>>, vector<1024x256xbf16>
    %cst = arith.constant dense<0.000000e+00> : vector<8x256xf32>
    %2 = tpu.matmul %0, %1, %cst {dimension_numbers = #tpu.dot_dimension_numbers<[1], [0], [0], [1], [0, 0, 1, 1], [], []>} : vector<8x1024xbf16>, vector<1024x256xbf16>, vector<8x256xf32> -> vector<8x256xf32>
    %c0_3 = arith.constant 0 : index
    %c0_4 = arith.constant 0 : index
    %3 = vector.load %arg3[%c0_3, %c0_4] : memref<1x256xf32, #tpu.memory_space<vmem>>, vector<1x256xf32>
    %4 = vector.broadcast %3 : vector<1x256xf32> to vector<8x256xf32>
    %5 = arith.addf %2, %4 : vector<8x256xf32>
    %cst_5 = arith.constant 0.000000e+00 : f32
    %6 = vector.broadcast %cst_5 : f32 to vector<8x256xf32>
    %7 = arith.maximumf %5, %6 : vector<8x256xf32>
    %8 = arith.truncf %7 : vector<8x256xf32> to vector<8x256xbf16>
    %c0_6 = arith.constant 0 : index
    %c0_7 = arith.constant 0 : index
    %9 = vector.load %arg4[%c0_6, %c0_7] : memref<256x256xbf16, #tpu.memory_space<vmem>>, vector<256x256xbf16>
    %cst_8 = arith.constant dense<0.000000e+00> : vector<8x256xf32>
    %10 = tpu.matmul %8, %9, %cst_8 {dimension_numbers = #tpu.dot_dimension_numbers<[1], [0], [0], [1], [0, 0, 1, 1], [], []>} : vector<8x256xbf16>, vector<256x256xbf16>, vector<8x256xf32> -> vector<8x256xf32>
    %c0_9 = arith.constant 0 : index
    %c0_10 = arith.constant 0 : index
    %11 = vector.load %arg5[%c0_9, %c0_10] : memref<1x256xf32, #tpu.memory_space<vmem>>, vector<1x256xf32>
    %12 = vector.broadcast %11 : vector<1x256xf32> to vector<8x256xf32>
    %13 = arith.addf %10, %12 : vector<8x256xf32>
    %cst_11 = arith.constant 0.000000e+00 : f32
    %14 = vector.broadcast %cst_11 : f32 to vector<8x256xf32>
    %15 = arith.maximumf %13, %14 : vector<8x256xf32>
    %16 = arith.truncf %15 : vector<8x256xf32> to vector<8x256xbf16>
    %c0_12 = arith.constant 0 : index
    %c0_13 = arith.constant 0 : index
    %17 = vector.load %arg6[%c0_12, %c0_13] : memref<256x128xbf16, #tpu.memory_space<vmem>>, vector<256x128xbf16>
    %cst_14 = arith.constant dense<0.000000e+00> : vector<8x128xf32>
    %18 = tpu.matmul %16, %17, %cst_14 {dimension_numbers = #tpu.dot_dimension_numbers<[1], [0], [0], [1], [0, 0, 1, 1], [], []>} : vector<8x256xbf16>, vector<256x128xbf16>, vector<8x128xf32> -> vector<8x128xf32>
    %c0_15 = arith.constant 0 : index
    %c0_16 = arith.constant 0 : index
    %19 = vector.load %arg7[%c0_15, %c0_16] : memref<1x128xf32, #tpu.memory_space<vmem>>, vector<1x128xf32>
    %20 = vector.broadcast %19 : vector<1x128xf32> to vector<8x128xf32>
    %21 = arith.addf %18, %20 : vector<8x128xf32>
    %c0_17 = arith.constant 0 : index
    %c0_18 = arith.constant 0 : index
    %22 = vector.load %arg8[%c0_17, %c0_18] : memref<8x128xf32, #tpu.memory_space<vmem>>, vector<8x128xf32>
    tpu.vector_store %arg8[%c0_17, %c0_18], %21 {strides = array<i32>} : memref<8x128xf32, #tpu.memory_space<vmem>>, vector<8x128xf32>,
    return
  }
  func.func @transform_0(%arg0: i32) -> (i32, i32) {
    %c0_i32 = arith.constant 0 : i32
    %c0_i32_0 = arith.constant 0 : i32
    %c0_i32_1 = arith.constant 0 : i32
    return %c0_i32, %c0_i32_0 : i32, i32
  }
  func.func @transform_1(%arg0: i32) -> (i32, i32) {
    %c0_i32 = arith.constant 0 : i32
    %c0_i32_0 = arith.constant 0 : i32
    %c0_i32_1 = arith.constant 0 : i32
    return %c0_i32, %c0_i32_0 : i32, i32
  }
  func.func @transform_2(%arg0: i32) -> (i32, i32) {
    %c0_i32 = arith.constant 0 : i32
    %c0_i32_0 = arith.constant 0 : i32
    %c0_i32_1 = arith.constant 0 : i32
    return %c0_i32, %c0_i32_0 : i32, i32
  }
  func.func @transform_3(%arg0: i32) -> (i32, i32) {
    %c0_i32 = arith.constant 0 : i32
    %c0_i32_0 = arith.constant 0 : i32
    %c0_i32_1 = arith.constant 0 : i32
    return %c0_i32, %c0_i32_0 : i32, i32
  }
  func.func @transform_4(%arg0: i32) -> (i32, i32) {
    %c0_i32 = arith.constant 0 : i32
    %c0_i32_0 = arith.constant 0 : i32
    %c0_i32_1 = arith.constant 0 : i32
    return %c0_i32, %c0_i32_0 : i32, i32
  }
  func.func @transform_5(%arg0: i32) -> (i32, i32) {
    %c0_i32 = arith.constant 0 : i32
    %c0_i32_0 = arith.constant 0 : i32
    %c0_i32_1 = arith.constant 0 : i32
    return %c0_i32, %c0_i32_0 : i32, i32
  }
  func.func @transform_6(%arg0: i32) -> (i32, i32) {
    %c0_i32 = arith.constant 0 : i32
    %c0_i32_0 = arith.constant 0 : i32
    %c0_i32_1 = arith.constant 0 : i32
    return %c0_i32, %c0_i32_0 : i32, i32
  }
  func.func @transform_7(%arg0: i32) -> (i32, i32) {
    %c0_i32 = arith.constant 0 : i32
    %c0_i32_0 = arith.constant 0 : i32
    %c0_i32_1 = arith.constant 0 : i32
    return %c0_i32, %c0_i32_0 : i32, i32
  }
}

</mosaic_0001>

<bundles_post_ra>
// kernel: alexnet_forward.9
= control target key start
LH: loop header
LB: loop body
LE: loop exit
PB: predicated region body
PF: predicated region fallthrough
CT: control target
= control target key end

     0   :  { %s1059_s12 = smov 0   ;;  %s1061_s13 = smov 0   ;;  %s1146_s0 = inlined_call_operand.vmem [shape: bf16[640,128], index: 0, kind: input, shape index: {}]   ;;  %s1147_s1 = inlined_call_operand.vmem [shape: bf16[128,128], index: 1, kind: input, shape index: {}]   ;;  %s1148_s2 = inlined_call_operand.vmem [shape: f32[1,128], index: 2, kind: input, shape index: {}]   ;;  %s1149_s3 = inlined_call_operand.vmem [shape: bf16[640,128], index: 3, kind: output, shape index: {}]  }
   0x1   :  { %s1063_s14 = smov 0  }
   0x2 LB: > { %s32_s15 = sadd.s32 1, %s1033_s13  ;;  %p808_p0 = scmp.ge.s32.totalorder %s1037_s14, 1  ;;  %s1037_s14 = sphi %s1063_s14, %s13_s14   ;;  %s1033_s13 = sphi %s1061_s13, %s1151_s13   ;;  %s1029_s12 = sphi %s1059_s12, %s1150_s12  }
   0x3   : > { %p34_p1 = scmp.ge.s32.totalorder %s32_s15, 5  ;;  %p188_p2 = scmp.lt.s32.totalorder %s1037_s14, 6 }
   0x5   : > { %s1153_s15 = smov (%p34_p1, %s32_s15), 0  ;;  %p189_p3 = pnand %p808_p0, %p188_p2 }
   0x6   : > { %v999_v0 = vld [vmem:[%s1147_s1] sm:$0xff] (!%p189_p3)   ;;  %s809_s18 = sshll.u32 (!%p189_p3), %s1029_s12, 4  ;;  %v1000_v1 = vld [vmem:[%s1147_s1 + $0x8] sm:$0xff] (!%p189_p3)   ;;  %v1001_v2 = vld [vmem:[%s1147_s1 + $0x10] sm:$0xff] (!%p189_p3)  }
   0x7   : > { %192 = sbr.rel (%p189_p3) target bundleno = 269 (0x10d), region = 32  ;;  %p230_p4 = scmp.lt.s32.totalorder (!%p189_p3), %s809_s18, 79  ;;  %927 = vmatprep.subr.bf16.mxu0 (!%p189_p3), %v999_v0  ;;  %959 = vmatprep.subr.bf16.mxu1 (!%p189_p3), %v999_v0  ;;  %v1002_v3 = vld [vmem:[%s1147_s1 + $0x18] sm:$0xff] (!%p189_p3)   ;;  %v1003_v6 = vld [vmem:[%s1147_s1 + $0x20] sm:$0xff] (!%p189_p3)   ;;  %v1004_v7 = vld [vmem:[%s1147_s1 + $0x28] sm:$0xff] (!%p189_p3)  }
   0x8   : > { %928 = vmatpush3.bf16.msra.mxu0 (!%p189_p3), %v999_v0  ;;  %967 = vmatpush3.bf16.msra.mxu1 (!%p189_p3), %v999_v0  ;;  %v1005_v8 = vld [vmem:[%s1147_s1 + $0x30] sm:$0xff] (!%p189_p3)   ;;  %v1006_v9 = vld [vmem:[%s1147_s1 + $0x38] sm:$0xff] (!%p189_p3)   ;;  %v829_v16 = vld [vmem:[%s1148_s2] ss:$0 sm:$0xff] (!%p189_p3) }
   0x9   : > { %929 = vmatprep.subr.bf16.mxu0 (!%p189_p3), %v1000_v1  ;;  %960 = vmatprep.subr.bf16.mxu1 (!%p189_p3), %v1000_v1 }
   0xc   : > { %930 = vmatpush3.bf16.msra.mxu0 (!%p189_p3), %v1000_v1  ;;  %968 = vmatpush3.bf16.msra.mxu1 (!%p189_p3), %v1000_v1 }
   0xd   : > { %931 = vmatprep.subr.bf16.mxu0 (!%p189_p3), %v1001_v2  ;;  %961 = vmatprep.subr.bf16.mxu1 (!%p189_p3), %v1001_v2 }
   0xe   : > { %s1155_s18 = smov (!%p230_p4, %s809_s18), 79 }
   0xf   : > { %s810_s23 = sshll.u32 %s1155_s18, 2 }
  0x10   : > { %s1094_s26 = scalar_lea.vmem %s1146_s0, %s810_s23  ;;  %932 = vmatpush3.bf16.msra.mxu0 %v1001_v2  ;;  %969 = vmatpush3.bf16.msra.mxu1 %v1001_v2  ;;  %s1127_s17 = scalar_lea.vmem %s1149_s3, %s810_s23 }
  0x11   : > { %v1007_v4 = vld [vmem:[%s1094_s26] sm:$0xff]   ;;  %933 = vmatprep.subr.bf16.mxu0 %v1002_v3  ;;  %962 = vmatprep.subr.bf16.mxu1 %v1002_v3  ;;  %v1009_v10 = vld [vmem:[%s1094_s26 + $0x8] sm:$0xff]   ;;  %v1011_v12 = vld [vmem:[%s1094_s26 + $0x10] sm:$0xff]  }
  0x12   : > { %v1008_v5 = vld [vmem:[%s1094_s26 + $0x20] sm:$0xff]   ;;  %943 = vmatprep.mubr.bf16.mxu0 %v1007_v4  ;;  %v1010_v11 = vld [vmem:[%s1094_s26 + $0x28] sm:$0xff]   ;;  %v1012_v13 = vld [vmem:[%s1094_s26 + $0x30] sm:$0xff]  }
  0x13   : > { %951 = vmatprep.mubr.bf16.mxu1 %v1008_v5  ;;  %v1013_v14 = vld [vmem:[%s1094_s26 + $0x18] sm:$0xff]  }
  0x14   : > { %934 = vmatpush3.bf16.msra.mxu0 %v1002_v3  ;;  %970 = vmatpush3.bf16.msra.mxu1 %v1002_v3  ;;  %v1014_v15 = vld [vmem:[%s1094_s26 + $0x38] sm:$0xff]  }
  0x15   : > { %935 = vmatprep.subr.bf16.mxu0 %v1003_v6  ;;  %963 = vmatprep.subr.bf16.mxu1 %v1003_v6 }
  0x18   : > { %936 = vmatpush3.bf16.msra.mxu0 %v1003_v6  ;;  %971 = vmatpush3.bf16.msra.mxu1 %v1003_v6 }
  0x19   : > { %937 = vmatprep.subr.bf16.mxu0 %v1004_v7  ;;  %964 = vmatprep.subr.bf16.mxu1 %v1004_v7 }
  0x1c   : > { %938 = vmatpush3.bf16.msra.mxu0 %v1004_v7  ;;  %972 = vmatpush3.bf16.msra.mxu1 %v1004_v7 }
  0x1d   : > { %939 = vmatprep.subr.bf16.mxu0 %v1005_v8  ;;  %965 = vmatprep.subr.bf16.mxu1 %v1005_v8 }
  0x20   : > { %940 = vmatpush3.bf16.msra.mxu0 %v1005_v8  ;;  %973 = vmatpush3.bf16.msra.mxu1 %v1005_v8 }
  0x21   : > { %941 = vmatprep.subr.bf16.mxu0 %v1006_v9  ;;  %966 = vmatprep.subr.bf16.mxu1 %v1006_v9 }
  0x24   : > { %942 = vmatpush3.bf16.msra.mxu0 %v1006_v9  ;;  %974 = vmatpush3.bf16.msra.mxu1 %v1006_v9 }
  0x27   : > { %944 = vmatmul.mubr.bf16.vlgmr.msra.gmra.mrb[0].mxu0 %v1009_v10  ;;  %952 = vmatmul.mubr.bf16.vlgmr.msra.gmra.mrb[0].mxu1 %v1010_v11 }
  0x28   : > { %947 = vmatprep.mubr.bf16.mxu0 %v1011_v12  ;;  %955 = vmatprep.mubr.bf16.mxu1 %v1012_v13 }
  0x2f   : > { %948 = vmatmul.mubr.bf16.gmra.mrb[4].mxu0 %v1013_v14  ;;  %956 = vmatmul.mubr.bf16.gmra.mrb[4].mxu1 %v1014_v15 }
  0xfa   : > { %v945_v17 = vpop.f32.mrb[0].mxu0  ;;  %v953_v18 = vpop.f32.mrb[0].mxu1 }
  0xfb   : > { %v581_v19 = vadd.f32 %v945_v17, %v829_v16  ;;  %v589_v20 = vadd.f32 %v953_v18, %v829_v16  ;;  %v458_v21 = vpop.f32.mrb[1].mxu0  ;;  %v490_v22 = vpop.f32.mrb[1].mxu1 }
  0xfc   : > { %v579_v23 = vadd.f32 %v829_v16, %v458_v21  ;;  %v587_v24 = vadd.f32 %v829_v16, %v490_v22  ;;  %v946_v25 = vpop.f32.mrb[2].mxu0  ;;  %v954_v26 = vpop.f32.mrb[2].mxu1 }
  0xfd   : > { %v582_v27 = vadd.f32 %v946_v25, %v829_v16  ;;  %v590_v28 = vadd.f32 %v954_v26, %v829_v16  ;;  %v461_v29 = vpop.f32.mrb[3].mxu0  ;;  %v493_v30 = vpop.f32.mrb[3].mxu1  ;;  %v597_v33 = vmax.f32 %v581_v19, 0.0  ;;  %v605_v34 = vmax.f32 %v589_v20, 0.0 }
  0xfe   : > { %v580_v31 = vadd.f32 %v829_v16, %v461_v29  ;;  %v588_v32 = vadd.f32 %v829_v16, %v493_v30  ;;  %v595_v37 = vmax.f32 %v579_v23, 0.0  ;;  %v603_v38 = vmax.f32 %v587_v24, 0.0 }
  0xff   : > { %v598_v35 = vmax.f32 %v582_v27, 0.0  ;;  %v606_v36 = vmax.f32 %v590_v28, 0.0 }
 0x100   : > { %v596_v39 = vmax.f32 %v580_v31, 0.0  ;;  %v604_v40 = vmax.f32 %v588_v32, 0.0 }
 0x101   : > { %v872_v41 = vpack.c.bf16 %v598_v35, %v597_v33  ;;  %v892_v42 = vpack.c.bf16 %v606_v36, %v605_v34 }
 0x102   : > { %v867_v43 = vpack.c.bf16 %v596_v39, %v595_v37  ;;  %v887_v44 = vpack.c.bf16 %v604_v40, %v603_v38  ;;  %v949_v45 = vpop.f32.mrb[4].mxu0  ;;  %v957_v46 = vpop.f32.mrb[4].mxu1 }
 0x103   : > { %904 = vst [vmem:[%s1127_s17 + $0x8] sm:$0xff] %v872_v41   ;;  %908 = vst [vmem:[%s1127_s17 + $0x28] sm:$0xff] %v892_v42   ;;  %v585_v47 = vadd.f32 %v949_v45, %v829_v16  ;;  %v593_v48 = vadd.f32 %v957_v46, %v829_v16  ;;  %v474_v49 = vpop.f32.mrb[5].mxu0  ;;  %v506_v50 = vpop.f32.mrb[5].mxu1 }
 0x104   : > { %868 = vst [vmem:[%s1127_s17] sm:$0xff] %v867_v43   ;;  %907 = vst [vmem:[%s1127_s17 + $0x20] sm:$0xff] %v887_v44   ;;  %v583_v51 = vadd.f32 %v829_v16, %v474_v49  ;;  %v591_v52 = vadd.f32 %v829_v16, %v506_v50  ;;  %v950_v53 = vpop.f32.mrb[6].mxu0  ;;  %v958_v54 = vpop.f32.mrb[6].mxu1 }
 0x105   : > { %v586_v55 = vadd.f32 %v950_v53, %v829_v16  ;;  %v594_v56 = vadd.f32 %v958_v54, %v829_v16  ;;  %v477_v57 = vpop.f32.mrb[7].mxu0  ;;  %v509_v58 = vpop.f32.mrb[7].mxu1  ;;  %v601_v61 = vmax.f32 %v585_v47, 0.0  ;;  %v609_v62 = vmax.f32 %v593_v48, 0.0 }
 0x106   : > { %v584_v59 = vadd.f32 %v829_v16, %v477_v57  ;;  %v592_v60 = vadd.f32 %v829_v16, %v509_v58  ;;  %v599_v1 = vmax.f32 %v583_v51, 0.0  ;;  %v607_v2 = vmax.f32 %v591_v52, 0.0 }
 0x107   : > { %v602_v63 = vmax.f32 %v586_v55, 0.0  ;;  %v610_v0 = vmax.f32 %v594_v56, 0.0 }
 0x108   : > { %v600_v3 = vmax.f32 %v584_v59, 0.0  ;;  %v608_v4 = vmax.f32 %v592_v60, 0.0 }
 0x109   : > { %v882_v5 = vpack.c.bf16 %v602_v63, %v601_v61  ;;  %v902_v6 = vpack.c.bf16 %v610_v0, %v609_v62 }
 0x10a   : > { %v877_v7 = vpack.c.bf16 %v600_v3, %v599_v1  ;;  %v897_v8 = vpack.c.bf16 %v608_v4, %v607_v2 }
 0x10b   : > { %906 = vst [vmem:[%s1127_s17 + $0x18] sm:$0xff] %v882_v5   ;;  %910 = vst [vmem:[%s1127_s17 + $0x38] sm:$0xff] %v902_v6  }
 0x10c   : > { %905 = vst [vmem:[%s1127_s17 + $0x10] sm:$0xff] %v877_v7   ;;  %909 = vst [vmem:[%s1127_s17 + $0x30] sm:$0xff] %v897_v8  }
 0x10d PF: > { %s13_s14 = sadd.s32 1, %s1037_s14   ;;  %s1150_s12 = smov %s1033_s13 }
 0x10e   : > { %p10_p5 = scmp.ge.s32.totalorder %s13_s14, 7   ;;  %s1151_s13 = smov %s1153_s15 }
 0x110   :  { %12 = sbr.rel (!%p10_p5) target bundleno = 2 (0x2), region = 76 }

// kernel: alexnet_forward.10
= control target key start
LH: loop header
LB: loop body
LE: loop exit
PB: predicated region body
PF: predicated region fallthrough
CT: control target
= control target key end

     0   :  { %s342_s0 = inlined_call_operand.vmem [shape: bf16[16,2,8,256], index: 0, kind: input, shape index: {}]   ;;  %s343_s1 = inlined_call_operand.vmem [shape: bf16[16,8,128], index: 1, kind: output, shape index: {}]  }
   0x1   :  { %v8_v0 = vld [vmem:[%s342_s0] sm:$0xff]  ;;  %v9_v1 = vld [vmem:[%s342_s0 + $0x10] sm:$0xff]  ;;  %v141_v2 = vld [vmem:[%s342_s0 + $0x8] sm:$0xff] }
   0x2   :  { %v142_v3 = vld [vmem:[%s342_s0 + $0x18] sm:$0xff]  ;;  %v41_v4 = vmax.bf16 %v141_v2, %v8_v0  ;;  %v10_v5 = vld [vmem:[%s342_s0 + $0x20] sm:$0xff]  ;;  %v11_v6 = vld [vmem:[%s342_s0 + $0x30] sm:$0xff] }
   0x3   :  { %v42_v7 = vmax.bf16 %v142_v3, %v9_v1  ;;  %v143_v8 = vld [vmem:[%s342_s0 + $0x28] sm:$0xff]  ;;  %v144_v9 = vld [vmem:[%s342_s0 + $0x38] sm:$0xff]  ;;  %v12_v10 = vld [vmem:[%s342_s0 + $0x40] sm:$0xff] }
   0x4   :  { %v73_v11 = vrot.slane %v41_v4, 4  ;;  %v43_v12 = vmax.bf16 %v143_v8, %v10_v5  ;;  %v44_v13 = vmax.bf16 %v144_v9, %v11_v6  ;;  %v13_v14 = vld [vmem:[%s342_s0 + $0x50] sm:$0xff]  ;;  %v145_v15 = vld [vmem:[%s342_s0 + $0x48] sm:$0xff]  ;;  %v146_v16 = vld [vmem:[%s342_s0 + $0x58] sm:$0xff] }
   0x5   :  { %v74_v17 = vrot.slane %v42_v7, 4  ;;  %v45_v18 = vmax.bf16 %v145_v15, %v12_v10  ;;  %v46_v19 = vmax.bf16 %v146_v16, %v13_v14  ;;  %v14_v20 = vld [vmem:[%s342_s0 + $0x60] sm:$0xff]  ;;  %v15_v21 = vld [vmem:[%s342_s0 + $0x70] sm:$0xff]  ;;  %v147_v22 = vld [vmem:[%s342_s0 + $0x68] sm:$0xff] }
   0x6   :  { %v105_v23 = vmax.bf16 %v73_v11, %v41_v4  ;;  %v75_v24 = vrot.slane %v43_v12, 4  ;;  %v76_v25 = vrot.slane %v44_v13, 4  ;;  %v148_v26 = vld [vmem:[%s342_s0 + $0x78] sm:$0xff]  ;;  %v47_v27 = vmax.bf16 %v147_v22, %v14_v20  ;;  %v16_v28 = vld [vmem:[%s342_s0 + $0x80] sm:$0xff]  ;;  %v17_v29 = vld [vmem:[%s342_s0 + $0x90] sm:$0xff] }
   0x7   :  { %v106_v30 = vmax.bf16 %v74_v17, %v42_v7  ;;  %v77_v31 = vrot.slane %v45_v18, 4  ;;  %v78_v32 = vrot.slane %v46_v19, 4  ;;  %v48_v33 = vmax.bf16 %v148_v26, %v15_v21  ;;  %v149_v34 = vld [vmem:[%s342_s0 + $0x88] sm:$0xff]  ;;  %v150_v35 = vld [vmem:[%s342_s0 + $0x98] sm:$0xff]  ;;  %v18_v36 = vld [vmem:[%s342_s0 + $0xa0] sm:$0xff] }
   0x8   :  { %v107_v37 = vmax.bf16 %v75_v24, %v43_v12  ;;  %v108_v38 = vmax.bf16 %v76_v25, %v44_v13  ;;  %v79_v39 = vrot.slane %v47_v27, 4  ;;  %v49_v40 = vmax.bf16 %v149_v34, %v16_v28  ;;  %v19_v41 = vld [vmem:[%s342_s0 + $0xb0] sm:$0xff]  ;;  %v151_v42 = vld [vmem:[%s342_s0 + $0xa8] sm:$0xff]  ;;  %v152_v43 = vld [vmem:[%s342_s0 + $0xb8] sm:$0xff] }
   0x9   :  { %v197_v44 = vcombine.low %v105_v23, %v106_v30  ;;  %v109_v45 = vmax.bf16 %v77_v31, %v45_v18  ;;  %v110_v46 = vmax.bf16 %v78_v32, %v46_v19  ;;  %v80_v47 = vrot.slane %v48_v33, 4  ;;  %v20_v48 = vld [vmem:[%s342_s0 + $0xc0] sm:$0xff]  ;;  %v21_v49 = vld [vmem:[%s342_s0 + $0xd0] sm:$0xff]  ;;  %v153_v50 = vld [vmem:[%s342_s0 + $0xc8] sm:$0xff] }
   0xa   :  { %v198_v51 = vcombine.low %v107_v37, %v108_v38  ;;  %v111_v52 = vmax.bf16 %v79_v39, %v47_v27  ;;  %v50_v53 = vmax.bf16 %v150_v35, %v17_v29  ;;  %v81_v54 = vrot.slane %v49_v40, 4  ;;  %v154_v55 = vld [vmem:[%s342_s0 + $0xd8] sm:$0xff]  ;;  %v22_v56 = vld [vmem:[%s342_s0 + $0xe0] sm:$0xff]  ;;  %v23_v61 = vld [vmem:[%s342_s0 + $0xf0] sm:$0xff] }
   0xb   :  { %161 = vst [vmem:[%s343_s1] sm:$0xff] %v197_v44   ;;  %v200_v57 = vcombine.low %v109_v45, %v110_v46  ;;  %v112_v58 = vmax.bf16 %v80_v47, %v48_v33  ;;  %v51_v59 = vmax.bf16 %v151_v42, %v18_v36  ;;  %v52_v60 = vmax.bf16 %v152_v43, %v19_v41  ;;  %v155_v62 = vld [vmem:[%s342_s0 + $0xe8] sm:$0xff]  ;;  %v156_v63 = vld [vmem:[%s342_s0 + $0xf8] sm:$0xff] }
   0xc   :  { %199 = vst [vmem:[%s343_s1 + $0x8] sm:$0xff] %v198_v51   ;;  %v82_v0 = vrot.slane %v50_v53, 4  ;;  %v113_v1 = vmax.bf16 %v81_v54, %v49_v40  ;;  %v53_v2 = vmax.bf16 %v153_v50, %v20_v48  ;;  %v54_v3 = vmax.bf16 %v154_v55, %v21_v49 }
   0xd   :  { %201 = vst [vmem:[%s343_s1 + $0x10] sm:$0xff] %v200_v57   ;;  %v202_v4 = vcombine.low %v111_v52, %v112_v58  ;;  %v83_v5 = vrot.slane %v51_v59, 4  ;;  %v84_v6 = vrot.slane %v52_v60, 4  ;;  %v55_v7 = vmax.bf16 %v155_v62, %v22_v56 }
   0xe   :  { %v114_v8 = vmax.bf16 %v82_v0, %v50_v53  ;;  %v85_v9 = vrot.slane %v53_v2, 4  ;;  %v86_v10 = vrot.slane %v54_v3, 4  ;;  %v56_v11 = vmax.bf16 %v156_v63, %v23_v61 }
   0xf   :  { %203 = vst [vmem:[%s343_s1 + $0x18] sm:$0xff] %v202_v4   ;;  %v115_v12 = vmax.bf16 %v83_v5, %v51_v59  ;;  %v116_v13 = vmax.bf16 %v84_v6, %v52_v60  ;;  %v87_v14 = vrot.slane %v55_v7, 4 }
  0x10   :  { %v204_v15 = vcombine.low %v113_v1, %v114_v8  ;;  %v117_v16 = vmax.bf16 %v85_v9, %v53_v2  ;;  %v118_v17 = vmax.bf16 %v86_v10, %v54_v3  ;;  %v88_v18 = vrot.slane %v56_v11, 4 }
  0x11   :  { %v206_v19 = vcombine.low %v115_v12, %v116_v13  ;;  %v119_v20 = vmax.bf16 %v87_v14, %v55_v7 }
  0x12   :  { %205 = vst [vmem:[%s343_s1 + $0x20] sm:$0xff] %v204_v15   ;;  %v208_v21 = vcombine.low %v117_v16, %v118_v17  ;;  %v120_v22 = vmax.bf16 %v88_v18, %v56_v11 }
  0x13   :  { %207 = vst [vmem:[%s343_s1 + $0x28] sm:$0xff] %v206_v19  }
  0x14   :  { %209 = vst [vmem:[%s343_s1 + $0x30] sm:$0xff] %v208_v21   ;;  %v210_v23 = vcombine.low %v119_v20, %v120_v22 }
  0x16   :  { %211 = vst [vmem:[%s343_s1 + $0x38] sm:$0xff] %v210_v23  }

// kernel: alexnet_forward.12
= control target key start
LH: loop header
LB: loop body
LE: loop exit
PB: predicated region body
PF: predicated region fallthrough
CT: control target
= control target key end

     0   :  { %s182_s0 = inlined_call_operand.vmem [shape: bf16[8,2,4,512], index: 0, kind: input, shape index: {}]   ;;  %s183_s1 = inlined_call_operand.vmem [shape: bf16[8,4,256], index: 1, kind: output, shape index: {}]  }
   0x1   :  { %v8_v0 = vld [vmem:[%s182_s0] sm:$0xff]  ;;  %v9_v1 = vld [vmem:[%s182_s0 + $0x10] sm:$0xff]  ;;  %v77_v2 = vld [vmem:[%s182_s0 + $0x8] sm:$0xff] }
   0x2   :  { %v78_v3 = vld [vmem:[%s182_s0 + $0x18] sm:$0xff]  ;;  %v25_v4 = vmax.bf16 %v77_v2, %v8_v0  ;;  %v10_v5 = vld [vmem:[%s182_s0 + $0x20] sm:$0xff]  ;;  %v11_v6 = vld [vmem:[%s182_s0 + $0x30] sm:$0xff] }
   0x3   :  { %v26_v7 = vmax.bf16 %v78_v3, %v9_v1  ;;  %v79_v8 = vld [vmem:[%s182_s0 + $0x28] sm:$0xff]  ;;  %v80_v9 = vld [vmem:[%s182_s0 + $0x38] sm:$0xff]  ;;  %v12_v10 = vld [vmem:[%s182_s0 + $0x40] sm:$0xff] }
   0x4   :  { %v41_v11 = vrot.slane %v25_v4, 4  ;;  %v27_v12 = vmax.bf16 %v79_v8, %v10_v5  ;;  %v28_v13 = vmax.bf16 %v80_v9, %v11_v6  ;;  %v13_v14 = vld [vmem:[%s182_s0 + $0x50] sm:$0xff]  ;;  %v81_v15 = vld [vmem:[%s182_s0 + $0x48] sm:$0xff]  ;;  %v82_v16 = vld [vmem:[%s182_s0 + $0x58] sm:$0xff] }
   0x5   :  { %v42_v17 = vrot.slane %v26_v7, 4  ;;  %v29_v18 = vmax.bf16 %v81_v15, %v12_v10  ;;  %v30_v19 = vmax.bf16 %v82_v16, %v13_v14  ;;  %v14_v20 = vld [vmem:[%s182_s0 + $0x60] sm:$0xff]  ;;  %v15_v21 = vld [vmem:[%s182_s0 + $0x70] sm:$0xff]  ;;  %v83_v22 = vld [vmem:[%s182_s0 + $0x68] sm:$0xff] }
   0x6   :  { %v57_v23 = vmax.bf16 %v41_v11, %v25_v4  ;;  %v43_v24 = vrot.slane %v27_v12, 4  ;;  %v44_v25 = vrot.slane %v28_v13, 4  ;;  %v84_v26 = vld [vmem:[%s182_s0 + $0x78] sm:$0xff]  ;;  %v31_v27 = vmax.bf16 %v83_v22, %v14_v20 }
   0x7   :  { %v58_v28 = vmax.bf16 %v42_v17, %v26_v7  ;;  %v45_v29 = vrot.slane %v29_v18, 4  ;;  %v46_v30 = vrot.slane %v30_v19, 4  ;;  %v32_v31 = vmax.bf16 %v84_v26, %v15_v21 }
   0x8   :  { %v59_v32 = vmax.bf16 %v43_v24, %v27_v12  ;;  %v60_v33 = vmax.bf16 %v44_v25, %v28_v13  ;;  %v47_v34 = vrot.slane %v31_v27, 4 }
   0x9   :  { %v105_v35 = vcombine.low %v57_v23, %v58_v28  ;;  %v61_v36 = vmax.bf16 %v45_v29, %v29_v18  ;;  %v62_v37 = vmax.bf16 %v46_v30, %v30_v19  ;;  %v48_v38 = vrot.slane %v32_v31, 4 }
   0xa   :  { %v106_v39 = vcombine.low %v59_v32, %v60_v33  ;;  %v63_v40 = vmax.bf16 %v47_v34, %v31_v27 }
   0xb   :  { %89 = vst [vmem:[%s183_s1] sm:$0xff] %v105_v35   ;;  %v108_v41 = vcombine.low %v61_v36, %v62_v37  ;;  %v64_v42 = vmax.bf16 %v48_v38, %v32_v31 }
   0xc   :  { %107 = vst [vmem:[%s183_s1 + $0x8] sm:$0xff] %v106_v39  }
   0xd   :  { %109 = vst [vmem:[%s183_s1 + $0x10] sm:$0xff] %v108_v41   ;;  %v110_v43 = vcombine.low %v63_v40, %v64_v42 }
   0xf   :  { %111 = vst [vmem:[%s183_s1 + $0x18] sm:$0xff] %v110_v43  }

// kernel: alexnet_forward.11
= control target key start
LH: loop header
LB: loop body
LE: loop exit
PB: predicated region body
PF: predicated region fallthrough
CT: control target
= control target key end

     0   :  { %s1349_s12 = smov 0   ;;  %s1351_s13 = smov 0   ;;  %s1557_s0 = inlined_call_operand.vmem [shape: bf16[128,3200], index: 0, kind: input, shape index: {}]   ;;  %s1558_s1 = inlined_call_operand.vmem [shape: bf16[3200,256], index: 1, kind: input, shape index: {}]   ;;  %s1559_s2 = inlined_call_operand.vmem [shape: f32[1,256], index: 2, kind: input, shape index: {}]   ;;  %s1560_s3 = inlined_call_operand.vmem [shape: bf16[128,256], index: 3, kind: output, shape index: {}]  }
   0x1   :  { %s1353_s14 = smov 0   ;;  %s1355_s15 = smov 0  }
   0x2   :  { %s1357_s16 = smov 0  }
   0x3 LB: > { %s25_s17 = sadd.s32 1, %s1321_s15  ;;  %p48_p1 = scmp.ne.s32.totalorder %s1313_s13, %s1309_s12  ;;  %s1325_s16 = sphi %s1357_s16, %s13_s16   ;;  %s1321_s15 = sphi %s1355_s15, %s1564_s15   ;;  %s1317_s14 = sphi %s1353_s14, %s1563_s14   ;;  %s1313_s13 = sphi %s1351_s13, %s1562_s13   ;;  %s1309_s12 = sphi %s1349_s12, %s1561_s12  }
   0x4   : > { %p26_p0 = scmp.ge.s32.totalorder %s25_s17, 25  ;;  %p49_p2 = scmp.eq.s32.totalorder %s1325_s16, 0 }
   0x5   : > { %s41_s19 = sadd.s32 1, %s1313_s13  ;;  %p1126_p5 = scmp.ge.s32.totalorder %s1325_s16, 25 }
   0x6   : > { %s1566_s17 = smov (%p26_p0, %s25_s17), 0  ;;  %p50_p3 = por %p49_p2, %p48_p1 }
   0x7   : > { %s37_s18 = ssub.s32 %s1321_s15, %s1566_s17  ;;  %164 = sbr.rel (%p1126_p5) target bundleno = 28 (0x1c), region = 20 }
   0x8   : > { %p39_p4 = scmp.eq.s32.totalorder %s37_s18, 0 }
   0xa   : > { %s1384_s20 = scalar_select %p39_p4, %s1313_s13, %s41_s19  }
   0xe   : > { %167 = sbr.rel (!%p50_p3) target bundleno = 28 (0x1c), region = 24  ;;  %s169_s21 = sand.u32 (%p50_p3), 1, %s1313_s13  }
   0xf   : > { %s1128_s22 = sshll.u32 (%p50_p3), %s1321_s15, 2  ;;  %s1127_s23 = sshll.u32 (%p50_p3), %s169_s21, 6 }
  0x10   : > { %s1392_s26 = scalar_lea.vmem (%p50_p3), %s1557_s0, %s1128_s22  ;;  %s171_s27 = scalar_lea.vmem (%p50_p3), [#allocation3], %s1127_s23 }
  0x11   : > { %v192_v0 = vld [vmem:[%s1392_s26] sm:$0xf] (%p50_p3)  ;;  %v194_v1 = vld [vmem:[%s1392_s26 + $0x64] sm:$0xf] (%p50_p3)  ;;  %v196_v2 = vld [vmem:[%s1392_s26 + $0xc8] sm:$0xf] (%p50_p3) }
  0x12   : > { %193 = vst [vmem:[%s171_s27] sm:$0xf] (%p50_p3), %v192_v0  ;;  %195 = vst [vmem:[%s171_s27 + $0x4] sm:$0xf] (%p50_p3), %v194_v1  ;;  %v198_v3 = vld [vmem:[%s1392_s26 + $0x12c] sm:$0xf] (%p50_p3) }
  0x13   : > { %v200_v4 = vld [vmem:[%s1392_s26 + $0x190] sm:$0xf] (%p50_p3)  ;;  %197 = vst [vmem:[%s171_s27 + $0x8] sm:$0xf] (%p50_p3), %v196_v2  ;;  %199 = vst [vmem:[%s171_s27 + $0xc] sm:$0xf] (%p50_p3), %v198_v3 }
  0x14   : > { %201 = vst [vmem:[%s171_s27 + $0x10] sm:$0xf] (%p50_p3), %v200_v4  ;;  %v202_v5 = vld [vmem:[%s1392_s26 + $0x1f4] sm:$0xf] (%p50_p3)  ;;  %v204_v6 = vld [vmem:[%s1392_s26 + $0x258] sm:$0xf] (%p50_p3) }
  0x15   : > { %v206_v7 = vld [vmem:[%s1392_s26 + $0x2bc] sm:$0xf]  ;;  %203 = vst [vmem:[%s171_s27 + $0x14] sm:$0xf] %v202_v5  ;;  %205 = vst [vmem:[%s171_s27 + $0x18] sm:$0xf] %v204_v6 }
  0x16   : > { %207 = vst [vmem:[%s171_s27 + $0x1c] sm:$0xf] %v206_v7  ;;  %v208_v8 = vld [vmem:[%s1392_s26 + $0x320] sm:$0xf]  ;;  %v210_v9 = vld [vmem:[%s1392_s26 + $0x384] sm:$0xf] }
  0x17   : > { %v212_v10 = vld [vmem:[%s1392_s26 + $0x3e8] sm:$0xf]  ;;  %209 = vst [vmem:[%s171_s27 + $0x20] sm:$0xf] %v208_v8  ;;  %211 = vst [vmem:[%s171_s27 + $0x24] sm:$0xf] %v210_v9 }
  0x18   : > { %213 = vst [vmem:[%s171_s27 + $0x28] sm:$0xf] %v212_v10  ;;  %v214_v11 = vld [vmem:[%s1392_s26 + $0x44c] sm:$0xf]  ;;  %v216_v12 = vld [vmem:[%s1392_s26 + $0x4b0] sm:$0xf] }
  0x19   : > { %v218_v13 = vld [vmem:[%s1392_s26 + $0x514] sm:$0xf]  ;;  %215 = vst [vmem:[%s171_s27 + $0x2c] sm:$0xf] %v214_v11  ;;  %217 = vst [vmem:[%s171_s27 + $0x30] sm:$0xf] %v216_v12 }
  0x1a   : > { %219 = vst [vmem:[%s171_s27 + $0x34] sm:$0xf] %v218_v13  ;;  %v220_v14 = vld [vmem:[%s1392_s26 + $0x578] sm:$0xf]  ;;  %v222_v15 = vld [vmem:[%s1392_s26 + $0x5dc] sm:$0xf] }
  0x1b   : > { %221 = vst [vmem:[%s171_s27 + $0x38] sm:$0xf] %v220_v14  ;;  %223 = vst [vmem:[%s171_s27 + $0x3c] sm:$0xf] %v222_v15 }
  0x1c PF: > { %p1129_p6 = scmp.ge.s32.totalorder %s1325_s16, 1  ;;  %p292_p7 = scmp.lt.s32.totalorder %s1325_s16, 26 }
  0x1e   : > { %p293_p8 = pnand %p1129_p6, %p292_p7 }
  0x1f   : > { %s299_s28 = sand.u32 (!%p293_p8), 1, %s1309_s12   ;;  %s1131_s29 = sshll.u32 (!%p293_p8), %s1317_s14, 4 }
  0x20   : > { %296 = sbr.rel (%p293_p8) target bundleno = 349 (0x15d), region = 69  ;;  %s1130_s30 = sshll.u32 (!%p293_p8), %s299_s28, 6 }
  0x21   : > { %p344_p9 = scmp.lt.s32.totalorder (!%p293_p8), %s1131_s29, 399  ;;  %s1419_s8 = scalar_lea.vmem (!%p293_p8), [#allocation3], %s1130_s30 }
  0x22   : > { %p1134_p10 = scmp.ne.s32.totalorder (!%p293_p8), %s1317_s14, 0 }
  0x27   : > { %s1568_s29 = smov (!%p344_p9, %s1131_s29), 399  ;;  %375 = sbr.rel (%p1134_p10) target bundleno = 57 (0x39), region = 77 }
  0x28   : > { %s1180_s4 = sshll.u32 %s1568_s29, 3  ;;  %v1327_v16 = vmov (!%p1134_p10), 0.0  }
  0x29   : > { %s1417_s7 = scalar_lea.vmem %s1558_s1, %s1180_s4  ;;  %376 = vst [vmem:[#allocation2] sm:$0xff] (!%p1134_p10), %v1327_v16  ;;  %377 = vst [vmem:[#allocation2 + $0x8] sm:$0xff] (!%p1134_p10), %v1327_v16 }
  0x2a   : > { %378 = vst [vmem:[#allocation2 + $0x10] sm:$0xff] (!%p1134_p10), %v1327_v16  ;;  %379 = vst [vmem:[#allocation2 + $0x18] sm:$0xff] (!%p1134_p10), %v1327_v16 }
  0x2b   : > { %380 = vst [vmem:[#allocation2 + $0x20] sm:$0xff] (!%p1134_p10), %v1327_v16  ;;  %381 = vst [vmem:[#allocation2 + $0x28] sm:$0xff] (!%p1134_p10), %v1327_v16 }
  0x2c   : > { %382 = vst [vmem:[#allocation2 + $0x30] sm:$0xff] (!%p1134_p10), %v1327_v16  ;;  %383 = vst [vmem:[#allocation2 + $0x38] sm:$0xff] (!%p1134_p10), %v1327_v16 }
  0x2d   : > { %384 = vst [vmem:[#allocation2 + $0x40] sm:$0xff] (!%p1134_p10), %v1327_v16  ;;  %385 = vst [vmem:[#allocation2 + $0x48] sm:$0xff] (!%p1134_p10), %v1327_v16 }
  0x2e   : > { %386 = vst [vmem:[#allocation2 + $0x50] sm:$0xff] %v1327_v16  ;;  %387 = vst [vmem:[#allocation2 + $0x58] sm:$0xff] %v1327_v16 }
  0x2f   : > { %388 = vst [vmem:[#allocation2 + $0x60] sm:$0xff] %v1327_v16  ;;  %389 = vst [vmem:[#allocation2 + $0x68] sm:$0xff] %v1327_v16 }
  0x30   : > { %390 = vst [vmem:[#allocation2 + $0x70] sm:$0xff] %v1327_v16  ;;  %391 = vst [vmem:[#allocation2 + $0x78] sm:$0xff] %v1327_v16 }
  0x31   : > { %392 = vst [vmem:[#allocation2 + $0x80] sm:$0xff] %v1327_v16  ;;  %393 = vst [vmem:[#allocation2 + $0x88] sm:$0xff] %v1327_v16 }
  0x32   : > { %394 = vst [vmem:[#allocation2 + $0x90] sm:$0xff] %v1327_v16  ;;  %395 = vst [vmem:[#allocation2 + $0x98] sm:$0xff] %v1327_v16 }
  0x33   : > { %396 = vst [vmem:[#allocation2 + $0xa0] sm:$0xff] %v1327_v16  ;;  %397 = vst [vmem:[#allocation2 + $0xa8] sm:$0xff] %v1327_v16 }
  0x34   : > { %398 = vst [vmem:[#allocation2 + $0xb0] sm:$0xff] %v1327_v16  ;;  %399 = vst [vmem:[#allocation2 + $0xb8] sm:$0xff] %v1327_v16 }
  0x35   : > { %400 = vst [vmem:[#allocation2 + $0xc0] sm:$0xff] %v1327_v16  ;;  %401 = vst [vmem:[#allocation2 + $0xc8] sm:$0xff] %v1327_v16 }
  0x36   : > { %402 = vst [vmem:[#allocation2 + $0xd0] sm:$0xff] %v1327_v16  ;;  %403 = vst [vmem:[#allocation2 + $0xd8] sm:$0xff] %v1327_v16 }
  0x37   : > { %404 = vst [vmem:[#allocation2 + $0xe0] sm:$0xff] %v1327_v16  ;;  %405 = vst [vmem:[#allocation2 + $0xe8] sm:$0xff] %v1327_v16 }
  0x38   : > { %406 = vst [vmem:[#allocation2 + $0xf0] sm:$0xff] %v1327_v16  ;;  %407 = vst [vmem:[#allocation2 + $0xf8] sm:$0xff] %v1327_v16 }
  0x39 PF: > { %v1255_v17 = vld [vmem:[%s1417_s7 + $0x4] ss:$8 sps:$4 sm:$0xff]   ;;  %v1257_v18 = vld [vmem:[%s1417_s7] ss:$8 sps:$4 sm:$0xff]   ;;  %v1328_v19 = vmov 0   ;;  %v1283_v38 = vld [vmem:[%s1419_s8 + $0x10] sm:$0xff]  }
  0x3a   : > { %632 = vmatprep.mubr.bf16.mxu0 %v1328_v19  ;;  %672 = vmatprep.mubr.bf16.mxu1 %v1328_v19  ;;  %v1258_v20 = vld [vmem:[%s1417_s7 + $0x14] ss:$8 sps:$4 sm:$0xff]   ;;  %v1260_v21 = vld [vmem:[%s1417_s7 + $0x10] ss:$8 sps:$4 sm:$0xff]   ;;  %v1261_v22 = vld [vmem:[%s1417_s7 + $0x24] ss:$8 sps:$4 sm:$0xff]  }
  0x3b   : > { %600 = vmatprep.subr.bf16.mxu0 %v1255_v17  ;;  %1197 = vmatprep.subr.bf16.mxu1 %v1255_v17  ;;  %v1263_v23 = vld [vmem:[%s1417_s7 + $0x20] ss:$8 sps:$4 sm:$0xff]   ;;  %v1264_v24 = vld [vmem:[%s1417_s7 + $0x34] ss:$8 sps:$4 sm:$0xff]   ;;  %v1266_v25 = vld [vmem:[%s1417_s7 + $0x30] ss:$8 sps:$4 sm:$0xff]  }
  0x3c   : > { %601 = vmatpush1.bf16.msra.mxu0 %v1257_v18  ;;  %1205 = vmatpush1.bf16.msra.mxu1 %v1257_v18  ;;  %v1267_v26 = vld [vmem:[%s1417_s7 + $0x44] ss:$8 sps:$4 sm:$0xff]   ;;  %v1269_v27 = vld [vmem:[%s1417_s7 + $0x40] ss:$8 sps:$4 sm:$0xff]   ;;  %v1270_v28 = vld [vmem:[%s1417_s7 + $0x54] ss:$8 sps:$4 sm:$0xff]  }
  0x3d   : > { %602 = vmatprep.subr.bf16.mxu0 %v1258_v20  ;;  %1198 = vmatprep.subr.bf16.mxu1 %v1258_v20  ;;  %v1272_v29 = vld [vmem:[%s1417_s7 + $0x50] ss:$8 sps:$4 sm:$0xff]   ;;  %v1273_v30 = vld [vmem:[%s1417_s7 + $0x64] ss:$8 sps:$4 sm:$0xff]   ;;  %v1275_v31 = vld [vmem:[%s1417_s7 + $0x60] ss:$8 sps:$4 sm:$0xff]  }
  0x3e   : > { %v1276_v32 = vld [vmem:[%s1417_s7 + $0x74] ss:$8 sps:$4 sm:$0xff]   ;;  %v1278_v33 = vld [vmem:[%s1417_s7 + $0x70] ss:$8 sps:$4 sm:$0xff]   ;;  %v1279_v34 = vld [vmem:[%s1419_s8] sm:$0xff]   ;;  %p1159_p11 = scmp.ne.s32.totalorder %s1317_s14, 24 }
  0x3f   : > { %v1280_v35 = vld [vmem:[%s1419_s8 + $0x20] sm:$0xff]   ;;  %v1281_v36 = vld [vmem:[%s1419_s8 + $0x8] sm:$0xff]   ;;  %v1284_v39 = vld [vmem:[%s1419_s8 + $0x30] sm:$0xff]  }
  0x40   : > { %603 = vmatpush1.bf16.msra.mxu0 %v1260_v21  ;;  %1206 = vmatpush1.bf16.msra.mxu1 %v1260_v21  ;;  %v1282_v37 = vld [vmem:[%s1419_s8 + $0x28] sm:$0xff]   ;;  %v1285_v40 = vld [vmem:[%s1419_s8 + $0x18] sm:$0xff]   ;;  %v408_v42 = vld [vmem:[#allocation2] sm:$0xff] }
  0x41   : > { %604 = vmatprep.subr.bf16.mxu0 %v1261_v22  ;;  %1199 = vmatprep.subr.bf16.mxu1 %v1261_v22  ;;  %v1286_v41 = vld [vmem:[%s1419_s8 + $0x38] sm:$0xff]   ;;  %v424_v43 = vld [vmem:[#allocation2 + $0x80] sm:$0xff]  ;;  %v409_v44 = vld [vmem:[#allocation2 + $0x8] sm:$0xff] }
  0x42   : > { %v425_v45 = vld [vmem:[#allocation2 + $0x88] sm:$0xff]  ;;  %v410_v48 = vld [vmem:[#allocation2 + $0x10] sm:$0xff]  ;;  %v411_v54 = vld [vmem:[#allocation2 + $0x18] sm:$0xff] }
  0x43   : > { %v426_v49 = vld [vmem:[#allocation2 + $0x90] sm:$0xff]  ;;  %v427_v55 = vld [vmem:[#allocation2 + $0x98] sm:$0xff]  ;;  %v412_v2 = vld [vmem:[#allocation2 + $0x20] sm:$0xff] }
  0x44   : > { %605 = vmatpush1.bf16.msra.mxu0 %v1263_v23  ;;  %1207 = vmatpush1.bf16.msra.mxu1 %v1263_v23  ;;  %v428_v3 = vld [vmem:[#allocation2 + $0xa0] sm:$0xff]  ;;  %v413_v4 = vld [vmem:[#allocation2 + $0x28] sm:$0xff]  ;;  %v414_v8 = vld [vmem:[#allocation2 + $0x30] sm:$0xff] }
  0x45   : > { %606 = vmatprep.subr.bf16.mxu0 %v1264_v24  ;;  %1200 = vmatprep.subr.bf16.mxu1 %v1264_v24  ;;  %v429_v5 = vld [vmem:[#allocation2 + $0xa8] sm:$0xff]  ;;  %v430_v9 = vld [vmem:[#allocation2 + $0xb0] sm:$0xff]  ;;  %v415_v14 = vld [vmem:[#allocation2 + $0x38] sm:$0xff] }
  0x46   : > { %v431_v15 = vld [vmem:[#allocation2 + $0xb8] sm:$0xff] }
  0x48   : > { %607 = vmatpush1.bf16.msra.mxu0 %v1266_v25  ;;  %1208 = vmatpush1.bf16.msra.mxu1 %v1266_v25 }
  0x49   : > { %608 = vmatprep.subr.bf16.mxu0 %v1267_v26  ;;  %1201 = vmatprep.subr.bf16.mxu1 %v1267_v26  ;;  %v416_v26 = vld [vmem:[#allocation2 + $0x40] sm:$0xff] }
  0x4c   : > { %609 = vmatpush1.bf16.msra.mxu0 %v1269_v27  ;;  %1209 = vmatpush1.bf16.msra.mxu1 %v1269_v27  ;;  %v432_v27 = vld [vmem:[#allocation2 + $0xc0] sm:$0xff] }
  0x4d   : > { %610 = vmatprep.subr.bf16.mxu0 %v1270_v28  ;;  %1202 = vmatprep.subr.bf16.mxu1 %v1270_v28  ;;  %v417_v28 = vld [vmem:[#allocation2 + $0x48] sm:$0xff] }
  0x50   : > { %611 = vmatpush1.bf16.msra.mxu0 %v1272_v29  ;;  %1210 = vmatpush1.bf16.msra.mxu1 %v1272_v29  ;;  %v433_v29 = vld [vmem:[#allocation2 + $0xc8] sm:$0xff] }
  0x51   : > { %612 = vmatprep.subr.bf16.mxu0 %v1273_v30  ;;  %1203 = vmatprep.subr.bf16.mxu1 %v1273_v30 }
  0x54   : > { %613 = vmatpush1.bf16.msra.mxu0 %v1275_v31  ;;  %1211 = vmatpush1.bf16.msra.mxu1 %v1275_v31 }
  0x55   : > { %614 = vmatprep.subr.bf16.mxu0 %v1276_v32  ;;  %1204 = vmatprep.subr.bf16.mxu1 %v1276_v32  ;;  %v418_v32 = vld [vmem:[#allocation2 + $0x50] sm:$0xff] }
  0x58   : > { %615 = vmatpush1.bf16.msra.mxu0 %v1278_v33  ;;  %1212 = vmatpush1.bf16.msra.mxu1 %v1278_v33  ;;  %v434_v33 = vld [vmem:[#allocation2 + $0xd0] sm:$0xff] }
  0x5b   : > { %633 = vmatmul.mubr.bf16.vlgmr.msra.gmra.mrb[0].mxu0 %v1279_v34  ;;  %673 = vmatmul.mubr.bf16.vlgmr.msra.gmra.mrb[0].mxu1 %v1280_v35 }
  0x5c   : > { %642 = vmatprep.mubr.bf16.mxu0 %v1328_v19  ;;  %682 = vmatprep.mubr.bf16.mxu1 %v1328_v19 }
  0x63   : > { %643 = vmatmul.mubr.bf16.gmra.mrb[4].mxu0 %v1281_v36  ;;  %683 = vmatmul.mubr.bf16.gmra.mrb[4].mxu1 %v1282_v37 }
  0x64   : > { %652 = vmatprep.mubr.bf16.mxu0 %v1328_v19  ;;  %692 = vmatprep.mubr.bf16.mxu1 %v1328_v19 }
  0x6b   : > { %653 = vmatmul.mubr.bf16.gmra.mrb[8].mxu0 %v1283_v38  ;;  %693 = vmatmul.mubr.bf16.gmra.mrb[8].mxu1 %v1284_v39  ;;  %v419_v38 = vld [vmem:[#allocation2 + $0x58] sm:$0xff] }
  0x6c   : > { %662 = vmatprep.mubr.bf16.mxu0 %v1328_v19  ;;  %702 = vmatprep.mubr.bf16.mxu1 %v1328_v19  ;;  %v435_v39 = vld [vmem:[#allocation2 + $0xd8] sm:$0xff] }
  0x73   : > { %663 = vmatmul.mubr.bf16.gmra.mrb[12].mxu0 %v1285_v40  ;;  %703 = vmatmul.mubr.bf16.gmra.mrb[12].mxu1 %v1286_v41 }
 0x12e   : > { %v634_v46 = vpop.f32.mrb[0].mxu0  ;;  %v674_v47 = vpop.f32.mrb[0].mxu1 }
 0x12f   : > { %v713_v50 = vadd.f32 %v634_v46, %v408_v42  ;;  %v729_v51 = vadd.f32 %v674_v47, %v424_v43  ;;  %v636_v52 = vpop.f32.mrb[1].mxu0  ;;  %v676_v53 = vpop.f32.mrb[1].mxu1 }
 0x130   : > { %v714_v56 = vadd.f32 %v636_v52, %v409_v44  ;;  %v730_v57 = vadd.f32 %v676_v53, %v425_v45  ;;  %v638_v58 = vpop.f32.mrb[2].mxu0  ;;  %v678_v59 = vpop.f32.mrb[2].mxu1  ;;  %v421_v52 = vld [vmem:[#allocation2 + $0x68] sm:$0xff] }
 0x131   : > { %745 = vst [vmem:[#allocation2] sm:$0xff] %v713_v50  ;;  %761 = vst [vmem:[#allocation2 + $0x80] sm:$0xff] %v729_v51  ;;  %v715_v60 = vadd.f32 %v638_v58, %v410_v48  ;;  %v731_v61 = vadd.f32 %v678_v59, %v426_v49  ;;  %v640_v62 = vpop.f32.mrb[3].mxu0  ;;  %v680_v63 = vpop.f32.mrb[3].mxu1  ;;  %v420_v50 = vld [vmem:[#allocation2 + $0x60] sm:$0xff]  ;;  %v437_v53 = vld [vmem:[#allocation2 + $0xe8] sm:$0xff] }
 0x132   : > { %746 = vst [vmem:[#allocation2 + $0x8] sm:$0xff] %v714_v56  ;;  %762 = vst [vmem:[#allocation2 + $0x88] sm:$0xff] %v730_v57  ;;  %v716_v0 = vadd.f32 %v640_v62, %v411_v54  ;;  %v732_v1 = vadd.f32 %v680_v63, %v427_v55  ;;  %v436_v51 = vld [vmem:[#allocation2 + $0xe0] sm:$0xff]  ;;  %v422_v56 = vld [vmem:[#allocation2 + $0x70] sm:$0xff] }
 0x133   : > { %747 = vst [vmem:[#allocation2 + $0x10] sm:$0xff] %v715_v60  ;;  %763 = vst [vmem:[#allocation2 + $0x90] sm:$0xff] %v731_v61  ;;  %v438_v57 = vld [vmem:[#allocation2 + $0xf0] sm:$0xff]  ;;  %v423_v62 = vld [vmem:[#allocation2 + $0x78] sm:$0xff] }
 0x134   : > { %748 = vst [vmem:[#allocation2 + $0x18] sm:$0xff] %v716_v0  ;;  %764 = vst [vmem:[#allocation2 + $0x98] sm:$0xff] %v732_v1  ;;  %v439_v63 = vld [vmem:[#allocation2 + $0xf8] sm:$0xff] }
 0x136   : > { %v644_v6 = vpop.f32.mrb[4].mxu0  ;;  %v684_v7 = vpop.f32.mrb[4].mxu1 }
 0x137   : > { %v717_v10 = vadd.f32 %v644_v6, %v412_v2  ;;  %v733_v11 = vadd.f32 %v684_v7, %v428_v3  ;;  %v646_v12 = vpop.f32.mrb[5].mxu0  ;;  %v686_v13 = vpop.f32.mrb[5].mxu1 }
 0x138   : > { %v718_v16 = vadd.f32 %v646_v12, %v413_v4  ;;  %v734_v17 = vadd.f32 %v686_v13, %v429_v5  ;;  %v648_v18 = vpop.f32.mrb[6].mxu0  ;;  %v688_v19 = vpop.f32.mrb[6].mxu1  ;;  %v813_v12 = vld [vmem:[%s1559_s2] sm:$0x3] (!%p1159_p11) }
 0x139   : > { %749 = vst [vmem:[#allocation2 + $0x20] sm:$0xff] %v717_v10  ;;  %765 = vst [vmem:[#allocation2 + $0xa0] sm:$0xff] %v733_v11  ;;  %v719_v20 = vadd.f32 %v648_v18, %v414_v8  ;;  %v735_v21 = vadd.f32 %v688_v19, %v430_v9  ;;  %v650_v22 = vpop.f32.mrb[7].mxu0  ;;  %v690_v23 = vpop.f32.mrb[7].mxu1  ;;  %v815_v10 = vlaneseq (!%p1159_p11)  ;;  %v781_v13 = vld [vmem:[#allocation2] sm:$0xff] (!%p1159_p11) }
 0x13a   : > { %750 = vst [vmem:[#allocation2 + $0x28] sm:$0xff] %v718_v16  ;;  %766 = vst [vmem:[#allocation2 + $0xa8] sm:$0xff] %v734_v17  ;;  %v720_v24 = vadd.f32 %v650_v22, %v415_v14  ;;  %v736_v25 = vadd.f32 %v690_v23, %v431_v15  ;;  %v782_v14 = vld [vmem:[#allocation2 + $0x8] sm:$0xff] (!%p1159_p11)  ;;  %v783_v17 = vld [vmem:[#allocation2 + $0x10] sm:$0xff] (!%p1159_p11) }
 0x13b   : > { %751 = vst [vmem:[#allocation2 + $0x30] sm:$0xff] %v719_v20  ;;  %767 = vst [vmem:[#allocation2 + $0xb0] sm:$0xff] %v735_v21  ;;  %v816_v11 = vshrl.u32 (!%p1159_p11), %v815_v10, 7  ;;  %v784_v18 = vld [vmem:[#allocation2 + $0x18] sm:$0xff] (!%p1159_p11) }
 0x13c   : > { %752 = vst [vmem:[#allocation2 + $0x38] sm:$0xff] %v720_v24  ;;  %768 = vst [vmem:[#allocation2 + $0xb8] sm:$0xff] %v736_v25 }
 0x13d   : > { %v817_v15 = vsub.s32 (!%p1159_p11), 0, %v816_v11  ;;  %v821_v16 = vsub.s32 (!%p1159_p11), 1, %v816_v11 }
 0x13e   : > { %v654_v30 = vpop.f32.mrb[8].mxu0  ;;  %v694_v31 = vpop.f32.mrb[8].mxu1 }
 0x13f   : > { %v721_v34 = vadd.f32 %v654_v30, %v416_v26  ;;  %v737_v35 = vadd.f32 %v694_v31, %v432_v27  ;;  %v656_v36 = vpop.f32.mrb[9].mxu0  ;;  %v696_v37 = vpop.f32.mrb[9].mxu1  ;;  %v1458_v20 = vrot.slane (!%p1159_p11), %v813_v12, %v817_v15  ;;  %v1460_v21 = vrot.slane (!%p1159_p11), %v813_v12, %v821_v16 }
 0x140   : > { %v722_v40 = vadd.f32 %v656_v36, %v417_v28  ;;  %v738_v41 = vadd.f32 %v696_v37, %v433_v29  ;;  %v658_v42 = vpop.f32.mrb[10].mxu0  ;;  %v698_v43 = vpop.f32.mrb[10].mxu1  ;;  %v785_v19 = vld [vmem:[#allocation2 + $0x20] sm:$0xff] (!%p1159_p11) }
 0x141   : > { %753 = vst [vmem:[#allocation2 + $0x40] sm:$0xff] %v721_v34  ;;  %769 = vst [vmem:[#allocation2 + $0xc0] sm:$0xff] %v737_v35  ;;  %v723_v44 = vadd.f32 %v658_v42, %v418_v32  ;;  %v739_v45 = vadd.f32 %v698_v43, %v434_v33  ;;  %v660_v46 = vpop.f32.mrb[11].mxu0  ;;  %v700_v47 = vpop.f32.mrb[11].mxu1  ;;  %v786_v22 = vld [vmem:[#allocation2 + $0x28] sm:$0xff] (!%p1159_p11)  ;;  %v825_v25 = vadd.f32 (!%p1159_p11), %v1458_v20, %v781_v13 }
 0x142   : > { %754 = vst [vmem:[#allocation2 + $0x48] sm:$0xff] %v722_v40  ;;  %770 = vst [vmem:[#allocation2 + $0xc8] sm:$0xff] %v738_v41  ;;  %v724_v48 = vadd.f32 %v660_v46, %v419_v38  ;;  %v740_v49 = vadd.f32 %v700_v47, %v435_v39  ;;  %v787_v23 = vld [vmem:[#allocation2 + $0x30] sm:$0xff] (!%p1159_p11)  ;;  %v826_v26 = vadd.f32 (!%p1159_p11), %v1460_v21, %v782_v14  ;;  %v802_v10 = vld [vmem:[#allocation2 + $0xa8] sm:$0xff] (!%p1159_p11) }
 0x143   : > { %755 = vst [vmem:[#allocation2 + $0x50] sm:$0xff] %v723_v44  ;;  %771 = vst [vmem:[#allocation2 + $0xd0] sm:$0xff] %v739_v45  ;;  %v788_v24 = vld [vmem:[#allocation2 + $0x38] sm:$0xff] (!%p1159_p11)  ;;  %v827_v27 = vadd.f32 (!%p1159_p11), %v1458_v20, %v783_v17  ;;  %v828_v28 = vadd.f32 (!%p1159_p11), %v1460_v21, %v784_v18  ;;  %v829_v29 = vadd.f32 (!%p1159_p11), %v1458_v20, %v785_v19  ;;  %v857_v35 = vmax.f32 (!%p1159_p11), %v825_v25, 0.0  ;;  %v803_v15 = vld [vmem:[#allocation2 + $0xb0] sm:$0xff] (!%p1159_p11) }
 0x144   : > { %756 = vst [vmem:[#allocation2 + $0x58] sm:$0xff] %v724_v48  ;;  %772 = vst [vmem:[#allocation2 + $0xd8] sm:$0xff] %v740_v49  ;;  %v830_v30 = vadd.f32 (!%p1159_p11), %v1460_v21, %v786_v22  ;;  %v831_v31 = vadd.f32 (!%p1159_p11), %v1458_v20, %v787_v23  ;;  %v832_v32 = vadd.f32 (!%p1159_p11), %v1460_v21, %v788_v24  ;;  %v858_v36 = vmax.f32 (!%p1159_p11), %v826_v26, 0.0  ;;  %v804_v16 = vld [vmem:[#allocation2 + $0xb8] sm:$0xff] (!%p1159_p11) }
 0x145   : > { %v859_v37 = vmax.f32 (!%p1159_p11), %v827_v27, 0.0  ;;  %v860_v38 = vmax.f32 (!%p1159_p11), %v828_v28, 0.0  ;;  %v861_v41 = vmax.f32 (!%p1159_p11), %v829_v29, 0.0  ;;  %v846_v27 = vadd.f32 (!%p1159_p11), %v1460_v21, %v802_v10 }
 0x146   : > { %v664_v54 = vpop.f32.mrb[12].mxu0  ;;  %v704_v55 = vpop.f32.mrb[12].mxu1  ;;  %780 = sbr.rel (%p1159_p11) target bundleno = 349 (0x15d), region = 81  ;;  %v862_v42 = vmax.f32 (!%p1159_p11), %v830_v30, 0.0  ;;  %v863_v43 = vmax.f32 (!%p1159_p11), %v831_v31, 0.0  ;;  %v864_v44 = vmax.f32 (!%p1159_p11), %v832_v32, 0.0  ;;  %v1181_v47 = vpack.c.bf16 (!%p1159_p11), %v858_v36, %v857_v35 }
 0x147   : > { %v725_v58 = vadd.f32 %v664_v54, %v420_v50  ;;  %v741_v59 = vadd.f32 %v704_v55, %v436_v51  ;;  %v666_v60 = vpop.f32.mrb[13].mxu0  ;;  %v706_v61 = vpop.f32.mrb[13].mxu1  ;;  %v1182_v48 = vpack.c.bf16 (!%p1159_p11), %v860_v38, %v859_v37  ;;  %v847_v31 = vadd.f32 (!%p1159_p11), %v1458_v20, %v803_v15 }
 0x148   : > { %v726_v0 = vadd.f32 %v666_v60, %v421_v52  ;;  %v742_v1 = vadd.f32 %v706_v61, %v437_v53  ;;  %v668_v2 = vpop.f32.mrb[14].mxu0  ;;  %v708_v3 = vpop.f32.mrb[14].mxu1  ;;  %v789_v33 = vld [vmem:[#allocation2 + $0x40] sm:$0xff] (!%p1159_p11)  ;;  %v1183_v53 = vpack.c.bf16 (!%p1159_p11), %v862_v42, %v861_v41  ;;  %v1184_v54 = vpack.c.bf16 (!%p1159_p11), %v864_v44, %v863_v43  ;;  %985 = vst [vmem:[%s1560_s3] sm:$0xff] (!%p1159_p11), %v1181_v47 }
 0x149   : > { %757 = vst [vmem:[#allocation2 + $0x60] sm:$0xff] %v725_v58  ;;  %773 = vst [vmem:[#allocation2 + $0xe0] sm:$0xff] %v741_v59  ;;  %v727_v4 = vadd.f32 %v668_v2, %v422_v56  ;;  %v743_v5 = vadd.f32 %v708_v3, %v438_v57  ;;  %v670_v6 = vpop.f32.mrb[15].mxu0  ;;  %v710_v7 = vpop.f32.mrb[15].mxu1  ;;  %v790_v34 = vld [vmem:[#allocation2 + $0x48] sm:$0xff] (!%p1159_p11)  ;;  %v833_v49 = vadd.f32 (!%p1159_p11), %v1458_v20, %v789_v33  ;;  %v797_v57 = vld [vmem:[#allocation2 + $0x80] sm:$0xff] (!%p1159_p11) }
 0x14a   : > { %758 = vst [vmem:[#allocation2 + $0x68] sm:$0xff] %v726_v0  ;;  %774 = vst [vmem:[#allocation2 + $0xe8] sm:$0xff] %v742_v1  ;;  %v728_v8 = vadd.f32 %v670_v6, %v423_v62  ;;  %v744_v9 = vadd.f32 %v710_v7, %v439_v63  ;;  %v791_v39 = vld [vmem:[#allocation2 + $0x50] sm:$0xff] (!%p1159_p11)  ;;  %v834_v50 = vadd.f32 (!%p1159_p11), %v1460_v21, %v790_v34  ;;  %v798_v62 = vld [vmem:[#allocation2 + $0x88] sm:$0xff] (!%p1159_p11)  ;;  %v878_v37 = vmax.f32 (!%p1159_p11), %v846_v27, 0.0 }
 0x14b   : > { %759 = vst [vmem:[#allocation2 + $0x70] sm:$0xff] %v727_v4  ;;  %775 = vst [vmem:[#allocation2 + $0xf0] sm:$0xff] %v743_v5  ;;  %v792_v40 = vld [vmem:[#allocation2 + $0x58] sm:$0xff] (!%p1159_p11)  ;;  %v835_v55 = vadd.f32 (!%p1159_p11), %v1458_v20, %v791_v39  ;;  %v865_v58 = vmax.f32 (!%p1159_p11), %v833_v49, 0.0  ;;  %v799_v3 = vld [vmem:[#allocation2 + $0x90] sm:$0xff] (!%p1159_p11)  ;;  %v842_v14 = vadd.f32 (!%p1159_p11), %v1460_v21, %v798_v62  ;;  %v848_v32 = vadd.f32 (!%p1159_p11), %v1460_v21, %v804_v16 }
 0x14c   : > { %760 = vst [vmem:[#allocation2 + $0x78] sm:$0xff] %v728_v8  ;;  %776 = vst [vmem:[#allocation2 + $0xf8] sm:$0xff] %v744_v9  ;;  %v836_v56 = vadd.f32 (!%p1159_p11), %v1460_v21, %v792_v40  ;;  %v866_v59 = vmax.f32 (!%p1159_p11), %v834_v50, 0.0  ;;  %v800_v4 = vld [vmem:[#allocation2 + $0x98] sm:$0xff] (!%p1159_p11)  ;;  %v841_v8 = vadd.f32 (!%p1159_p11), %v1458_v20, %v797_v57  ;;  %v801_v9 = vld [vmem:[#allocation2 + $0xa0] sm:$0xff] (!%p1159_p11)  ;;  %v843_v19 = vadd.f32 (!%p1159_p11), %v1458_v20, %v799_v3 }
 0x14d   : > { %986 = vst [vmem:[%s1560_s3 + $0x8] sm:$0xff] %v1182_v48  ;;  %987 = vst [vmem:[%s1560_s3 + $0x10] sm:$0xff] %v1183_v53  ;;  %v867_v63 = vmax.f32 %v835_v55, 0.0  ;;  %v844_v22 = vadd.f32 %v1460_v21, %v800_v4  ;;  %v805_v23 = vld [vmem:[#allocation2 + $0xc0] sm:$0xff]  ;;  %v874_v25 = vmax.f32 %v842_v14, 0.0  ;;  %v845_v26 = vadd.f32 %v1458_v20, %v801_v9  ;;  %v806_v28 = vld [vmem:[#allocation2 + $0xc8] sm:$0xff] }
 0x14e   : > { %988 = vst [vmem:[%s1560_s3 + $0x18] sm:$0xff] %v1184_v54  ;;  %v868_v0 = vmax.f32 %v836_v56, 0.0  ;;  %v1185_v5 = vpack.c.bf16 %v866_v59, %v865_v58  ;;  %v873_v18 = vmax.f32 %v841_v8, 0.0  ;;  %v875_v29 = vmax.f32 %v843_v19, 0.0  ;;  %v807_v33 = vld [vmem:[#allocation2 + $0xd0] sm:$0xff]  ;;  %v808_v34 = vld [vmem:[#allocation2 + $0xd8] sm:$0xff] }
 0x14f   : > { %v876_v30 = vmax.f32 %v844_v22, 0.0  ;;  %v877_v36 = vmax.f32 %v845_v26, 0.0  ;;  %v849_v38 = vadd.f32 %v1458_v20, %v805_v23  ;;  %v879_v42 = vmax.f32 %v847_v31, 0.0 }
 0x150   : > { %v793_v45 = vld [vmem:[#allocation2 + $0x60] sm:$0xff]  ;;  %v1186_v11 = vpack.c.bf16 %v868_v0, %v867_v63  ;;  %989 = vst [vmem:[%s1560_s3 + $0x20] sm:$0xff] %v1185_v5  ;;  %v1189_v35 = vpack.c.bf16 %v874_v25, %v873_v18  ;;  %v880_v43 = vmax.f32 %v848_v32, 0.0  ;;  %v850_v44 = vadd.f32 %v1460_v21, %v806_v28 }
 0x151   : > { %v794_v46 = vld [vmem:[#allocation2 + $0x68] sm:$0xff]  ;;  %v837_v60 = vadd.f32 %v1458_v20, %v793_v45  ;;  %v809_v39 = vld [vmem:[#allocation2 + $0xe0] sm:$0xff]  ;;  %v1190_v41 = vpack.c.bf16 %v876_v30, %v875_v29  ;;  %v1191_v47 = vpack.c.bf16 %v878_v37, %v877_v36  ;;  %v881_v48 = vmax.f32 %v849_v38, 0.0 }
 0x152   : > { %v795_v51 = vld [vmem:[#allocation2 + $0x70] sm:$0xff]  ;;  %v838_v61 = vadd.f32 %v1460_v21, %v794_v46  ;;  %990 = vst [vmem:[%s1560_s3 + $0x28] sm:$0xff] %v1186_v11  ;;  %v810_v40 = vld [vmem:[#allocation2 + $0xe8] sm:$0xff]  ;;  %993 = vst [vmem:[%s1560_s3 + $0x40] sm:$0xff] %v1189_v35  ;;  %v851_v49 = vadd.f32 %v1458_v20, %v807_v33  ;;  %v852_v50 = vadd.f32 %v1460_v21, %v808_v34 }
 0x153   : > { %v796_v52 = vld [vmem:[#allocation2 + $0x78] sm:$0xff]  ;;  %v839_v1 = vadd.f32 %v1458_v20, %v795_v51  ;;  %v869_v6 = vmax.f32 %v837_v60, 0.0  ;;  %v811_v45 = vld [vmem:[#allocation2 + $0xf0] sm:$0xff]  ;;  %994 = vst [vmem:[%s1560_s3 + $0x48] sm:$0xff] %v1190_v41  ;;  %v1192_v51 = vpack.c.bf16 %v880_v43, %v879_v42  ;;  %v853_v53 = vadd.f32 %v1458_v20, %v809_v39  ;;  %995 = vst [vmem:[%s1560_s3 + $0x50] sm:$0xff] %v1191_v47 }
 0x154   : > { %v840_v2 = vadd.f32 %v1460_v21, %v796_v52  ;;  %v870_v7 = vmax.f32 %v838_v61, 0.0  ;;  %v812_v46 = vld [vmem:[#allocation2 + $0xf8] sm:$0xff]  ;;  %v882_v52 = vmax.f32 %v850_v44, 0.0  ;;  %v854_v54 = vadd.f32 %v1460_v21, %v810_v40 }
 0x155   : > { %v871_v12 = vmax.f32 %v839_v1, 0.0  ;;  %v883_v55 = vmax.f32 %v851_v49, 0.0  ;;  %v884_v56 = vmax.f32 %v852_v50, 0.0  ;;  %v855_v57 = vadd.f32 %v1458_v20, %v811_v45  ;;  %996 = vst [vmem:[%s1560_s3 + $0x58] sm:$0xff] %v1192_v51 }
 0x156   : > { %v872_v13 = vmax.f32 %v840_v2, 0.0  ;;  %v1187_v17 = vpack.c.bf16 %v870_v7, %v869_v6  ;;  %v856_v58 = vadd.f32 %v1460_v21, %v812_v46  ;;  %v1193_v59 = vpack.c.bf16 %v882_v52, %v881_v48 }
 0x157   : > { %v885_v60 = vmax.f32 %v853_v53, 0.0  ;;  %v886_v61 = vmax.f32 %v854_v54, 0.0  ;;  %v1194_v62 = vpack.c.bf16 %v884_v56, %v883_v55  ;;  %v887_v63 = vmax.f32 %v855_v57, 0.0 }
 0x158   : > { %v1188_v24 = vpack.c.bf16 %v872_v13, %v871_v12  ;;  %991 = vst [vmem:[%s1560_s3 + $0x30] sm:$0xff] %v1187_v17  ;;  %v888_v0 = vmax.f32 %v856_v58, 0.0  ;;  %997 = vst [vmem:[%s1560_s3 + $0x60] sm:$0xff] %v1193_v59 }
 0x159   : > { %v1195_v1 = vpack.c.bf16 %v886_v61, %v885_v60  ;;  %998 = vst [vmem:[%s1560_s3 + $0x68] sm:$0xff] %v1194_v62 }
 0x15a   : > { %992 = vst [vmem:[%s1560_s3 + $0x38] sm:$0xff] %v1188_v24  ;;  %v1196_v20 = vpack.c.bf16 %v888_v0, %v887_v63 }
 0x15b   : > { %999 = vst [vmem:[%s1560_s3 + $0x70] sm:$0xff] %v1195_v1 }
 0x15c   : > { %1000 = vst [vmem:[%s1560_s3 + $0x78] sm:$0xff] %v1196_v20 }
 0x15d PF: > { %s13_s16 = sadd.s32 1, %s1325_s16   ;;  %s1561_s12 = smov %s1313_s13 }
 0x15e   : > { %p10_p12 = scmp.ge.s32.totalorder %s13_s16, 27   ;;  %s1562_s13 = smov %s1384_s20 }
 0x15f   : > { %s1563_s14 = smov %s1321_s15  ;;  %s1564_s15 = smov %s1566_s17 }
 0x160   :  { %12 = sbr.rel (!%p10_p12) target bundleno = 3 (0x3), region = 122 }

// kernel: alexnet_forward.13
= control target key start
LH: loop header
LB: loop body
LE: loop exit
PB: predicated region body
PF: predicated region fallthrough
CT: control target
= control target key end

     0   :  { %s1754_s0 = inlined_call_operand.vmem [shape: bf16[32,2304], index: 0, kind: input, shape index: {}]   ;;  %s1755_s1 = inlined_call_operand.vmem [shape: bf16[2304,384], index: 1, kind: input, shape index: {}]   ;;  %s1756_s2 = inlined_call_operand.vmem [shape: f32[1,384], index: 2, kind: input, shape index: {}]   ;;  %s1757_s3 = inlined_call_operand.vmem [shape: bf16[32,384], index: 3, kind: output, shape index: {}]  }
   0x1   :  { %1759 = sst [smem:[#allocation7_spill]] %s1754_s0 }
   0x2   :  { %1760 = sst [smem:[#allocation8_spill]] %s1755_s1 }
   0x3   :  { %s1439_s12 = smov 0   ;;  %s1441_s13 = smov 0  }
   0x4   :  { %s1443_s14 = smov 0   ;;  %s1445_s15 = smov 0  }
   0x5   :  { %s1447_s16 = smov 0   ;;  %s1449_s17 = smov 0  }
   0x6   :  { %s1451_s18 = smov 0   ;;  %s1453_s19 = smov 0  }
   0x7   :  { %s1455_s20 = smov 0   ;;  %s1457_s21 = smov 0  }
   0x8   :  { %s1459_s22 = smov 0  }
   0x9 LB: > { %s1072_s23 = sadd.s32 4294967295, %s1416_s22   ;;  %s25_s24 = sadd.s32 1, %s1408_s20  ;;  %s1416_s22 = sphi %s1459_s22, %s13_s22   ;;  %s1412_s21 = sphi %s1457_s21, %s1777_s21   ;;  %s1408_s20 = sphi %s1455_s20, %s1776_s20   ;;  %s1404_s19 = sphi %s1453_s19, %s1775_s19   ;;  %s1400_s18 = sphi %s1451_s18, %s1774_s18   ;;  %s1396_s17 = sphi %s1449_s17, %s1773_s17   ;;  %s1392_s16 = sphi %s1447_s16, %s1772_s16   ;;  %s1388_s15 = sphi %s1445_s15, %s1771_s15   ;;  %s1384_s14 = sphi %s1443_s14, %s1770_s14   ;;  %s1380_s13 = sphi %s1441_s13, %s1769_s13   ;;  %s1376_s12 = sphi %s1439_s12, %s1768_s12  }
   0xa   : > { %p26_p0 = scmp.ge.s32.totalorder %s25_s24, 6  ;;  %s28_s25 = sadd.s32 1, %s1412_s21 }
   0xb   : > { %s41_s26 = sadd.s32 1, %s1396_s17  ;;  %p48_p1 = scmp.ne.s32.totalorder %s1396_s17, %s1392_s16 }
   0xc   : > { %s1779_s24 = smov (%p26_p0, %s25_s24), 0  ;;  %s1781_s25 = smov (!%p26_p0, %s28_s25), %s1412_s21 }
   0xd   : > { %s37_s27 = ssub.s32 %s1408_s20, %s1779_s24  ;;  %p49_p2 = scmp.eq.s32.totalorder %s1416_s22, 0 }
   0xe   : > { %p30_p3 = scmp.ge.s32.totalorder %s1781_s25, 3  ;;  %p39_p4 = scmp.eq.s32.totalorder %s37_s27, 0 }
   0xf   : > { %p1506_p5 = por %p49_p2, %p48_p1  ;;  %s69_s29 = sadd.s32 1, %s1388_s15 }
  0x10   : > { %s1783_s25 = smov (%p30_p3, %s1781_s25), 0  ;;  %p76_p6 = scmp.ne.s32.totalorder %s1388_s15, %s1384_s14 }
  0x11   : > { %1762 = sst [smem:[#allocation6_spill]] %s1783_s25  ;;  %s65_s4 = ssub.s32 %s1412_s21, %s1783_s25 }
  0x12   : > { %s1514_s30 = scalar_select %p39_p4, %s1396_s17, %s41_s26  }
  0x13   : > { %s66_s5 = sor.u32 %s65_s4, %s37_s27  ;;  %p121_p7 = scmp.eq.s32.totalorder %s65_s4, 0 }
  0x14   : > { %p67_p8 = scmp.eq.s32.totalorder %s66_s5, 0  ;;  %p1520_p9 = por %p76_p6, %p49_p2 }
  0x15   : > { %s123_s7 = sadd.s32 1, %s1380_s13  ;;  %p133_p10 = scmp.ne.s32.totalorder %s1380_s13, %s1376_s12 }
  0x16   : > { %s1528_s8 = scalar_select %p67_p8, %s1388_s15, %s69_s29  }
  0x17   : > { %s1531_s9 = scalar_select %p121_p7, %s1380_s13, %s123_s7  }
  0x18   : > { %p134_p11 = scmp.eq.s32.totalorder %s1072_s23, 17  ;;  %p1075_p13 = scmp.ge.s32.totalorder %s1416_s22, 18 }
  0x1a   : > { %p1533_p12 = por %p134_p11, %p133_p10  ;;  %156 = sbr.rel (%p1075_p13) target bundleno = 87 (0x57), region = 16 }
  0x21   : > { %159 = sbr.rel (!%p1506_p5) target bundleno = 46 (0x2e), region = 20  ;;  %s161_s11 = sand.u32 (%p1506_p5), 1, %s1396_s17  }
  0x22   : > { %s1129_s26 = smul.u32 (%p1506_p5), 12, %s1408_s20  ;;  %s1765_s0 = sld [smem:[#allocation7_spill]] (%p1506_p5) }
  0x23   : > { %s1203_s27 = smul.u32 (%p1506_p5), 48, %s161_s11 }
  0x25   : > { %s163_s23 = scalar_lea.vmem (%p1506_p5), [#allocation3], %s1203_s27 }
  0x28   : > { %s169_s5 = scalar_lea.vmem %s1765_s0, %s1129_s26 }
  0x29   : > { %v184_v0 = vld [vmem:[%s169_s5] sm:$0xff]  ;;  %v186_v1 = vld [vmem:[%s169_s5 + $0x48] sm:$0xff]  ;;  %v188_v2 = vld [vmem:[%s169_s5 + $0x90] sm:$0xff] }
  0x2a   : > { %185 = vst [vmem:[%s163_s23] sm:$0xff] %v184_v0  ;;  %187 = vst [vmem:[%s163_s23 + $0xc] sm:$0xff] %v186_v1  ;;  %v190_v3 = vld [vmem:[%s169_s5 + $0xd8] sm:$0xff]  ;;  %v1077_v4 = vld [vmem:[%s169_s5 + $0x8] sm:$0xf] }
  0x2b   : > { %189 = vst [vmem:[%s163_s23 + $0x18] sm:$0xff] %v188_v2  ;;  %v1079_v5 = vld [vmem:[%s169_s5 + $0x50] sm:$0xf]  ;;  %191 = vst [vmem:[%s163_s23 + $0x24] sm:$0xff] %v190_v3  ;;  %v1081_v6 = vld [vmem:[%s169_s5 + $0x98] sm:$0xf] }
  0x2c   : > { %1078 = vst [vmem:[%s163_s23 + $0x8] sm:$0xf] %v1077_v4  ;;  %1080 = vst [vmem:[%s163_s23 + $0x14] sm:$0xf] %v1079_v5  ;;  %v1083_v7 = vld [vmem:[%s169_s5 + $0xe0] sm:$0xf] }
  0x2d   : > { %1082 = vst [vmem:[%s163_s23 + $0x20] sm:$0xf] %v1081_v6  ;;  %1084 = vst [vmem:[%s163_s23 + $0x2c] sm:$0xf] %v1083_v7 }
  0x2e PF: > { %212 = sbr.rel (!%p1520_p9) target bundleno = 87 (0x57), region = 46  ;;  %s214_s28 = sand.u32 (%p1520_p9), 1, %s1388_s15  }
  0x2f   : > { %s1204_s7 = smul.u32 (%p1520_p9), 192, %s214_s28  ;;  %s1766_s1 = sld [smem:[#allocation8_spill]] (%p1520_p9) }
  0x30   : > { %s1208_s11 = smul.u32 (%p1520_p9), 144, %s1408_s20 }
  0x31   : > { %s1558_s6 = scalar_lea.vmem (%p1520_p9), [#allocation4], %s1204_s7 }
  0x32   : > { %s219_s26 = sadd.s32 (%p1520_p9), %s1412_s21, %s1208_s11 }
  0x33   : > { %s1085_s27 = sshll.u32 (%p1520_p9), %s219_s26, 2 }
  0x35   : > { %s1553_s0 = scalar_lea.vmem %s1766_s1, %s1085_s27 }
  0x36   : > { %v237_v8 = vld [vmem:[%s1553_s0] sm:$0xf]  ;;  %v239_v9 = vld [vmem:[%s1553_s0 + $0xc] sm:$0xf]  ;;  %v241_v10 = vld [vmem:[%s1553_s0 + $0x18] sm:$0xf] }
  0x37   : > { %238 = vst [vmem:[%s1558_s6] sm:$0xf] %v237_v8  ;;  %240 = vst [vmem:[%s1558_s6 + $0x4] sm:$0xf] %v239_v9  ;;  %v243_v11 = vld [vmem:[%s1553_s0 + $0x24] sm:$0xf] }
  0x38   : > { %242 = vst [vmem:[%s1558_s6 + $0x8] sm:$0xf] %v241_v10  ;;  %v245_v12 = vld [vmem:[%s1553_s0 + $0x30] sm:$0xf]  ;;  %v247_v13 = vld [vmem:[%s1553_s0 + $0x3c] sm:$0xf] }
  0x39   : > { %244 = vst [vmem:[%s1558_s6 + $0xc] sm:$0xf] %v243_v11  ;;  %246 = vst [vmem:[%s1558_s6 + $0x10] sm:$0xf] %v245_v12  ;;  %v249_v14 = vld [vmem:[%s1553_s0 + $0x48] sm:$0xf] }
  0x3a   : > { %248 = vst [vmem:[%s1558_s6 + $0x14] sm:$0xf] %v247_v13  ;;  %v251_v15 = vld [vmem:[%s1553_s0 + $0x54] sm:$0xf]  ;;  %v253_v16 = vld [vmem:[%s1553_s0 + $0x60] sm:$0xf] }
  0x3b   : > { %250 = vst [vmem:[%s1558_s6 + $0x18] sm:$0xf] %v249_v14  ;;  %252 = vst [vmem:[%s1558_s6 + $0x1c] sm:$0xf] %v251_v15  ;;  %v255_v17 = vld [vmem:[%s1553_s0 + $0x6c] sm:$0xf] }
  0x3c   : > { %254 = vst [vmem:[%s1558_s6 + $0x20] sm:$0xf] %v253_v16  ;;  %v257_v18 = vld [vmem:[%s1553_s0 + $0x78] sm:$0xf]  ;;  %v259_v19 = vld [vmem:[%s1553_s0 + $0x84] sm:$0xf] }
  0x3d   : > { %256 = vst [vmem:[%s1558_s6 + $0x24] sm:$0xf] %v255_v17  ;;  %258 = vst [vmem:[%s1558_s6 + $0x28] sm:$0xf] %v257_v18  ;;  %v261_v20 = vld [vmem:[%s1553_s0 + $0x90] sm:$0xf] }
  0x3e   : > { %260 = vst [vmem:[%s1558_s6 + $0x2c] sm:$0xf] %v259_v19  ;;  %v263_v21 = vld [vmem:[%s1553_s0 + $0x9c] sm:$0xf]  ;;  %v265_v22 = vld [vmem:[%s1553_s0 + $0xa8] sm:$0xf] }
  0x3f   : > { %262 = vst [vmem:[%s1558_s6 + $0x30] sm:$0xf] %v261_v20  ;;  %264 = vst [vmem:[%s1558_s6 + $0x34] sm:$0xf] %v263_v21  ;;  %v267_v23 = vld [vmem:[%s1553_s0 + $0xb4] sm:$0xf] }
  0x40   : > { %266 = vst [vmem:[%s1558_s6 + $0x38] sm:$0xf] %v265_v22  ;;  %v269_v24 = vld [vmem:[%s1553_s0 + $0xc0] sm:$0xf]  ;;  %v271_v25 = vld [vmem:[%s1553_s0 + $0xcc] sm:$0xf] }
  0x41   : > { %268 = vst [vmem:[%s1558_s6 + $0x3c] sm:$0xf] %v267_v23  ;;  %270 = vst [vmem:[%s1558_s6 + $0x40] sm:$0xf] %v269_v24  ;;  %v273_v26 = vld [vmem:[%s1553_s0 + $0xd8] sm:$0xf] }
  0x42   : > { %272 = vst [vmem:[%s1558_s6 + $0x44] sm:$0xf] %v271_v25  ;;  %v275_v27 = vld [vmem:[%s1553_s0 + $0xe4] sm:$0xf]  ;;  %v277_v28 = vld [vmem:[%s1553_s0 + $0xf0] sm:$0xf] }
  0x43   : > { %274 = vst [vmem:[%s1558_s6 + $0x48] sm:$0xf] %v273_v26  ;;  %276 = vst [vmem:[%s1558_s6 + $0x4c] sm:$0xf] %v275_v27  ;;  %v279_v29 = vld [vmem:[%s1553_s0 + $0xfc] sm:$0xf] }
  0x44   : > { %278 = vst [vmem:[%s1558_s6 + $0x50] sm:$0xf] %v277_v28  ;;  %v281_v30 = vld [vmem:[%s1553_s0 + $0x108] sm:$0xf]  ;;  %v283_v31 = vld [vmem:[%s1553_s0 + $0x114] sm:$0xf] }
  0x45   : > { %280 = vst [vmem:[%s1558_s6 + $0x54] sm:$0xf] %v279_v29  ;;  %282 = vst [vmem:[%s1558_s6 + $0x58] sm:$0xf] %v281_v30  ;;  %v285_v32 = vld [vmem:[%s1553_s0 + $0x120] sm:$0xf] }
  0x46   : > { %284 = vst [vmem:[%s1558_s6 + $0x5c] sm:$0xf] %v283_v31  ;;  %v287_v33 = vld [vmem:[%s1553_s0 + $0x12c] sm:$0xf]  ;;  %v289_v34 = vld [vmem:[%s1553_s0 + $0x138] sm:$0xf] }
  0x47   : > { %286 = vst [vmem:[%s1558_s6 + $0x60] sm:$0xf] %v285_v32  ;;  %288 = vst [vmem:[%s1558_s6 + $0x64] sm:$0xf] %v287_v33  ;;  %v291_v35 = vld [vmem:[%s1553_s0 + $0x144] sm:$0xf] }
  0x48   : > { %290 = vst [vmem:[%s1558_s6 + $0x68] sm:$0xf] %v289_v34  ;;  %v293_v36 = vld [vmem:[%s1553_s0 + $0x150] sm:$0xf]  ;;  %v295_v37 = vld [vmem:[%s1553_s0 + $0x15c] sm:$0xf] }
  0x49   : > { %292 = vst [vmem:[%s1558_s6 + $0x6c] sm:$0xf] %v291_v35  ;;  %294 = vst [vmem:[%s1558_s6 + $0x70] sm:$0xf] %v293_v36  ;;  %v297_v38 = vld [vmem:[%s1553_s0 + $0x168] sm:$0xf] }
  0x4a   : > { %296 = vst [vmem:[%s1558_s6 + $0x74] sm:$0xf] %v295_v37  ;;  %v299_v39 = vld [vmem:[%s1553_s0 + $0x174] sm:$0xf]  ;;  %v301_v40 = vld [vmem:[%s1553_s0 + $0x180] sm:$0xf] }
  0x4b   : > { %298 = vst [vmem:[%s1558_s6 + $0x78] sm:$0xf] %v297_v38  ;;  %300 = vst [vmem:[%s1558_s6 + $0x7c] sm:$0xf] %v299_v39  ;;  %v303_v41 = vld [vmem:[%s1553_s0 + $0x18c] sm:$0xf] }
  0x4c   : > { %302 = vst [vmem:[%s1558_s6 + $0x80] sm:$0xf] %v301_v40  ;;  %v305_v42 = vld [vmem:[%s1553_s0 + $0x198] sm:$0xf]  ;;  %v307_v43 = vld [vmem:[%s1553_s0 + $0x1a4] sm:$0xf] }
  0x4d   : > { %304 = vst [vmem:[%s1558_s6 + $0x84] sm:$0xf] %v303_v41  ;;  %306 = vst [vmem:[%s1558_s6 + $0x88] sm:$0xf] %v305_v42  ;;  %v309_v44 = vld [vmem:[%s1553_s0 + $0x1b0] sm:$0xf] }
  0x4e   : > { %308 = vst [vmem:[%s1558_s6 + $0x8c] sm:$0xf] %v307_v43  ;;  %v311_v45 = vld [vmem:[%s1553_s0 + $0x1bc] sm:$0xf]  ;;  %v313_v46 = vld [vmem:[%s1553_s0 + $0x1c8] sm:$0xf] }
  0x4f   : > { %310 = vst [vmem:[%s1558_s6 + $0x90] sm:$0xf] %v309_v44  ;;  %312 = vst [vmem:[%s1558_s6 + $0x94] sm:$0xf] %v311_v45  ;;  %v315_v47 = vld [vmem:[%s1553_s0 + $0x1d4] sm:$0xf] }
  0x50   : > { %314 = vst [vmem:[%s1558_s6 + $0x98] sm:$0xf] %v313_v46  ;;  %v317_v48 = vld [vmem:[%s1553_s0 + $0x1e0] sm:$0xf]  ;;  %v319_v49 = vld [vmem:[%s1553_s0 + $0x1ec] sm:$0xf] }
  0x51   : > { %316 = vst [vmem:[%s1558_s6 + $0x9c] sm:$0xf] %v315_v47  ;;  %318 = vst [vmem:[%s1558_s6 + $0xa0] sm:$0xf] %v317_v48  ;;  %v321_v50 = vld [vmem:[%s1553_s0 + $0x1f8] sm:$0xf] }
  0x52   : > { %320 = vst [vmem:[%s1558_s6 + $0xa4] sm:$0xf] %v319_v49  ;;  %v323_v51 = vld [vmem:[%s1553_s0 + $0x204] sm:$0xf]  ;;  %v325_v52 = vld [vmem:[%s1553_s0 + $0x210] sm:$0xf] }
  0x53   : > { %322 = vst [vmem:[%s1558_s6 + $0xa8] sm:$0xf] %v321_v50  ;;  %324 = vst [vmem:[%s1558_s6 + $0xac] sm:$0xf] %v323_v51  ;;  %v327_v53 = vld [vmem:[%s1553_s0 + $0x21c] sm:$0xf] }
  0x54   : > { %326 = vst [vmem:[%s1558_s6 + $0xb0] sm:$0xf] %v325_v52  ;;  %v329_v54 = vld [vmem:[%s1553_s0 + $0x228] sm:$0xf]  ;;  %v331_v55 = vld [vmem:[%s1553_s0 + $0x234] sm:$0xf] }
  0x55   : > { %328 = vst [vmem:[%s1558_s6 + $0xb4] sm:$0xf] %v327_v53  ;;  %330 = vst [vmem:[%s1558_s6 + $0xb8] sm:$0xf] %v329_v54 }
  0x56   : > { %332 = vst [vmem:[%s1558_s6 + $0xbc] sm:$0xf] %v331_v55 }
  0x57 PF: > { %p1086_p0 = scmp.ge.s32.totalorder %s1416_s22, 1  ;;  %p456_p1 = scmp.lt.s32.totalorder %s1416_s22, 19 }
  0x59   : > { %p457_p2 = pnand %p1086_p0, %p456_p1 }
  0x5a   : > { %s463_s5 = sand.u32 (!%p457_p2), 1, %s1392_s16   ;;  %s470_s23 = sand.u32 (!%p457_p2), 1, %s1384_s14  }
  0x5b   : > { %460 = sbr.rel (%p457_p2) target bundleno = 391 (0x187), region = 91  ;;  %s496_s0 = sand.u32 (!%p457_p2), 1, %s1376_s12  }
  0x5c   : > { %s1206_s28 = smul.u32 (!%p457_p2), 48, %s463_s5  ;;  %s1087_s11 = sshll.u32 (!%p457_p2), %s496_s0, 4 }
  0x5d   : > { %s1207_s7 = smul.u32 (!%p457_p2), 192, %s470_s23  ;;  %p502_p3 = scmp.lt.s32.totalorder (!%p457_p2), %s1404_s19, 2 }
  0x5e   : > { %s1666_s6 = scalar_lea.vmem (!%p457_p2), [#allocation3], %s1206_s28  ;;  %s1670_s25 = scalar_lea.vmem (!%p457_p2), [#allocation5], %s1087_s11 }
  0x5f   : > { %s1668_s1 = scalar_lea.vmem (!%p457_p2), [#allocation4], %s1207_s7  ;;  %p1088_p4 = scmp.ne.s32.totalorder (!%p457_p2), %s1400_s18, 0 }
  0x62   : > { %s1660_s26 = scalar_select %p502_p3, %s1404_s19, 2 }
  0x63   : > { %510 = sbr.rel (%p1088_p4) target bundleno = 106 (0x6a), region = 103  ;;  %v1418_v56 = vmov (!%p1088_p4), 0.0  }
  0x64   : > { %s504_s4 = scalar_lea.vmem %s1756_s2, %s1660_s26  ;;  %511 = vst [vmem:[#allocation2] sm:$0xff] (!%p1088_p4), %v1418_v56  ;;  %512 = vst [vmem:[#allocation2 + $0x8] sm:$0xff] (!%p1088_p4), %v1418_v56 }
  0x65   : > { %513 = vst [vmem:[#allocation2 + $0x10] sm:$0xff] (!%p1088_p4), %v1418_v56  ;;  %514 = vst [vmem:[#allocation2 + $0x18] sm:$0xff] (!%p1088_p4), %v1418_v56 }
  0x6a PF: > { %v1298_v57 = vld [vmem:[%s1668_s1 + $0x40] sm:$0xff]   ;;  %v1301_v60 = vld [vmem:[%s1668_s1 + $0x48] sm:$0xff]   ;;  %v1304_v63 = vld [vmem:[%s1668_s1 + $0x50] sm:$0xff]   ;;  %p1119_p5 = scmp.ne.s32.totalorder %s1400_s18, 5 }
  0x6b   : > { %v1299_v58 = vld [vmem:[%s1668_s1] sm:$0xff]   ;;  %1145 = vmatprep.subr.bf16.mxu0 %v1298_v57  ;;  %v1302_v61 = vld [vmem:[%s1668_s1 + $0x8] sm:$0xff]   ;;  %v1305_v0 = vld [vmem:[%s1668_s1 + $0x10] sm:$0xff]  }
  0x6c   : > { %v1300_v59 = vld [vmem:[%s1668_s1 + $0x80] sm:$0xff]   ;;  %1146 = vmatpush3.bf16.msra.mxu0 %v1299_v58  ;;  %v1303_v62 = vld [vmem:[%s1668_s1 + $0x88] sm:$0xff]   ;;  %v1306_v1 = vld [vmem:[%s1668_s1 + $0x90] sm:$0xff]  }
  0x6d   : > { %1183 = vmatprep.subr.bf16.mxu1 %v1300_v59  ;;  %1147 = vmatprep.subr.bf16.mxu0 %v1301_v60  ;;  %v1307_v2 = vld [vmem:[%s1668_s1 + $0x58] sm:$0xff]   ;;  %v1310_v5 = vld [vmem:[%s1668_s1 + $0x60] sm:$0xff]   ;;  %v1313_v8 = vld [vmem:[%s1668_s1 + $0x68] sm:$0xff]  }
  0x6e   : > { %1184 = vmatpush3.bf16.msra.mxu1 %v1300_v59  ;;  %v1308_v3 = vld [vmem:[%s1668_s1 + $0x18] sm:$0xff]   ;;  %v1312_v6 = vld [vmem:[%s1668_s1 + $0xa0] sm:$0xff]   ;;  %v1315_v9 = vld [vmem:[%s1668_s1 + $0xa8] sm:$0xff]  }
  0x6f   : > { %1185 = vmatprep.subr.bf16.mxu1 %v1303_v62  ;;  %v1309_v4 = vld [vmem:[%s1668_s1 + $0x98] sm:$0xff]   ;;  %v1311_v7 = vld [vmem:[%s1668_s1 + $0x20] sm:$0xff]   ;;  %v1314_v10 = vld [vmem:[%s1668_s1 + $0x28] sm:$0xff]  }
  0x70   : > { %1148 = vmatpush3.bf16.msra.mxu0 %v1302_v61  ;;  %v1316_v11 = vld [vmem:[%s1668_s1 + $0x70] sm:$0xff]   ;;  %v1319_v14 = vld [vmem:[%s1668_s1 + $0x78] sm:$0xff]   ;;  %v515_v29 = vld [vmem:[#allocation2] sm:$0xff] }
  0x71   : > { %1149 = vmatprep.subr.bf16.mxu0 %v1304_v63  ;;  %v1317_v12 = vld [vmem:[%s1668_s1 + $0x30] sm:$0xff]   ;;  %v1321_v15 = vld [vmem:[%s1668_s1 + $0xb8] sm:$0xff]   ;;  %v516_v34 = vld [vmem:[#allocation2 + $0x8] sm:$0xff] }
  0x72   : > { %1186 = vmatpush3.bf16.msra.mxu1 %v1303_v62  ;;  %v1318_v13 = vld [vmem:[%s1668_s1 + $0xb0] sm:$0xff]   ;;  %v1320_v18 = vld [vmem:[%s1668_s1 + $0x38] sm:$0xff]   ;;  %v1120_v53 = vld [vmem:[%s504_s4] ss:$0 sm:$0xff] (!%p1119_p5) }
  0x73   : > { %1187 = vmatprep.subr.bf16.mxu1 %v1306_v1  ;;  %v1324_v16 = vld [vmem:[%s1666_s6 + $0x4] ss:$12 sps:$4 sm:$0xff]   ;;  %v1325_v17 = vld [vmem:[%s1666_s6 + $0x8] ss:$12 sps:$4 sm:$0xff]   ;;  %v1322_v19 = vld [vmem:[%s1666_s6] ss:$12 sps:$4 sm:$0xff]  }
  0x74   : > { %1150 = vmatpush3.bf16.msra.mxu0 %v1305_v0  ;;  %783 = vmatprep.mubr.bf16.mxu0 %v1324_v16  ;;  %v1327_v20 = vld [vmem:[%s1666_s6 + $0x1c] ss:$12 sps:$4 sm:$0xff]   ;;  %v1326_v21 = vld [vmem:[%s1666_s6 + $0x20] ss:$12 sps:$4 sm:$0xff]   ;;  %v1329_v22 = vld [vmem:[%s1666_s6 + $0x18] ss:$12 sps:$4 sm:$0xff]  }
  0x75   : > { %1151 = vmatprep.subr.bf16.mxu0 %v1307_v2  ;;  %1199 = vmatprep.mubr.bf16.mxu1 %v1325_v17  ;;  %v517_v43 = vld [vmem:[#allocation2 + $0x10] sm:$0xff]  ;;  %v518_v47 = vld [vmem:[#allocation2 + $0x18] sm:$0xff] }
  0x76   : > { %1188 = vmatpush3.bf16.msra.mxu1 %v1306_v1 }
  0x77   : > { %1189 = vmatprep.subr.bf16.mxu1 %v1309_v4 }
  0x78   : > { %1152 = vmatpush3.bf16.msra.mxu0 %v1308_v3 }
  0x79   : > { %1153 = vmatprep.subr.bf16.mxu0 %v1310_v5 }
  0x7a   : > { %1190 = vmatpush3.bf16.msra.mxu1 %v1309_v4 }
  0x7b   : > { %1191 = vmatprep.subr.bf16.mxu1 %v1312_v6 }
  0x7c   : > { %1154 = vmatpush3.bf16.msra.mxu0 %v1311_v7 }
  0x7d   : > { %1155 = vmatprep.subr.bf16.mxu0 %v1313_v8 }
  0x7e   : > { %1192 = vmatpush3.bf16.msra.mxu1 %v1312_v6 }
  0x7f   : > { %1193 = vmatprep.subr.bf16.mxu1 %v1315_v9 }
  0x80   : > { %1156 = vmatpush3.bf16.msra.mxu0 %v1314_v10 }
  0x81   : > { %1157 = vmatprep.subr.bf16.mxu0 %v1316_v11 }
  0x82   : > { %1194 = vmatpush3.bf16.msra.mxu1 %v1315_v9 }
  0x83   : > { %1195 = vmatprep.subr.bf16.mxu1 %v1318_v13 }
  0x84   : > { %1158 = vmatpush3.bf16.msra.mxu0 %v1317_v12 }
  0x85   : > { %1159 = vmatprep.subr.bf16.mxu0 %v1319_v14 }
  0x86   : > { %1196 = vmatpush3.bf16.msra.mxu1 %v1318_v13 }
  0x87   : > { %1197 = vmatprep.subr.bf16.mxu1 %v1321_v15 }
  0x88   : > { %1160 = vmatpush3.bf16.msra.mxu0 %v1320_v18 }
  0x8a   : > { %1198 = vmatpush3.bf16.msra.mxu1 %v1321_v15 }
  0x8b   : > { %784 = vmatmul.mubr.bf16.vlgmr.msra.gmra.mrb[0].mxu0 %v1322_v19 }
  0x8c   : > { %791 = vmatprep.mubr.bf16.mxu0 %v1327_v20 }
  0x8d   : > { %1200 = vmatmul.mubr.bf16.vlgmr.msra.gmra.mrb[0].mxu1 %v1326_v21 }
  0x93   : > { %792 = vmatmul.mubr.bf16.gmra.mrb[4].mxu0 %v1329_v22 }
 0x15e   : > { %v1161_v23 = vpop.f32.mrb[0].mxu0 }
 0x15f   : > { %v1162_v24 = vpop.f32.mrb[1].mxu0 }
 0x160   : > { %v1163_v25 = vadd.f32 %v1162_v24, %v1161_v23  ;;  %v1164_v26 = vpop.f32.mrb[2].mxu0  ;;  %v1201_v27 = vpop.f32.mrb[0].mxu1 }
 0x161   : > { %v1165_v28 = vpop.f32.mrb[3].mxu0  ;;  %v834_v30 = vpop.f32.mrb[1].mxu1 }
 0x162   : > { %v1166_v31 = vadd.f32 %v1165_v28, %v1164_v26  ;;  %v835_v32 = vadd.f32 %v1163_v25, %v834_v30  ;;  %v1202_v33 = vpop.f32.mrb[2].mxu1 }
 0x163   : > { %v837_v35 = vpop.f32.mrb[3].mxu1 }
 0x164   : > { %v849_v36 = vadd.f32 %v835_v32, %v515_v29  ;;  %v838_v37 = vadd.f32 %v1166_v31, %v837_v35 }
 0x166   : > { %853 = vst [vmem:[#allocation2] sm:$0xff] %v849_v36  ;;  %v850_v38 = vadd.f32 %v838_v37, %v516_v34  ;;  %v1167_v39 = vpop.f32.mrb[4].mxu0 }
 0x167   : > { %v1168_v40 = vpop.f32.mrb[5].mxu0 }
 0x168   : > { %854 = vst [vmem:[#allocation2 + $0x8] sm:$0xff] %v850_v38  ;;  %v1169_v41 = vadd.f32 %v1168_v40, %v1167_v39  ;;  %v1170_v42 = vpop.f32.mrb[6].mxu0 }
 0x169   : > { %v1171_v44 = vpop.f32.mrb[7].mxu0 }
 0x16a   : > { %v843_v45 = vadd.f32 %v1201_v27, %v1169_v41  ;;  %v1172_v46 = vadd.f32 %v1171_v44, %v1170_v42  ;;  %860 = sbr.rel (%p1119_p5) target bundleno = 383 (0x17f), region = 107 }
 0x16c   : > { %v851_v48 = vadd.f32 %v843_v45, %v517_v43  ;;  %v846_v49 = vadd.f32 %v1202_v33, %v1172_v46 }
 0x16d   : > { %v861_v51 = vld [vmem:[#allocation2] sm:$0xff] (!%p1119_p5) }
 0x16e   : > { %855 = vst [vmem:[#allocation2 + $0x10] sm:$0xff] %v851_v48  ;;  %v852_v50 = vadd.f32 %v846_v49, %v518_v47  ;;  %v872_v54 = vadd.f32 (!%p1119_p5), %v1120_v53, %v861_v51 }
 0x16f   : > { %v862_v52 = vld [vmem:[#allocation2 + $0x8] sm:$0xff] (!%p1119_p5) }
 0x170   : > { %856 = vst [vmem:[#allocation2 + $0x18] sm:$0xff] %v852_v50  ;;  %v873_v55 = vadd.f32 (!%p1119_p5), %v1120_v53, %v862_v52  ;;  %v876_v60 = vmax.f32 (!%p1119_p5), %v872_v54, 0.0 }
 0x172   : > { %v877_v61 = vmax.f32 %v873_v55, 0.0 }
 0x174   : > { %v1137_v0 = vpack.c.bf16 %v877_v61, %v876_v60 }
 0x175   : > { %v863_v56 = vld [vmem:[#allocation2 + $0x10] sm:$0xff] }
 0x176   : > { %v874_v58 = vadd.f32 %v1120_v53, %v863_v56  ;;  %1138 = vst [vmem:[%s1670_s25] sm:$0xff] %v1137_v0  }
 0x177   : > { %v864_v57 = vld [vmem:[#allocation2 + $0x18] sm:$0xff] }
 0x178   : > { %v875_v59 = vadd.f32 %v1120_v53, %v864_v57  ;;  %v878_v62 = vmax.f32 %v874_v58, 0.0 }
 0x17a   : > { %v879_v63 = vmax.f32 %v875_v59, 0.0 }
 0x17c   : > { %v1142_v1 = vpack.c.bf16 %v879_v63, %v878_v62 }
 0x17e   : > { %1144 = vst [vmem:[%s1670_s25 + $0x8] sm:$0xff] %v1142_v1  }
 0x17f PF: > { %906 = sbr.rel (!%p1533_p12) target bundleno = 391 (0x187), region = 111  ;;  %s1126_s14 = sshll.u32 (%p1533_p12), %s1404_s19, 2  ;;  %v927_v2 = vld [vmem:[%s1670_s25] sm:$0xf] (%p1533_p12)  ;;  %v929_v3 = vld [vmem:[%s1670_s25 + $0x4] sm:$0xf] (%p1533_p12) }
 0x180   : > { %s911_s5 = scalar_lea.vmem (%p1533_p12), %s1757_s3, %s1126_s14 }
 0x181   : > { %928 = vst [vmem:[%s911_s5] sm:$0xf] (%p1533_p12), %v927_v2  ;;  %930 = vst [vmem:[%s911_s5 + $0xc] sm:$0xf] (%p1533_p12), %v929_v3 }
 0x185   : > { %v931_v4 = vld [vmem:[%s1670_s25 + $0x8] sm:$0xf] (%p1533_p12)  ;;  %v933_v5 = vld [vmem:[%s1670_s25 + $0xc] sm:$0xf] (%p1533_p12) }
 0x186   : > { %932 = vst [vmem:[%s911_s5 + $0x18] sm:$0xf] %v931_v4  ;;  %934 = vst [vmem:[%s911_s5 + $0x24] sm:$0xf] %v933_v5 }
 0x187 PF: > { %s13_s22 = sadd.s32 1, %s1416_s22   ;;  %s1767_s10 = sld [smem:[#allocation6_spill]] }
 0x188   : > { %p10_p6 = scmp.ge.s32.totalorder %s13_s22, 20   ;;  %s1768_s12 = smov %s1380_s13 }
 0x189   : > { %s1769_s13 = smov %s1531_s9  ;;  %s1770_s14 = smov %s1388_s15 }
 0x18a   : > { %s1771_s15 = smov %s1528_s8  ;;  %s1772_s16 = smov %s1396_s17 }
 0x18b   : > { %s1773_s17 = smov %s1514_s30  ;;  %s1774_s18 = smov %s1408_s20 }
 0x18c   : > { %s1775_s19 = smov %s1412_s21  ;;  %s1776_s20 = smov %s1779_s24 }
 0x18d   : > { %s1777_s21 = smov %s1767_s10  ;;  %12 = sbr.rel (!%p10_p6) target bundleno = 9 (0x9), region = 200 }

// kernel: alexnet_forward.15
= control target key start
LH: loop header
LB: loop body
LE: loop exit
PB: predicated region body
PF: predicated region fallthrough
CT: control target
= control target key end

     0   :  { %s1260_s12 = smov 0   ;;  %s1262_s13 = smov 0   ;;  %s1402_s0 = inlined_call_operand.vmem [shape: bf16[32,2304], index: 0, kind: input, shape index: {}]   ;;  %s1403_s1 = inlined_call_operand.vmem [shape: bf16[2304,256], index: 1, kind: input, shape index: {}]   ;;  %s1404_s2 = inlined_call_operand.vmem [shape: f32[1,256], index: 2, kind: input, shape index: {}]   ;;  %s1405_s3 = inlined_call_operand.vmem [shape: bf16[32,256], index: 3, kind: output, shape index: {}]  }
   0x1   :  { %s1264_s14 = smov 0   ;;  %s1266_s15 = smov 0  }
   0x2   :  { %s1268_s16 = smov 0  }
   0x3 LB: > { %s25_s17 = sadd.s32 1, %s1232_s15  ;;  %p48_p1 = scmp.ne.s32.totalorder %s1224_s13, %s1220_s12  ;;  %s1236_s16 = sphi %s1268_s16, %s13_s16   ;;  %s1232_s15 = sphi %s1266_s15, %s1409_s15   ;;  %s1228_s14 = sphi %s1264_s14, %s1408_s14   ;;  %s1224_s13 = sphi %s1262_s13, %s1407_s13   ;;  %s1220_s12 = sphi %s1260_s12, %s1406_s12  }
   0x4   : > { %p26_p0 = scmp.ge.s32.totalorder %s25_s17, 6  ;;  %p49_p2 = scmp.eq.s32.totalorder %s1236_s16, 0 }
   0x5   : > { %s41_s19 = sadd.s32 1, %s1224_s13  ;;  %p983_p5 = scmp.ge.s32.totalorder %s1236_s16, 6 }
   0x6   : > { %s1411_s17 = smov (%p26_p0, %s25_s17), 0  ;;  %p50_p3 = por %p49_p2, %p48_p1 }
   0x7   : > { %s37_s18 = ssub.s32 %s1232_s15, %s1411_s17  ;;  %164 = sbr.rel (%p983_p5) target bundleno = 23 (0x17), region = 20 }
   0x8   : > { %p39_p4 = scmp.eq.s32.totalorder %s37_s18, 0 }
   0xa   : > { %s1295_s20 = scalar_select %p39_p4, %s1224_s13, %s41_s19  }
   0xe   : > { %167 = sbr.rel (!%p50_p3) target bundleno = 23 (0x17), region = 24  ;;  %s169_s21 = sand.u32 (%p50_p3), 1, %s1224_s13  }
   0xf   : > { %s1060_s22 = smul.u32 (%p50_p3), 12, %s1232_s15 }
  0x10   : > { %s1074_s23 = smul.u32 (%p50_p3), 48, %s169_s21 }
  0x11   : > { %s177_s26 = scalar_lea.vmem (%p50_p3), %s1402_s0, %s1060_s22 }
  0x12   : > { %v192_v0 = vld [vmem:[%s177_s26] sm:$0xff] (%p50_p3)  ;;  %v194_v1 = vld [vmem:[%s177_s26 + $0x48] sm:$0xff] (%p50_p3)  ;;  %v196_v2 = vld [vmem:[%s177_s26 + $0x90] sm:$0xff] (%p50_p3)  ;;  %s171_s27 = scalar_lea.vmem (%p50_p3), [#allocation3], %s1074_s23 }
  0x13   : > { %193 = vst [vmem:[%s171_s27] sm:$0xff] (%p50_p3), %v192_v0  ;;  %195 = vst [vmem:[%s171_s27 + $0xc] sm:$0xff] (%p50_p3), %v194_v1  ;;  %v198_v3 = vld [vmem:[%s177_s26 + $0xd8] sm:$0xff] (%p50_p3)  ;;  %v985_v4 = vld [vmem:[%s177_s26 + $0x8] sm:$0xf] (%p50_p3) }
  0x14   : > { %197 = vst [vmem:[%s171_s27 + $0x18] sm:$0xff] (%p50_p3), %v196_v2  ;;  %v987_v5 = vld [vmem:[%s177_s26 + $0x50] sm:$0xf] (%p50_p3)  ;;  %199 = vst [vmem:[%s171_s27 + $0x24] sm:$0xff] (%p50_p3), %v198_v3  ;;  %v989_v6 = vld [vmem:[%s177_s26 + $0x98] sm:$0xf] (%p50_p3) }
  0x15   : > { %986 = vst [vmem:[%s171_s27 + $0x8] sm:$0xf] %v985_v4  ;;  %988 = vst [vmem:[%s171_s27 + $0x14] sm:$0xf] %v987_v5  ;;  %v991_v7 = vld [vmem:[%s177_s26 + $0xe0] sm:$0xf] }
  0x16   : > { %990 = vst [vmem:[%s171_s27 + $0x20] sm:$0xf] %v989_v6  ;;  %992 = vst [vmem:[%s171_s27 + $0x2c] sm:$0xf] %v991_v7 }
  0x17 PF: > { %p993_p6 = scmp.ge.s32.totalorder %s1236_s16, 1  ;;  %p234_p7 = scmp.lt.s32.totalorder %s1236_s16, 7 }
  0x19   : > { %p235_p8 = pnand %p993_p6, %p234_p7 }
  0x1a   : > { %s241_s28 = sand.u32 (!%p235_p8), 1, %s1220_s12   ;;  %s285_s29 = smul.u32 (!%p235_p8), 48, %s1228_s14 }
  0x1b   : > { %238 = sbr.rel (%p235_p8) target bundleno = 348 (0x15c), region = 54  ;;  %p996_p10 = scmp.ne.s32.totalorder (!%p235_p8), %s1228_s14, 0 }
  0x1c   : > { %s1075_s30 = smul.u32 (!%p235_p8), 48, %s241_s28  ;;  %p287_p9 = scmp.lt.s32.totalorder (!%p235_p8), %s285_s29, 287 }
  0x1e   : > { %s1312_s8 = scalar_lea.vmem (!%p235_p8), [#allocation3], %s1075_s30 }
  0x22   : > { %s1413_s29 = smov (!%p287_p9, %s285_s29), 287  ;;  %318 = sbr.rel (%p996_p10) target bundleno = 41 (0x29), region = 62 }
  0x23   : > { %s1061_s4 = sshll.u32 %s1413_s29, 3  ;;  %v1238_v8 = vmov (!%p996_p10), 0.0  }
  0x24   : > { %s1310_s7 = scalar_lea.vmem %s1403_s1, %s1061_s4  ;;  %319 = vst [vmem:[#allocation2] sm:$0xff] (!%p996_p10), %v1238_v8  ;;  %320 = vst [vmem:[#allocation2 + $0x8] sm:$0xff] (!%p996_p10), %v1238_v8 }
  0x25   : > { %321 = vst [vmem:[#allocation2 + $0x10] sm:$0xff] (!%p996_p10), %v1238_v8  ;;  %322 = vst [vmem:[#allocation2 + $0x18] sm:$0xff] (!%p996_p10), %v1238_v8 }
  0x26   : > { %323 = vst [vmem:[#allocation2 + $0x20] sm:$0xff] (!%p996_p10), %v1238_v8  ;;  %324 = vst [vmem:[#allocation2 + $0x28] sm:$0xff] (!%p996_p10), %v1238_v8 }
  0x27   : > { %325 = vst [vmem:[#allocation2 + $0x30] sm:$0xff] (!%p996_p10), %v1238_v8  ;;  %326 = vst [vmem:[#allocation2 + $0x38] sm:$0xff] (!%p996_p10), %v1238_v8 }
  0x29 PF: > { %v1118_v9 = vld [vmem:[%s1310_s7 + $0x4] ss:$8 sps:$4 sm:$0xff]   ;;  %v1120_v10 = vld [vmem:[%s1310_s7] ss:$8 sps:$4 sm:$0xff]   ;;  %v1239_v11 = vmov 0   ;;  %p1051_p11 = scmp.ne.s32.totalorder %s1228_s14, 5 }
  0x2a   : > { %748 = vmatprep.mubr.bf16.mxu0 %v1239_v11  ;;  %663 = vmatprep.subr.bf16.mxu1 %v1118_v9  ;;  %v1121_v12 = vld [vmem:[%s1310_s7 + $0x14] ss:$8 sps:$4 sm:$0xff]   ;;  %v1123_v13 = vld [vmem:[%s1310_s7 + $0x10] ss:$8 sps:$4 sm:$0xff]   ;;  %v1124_v14 = vld [vmem:[%s1310_s7 + $0x24] ss:$8 sps:$4 sm:$0xff]  }
  0x2b   : > { %664 = vmatpush1.bf16.msra.mxu1 %v1120_v10  ;;  %v1126_v15 = vld [vmem:[%s1310_s7 + $0x20] ss:$8 sps:$4 sm:$0xff]   ;;  %v1127_v16 = vld [vmem:[%s1310_s7 + $0x34] ss:$8 sps:$4 sm:$0xff]   ;;  %v1129_v17 = vld [vmem:[%s1310_s7 + $0x30] ss:$8 sps:$4 sm:$0xff]  }
  0x2c   : > { %665 = vmatprep.subr.bf16.mxu1 %v1121_v12  ;;  %v1142_v18 = vld [vmem:[%s1310_s7 + $0x104] ss:$8 sps:$4 sm:$0xff]   ;;  %v1144_v19 = vld [vmem:[%s1310_s7 + $0x100] ss:$8 sps:$4 sm:$0xff]   ;;  %v1148_v21 = vld [vmem:[%s1310_s7 + $0x114] ss:$8 sps:$4 sm:$0xff]  }
  0x2d   : > { %v1130_v20 = vld [vmem:[%s1310_s7 + $0x44] ss:$8 sps:$4 sm:$0xff]   ;;  %716 = vmatprep.subr.bf16.mxu0 %v1142_v18  ;;  %v1150_v22 = vld [vmem:[%s1310_s7 + $0x110] ss:$8 sps:$4 sm:$0xff]   ;;  %v1132_v23 = vld [vmem:[%s1310_s7 + $0x40] ss:$8 sps:$4 sm:$0xff]  }
  0x2e   : > { %717 = vmatpush1.bf16.msra.mxu0 %v1144_v19  ;;  %v1133_v24 = vld [vmem:[%s1310_s7 + $0x54] ss:$8 sps:$4 sm:$0xff]   ;;  %v1154_v25 = vld [vmem:[%s1310_s7 + $0x124] ss:$8 sps:$4 sm:$0xff]   ;;  %v1156_v26 = vld [vmem:[%s1310_s7 + $0x120] ss:$8 sps:$4 sm:$0xff]  }
  0x2f   : > { %666 = vmatpush1.bf16.msra.mxu1 %v1123_v13  ;;  %718 = vmatprep.subr.bf16.mxu0 %v1148_v21  ;;  %v1135_v27 = vld [vmem:[%s1310_s7 + $0x50] ss:$8 sps:$4 sm:$0xff]   ;;  %v1160_v28 = vld [vmem:[%s1310_s7 + $0x134] ss:$8 sps:$4 sm:$0xff]   ;;  %v1136_v29 = vld [vmem:[%s1310_s7 + $0x64] ss:$8 sps:$4 sm:$0xff]  }
  0x30   : > { %667 = vmatprep.subr.bf16.mxu1 %v1124_v14  ;;  %v1162_v30 = vld [vmem:[%s1310_s7 + $0x130] ss:$8 sps:$4 sm:$0xff]   ;;  %v1138_v31 = vld [vmem:[%s1310_s7 + $0x60] ss:$8 sps:$4 sm:$0xff]   ;;  %v1166_v32 = vld [vmem:[%s1310_s7 + $0x144] ss:$8 sps:$4 sm:$0xff]  }
  0x31   : > { %v1139_v33 = vld [vmem:[%s1310_s7 + $0x74] ss:$8 sps:$4 sm:$0xff]   ;;  %v1168_v34 = vld [vmem:[%s1310_s7 + $0x140] ss:$8 sps:$4 sm:$0xff]   ;;  %v1141_v35 = vld [vmem:[%s1310_s7 + $0x70] ss:$8 sps:$4 sm:$0xff]  }
  0x32   : > { %719 = vmatpush1.bf16.msra.mxu0 %v1150_v22  ;;  %v1172_v36 = vld [vmem:[%s1310_s7 + $0x154] ss:$8 sps:$4 sm:$0xff]   ;;  %v1145_v37 = vld [vmem:[%s1310_s7 + $0x84] ss:$8 sps:$4 sm:$0xff]   ;;  %v1174_v38 = vld [vmem:[%s1310_s7 + $0x150] ss:$8 sps:$4 sm:$0xff]  }
  0x33   : > { %668 = vmatpush1.bf16.msra.mxu1 %v1126_v15  ;;  %720 = vmatprep.subr.bf16.mxu0 %v1154_v25  ;;  %v1147_v39 = vld [vmem:[%s1310_s7 + $0x80] ss:$8 sps:$4 sm:$0xff]   ;;  %v1178_v40 = vld [vmem:[%s1310_s7 + $0x164] ss:$8 sps:$4 sm:$0xff]   ;;  %v1151_v41 = vld [vmem:[%s1310_s7 + $0x94] ss:$8 sps:$4 sm:$0xff]  }
  0x34   : > { %669 = vmatprep.subr.bf16.mxu1 %v1127_v16  ;;  %v1153_v42 = vld [vmem:[%s1310_s7 + $0x90] ss:$8 sps:$4 sm:$0xff]   ;;  %v1180_v43 = vld [vmem:[%s1310_s7 + $0x160] ss:$8 sps:$4 sm:$0xff]   ;;  %v1184_v45 = vld [vmem:[%s1310_s7 + $0x174] ss:$8 sps:$4 sm:$0xff]  }
  0x35   : > { %v1193_v44 = vld [vmem:[%s1312_s8 + $0x4] ss:$12 sps:$4 sm:$0xff]   ;;  %v1190_v50 = vld [vmem:[%s1312_s8 + $0x8] ss:$12 sps:$4 sm:$0xff]   ;;  %v1194_v55 = vld [vmem:[%s1312_s8 + $0x20] ss:$12 sps:$4 sm:$0xff]  }
  0x36   : > { %721 = vmatpush1.bf16.msra.mxu0 %v1156_v26  ;;  %v1157_v46 = vld [vmem:[%s1310_s7 + $0xa4] ss:$8 sps:$4 sm:$0xff]   ;;  %695 = vmatprep.mubr.bf16.mxu1 %v1193_v44  ;;  %v1186_v47 = vld [vmem:[%s1310_s7 + $0x170] ss:$8 sps:$4 sm:$0xff]   ;;  %v1159_v48 = vld [vmem:[%s1310_s7 + $0xa0] ss:$8 sps:$4 sm:$0xff]  }
  0x37   : > { %670 = vmatpush1.bf16.msra.mxu1 %v1129_v17  ;;  %722 = vmatprep.subr.bf16.mxu0 %v1160_v28  ;;  %v1163_v49 = vld [vmem:[%s1310_s7 + $0xb4] ss:$8 sps:$4 sm:$0xff]   ;;  %v1165_v51 = vld [vmem:[%s1310_s7 + $0xb0] ss:$8 sps:$4 sm:$0xff]   ;;  %v1169_v52 = vld [vmem:[%s1310_s7 + $0xc4] ss:$8 sps:$4 sm:$0xff]  }
  0x38   : > { %671 = vmatprep.subr.bf16.mxu1 %v1130_v20  ;;  %v1171_v53 = vld [vmem:[%s1310_s7 + $0xc0] ss:$8 sps:$4 sm:$0xff]   ;;  %v1175_v54 = vld [vmem:[%s1310_s7 + $0xd4] ss:$8 sps:$4 sm:$0xff]   ;;  %v1177_v56 = vld [vmem:[%s1310_s7 + $0xd0] ss:$8 sps:$4 sm:$0xff]  }
  0x39   : > { %v1181_v57 = vld [vmem:[%s1310_s7 + $0xe4] ss:$8 sps:$4 sm:$0xff]   ;;  %v1183_v58 = vld [vmem:[%s1310_s7 + $0xe0] ss:$8 sps:$4 sm:$0xff]   ;;  %v1187_v59 = vld [vmem:[%s1310_s7 + $0xf4] ss:$8 sps:$4 sm:$0xff]  }
  0x3a   : > { %723 = vmatpush1.bf16.msra.mxu0 %v1162_v30  ;;  %v1189_v60 = vld [vmem:[%s1310_s7 + $0xf0] ss:$8 sps:$4 sm:$0xff]   ;;  %v327_v8 = vld [vmem:[#allocation2] sm:$0xff] }
  0x3b   : > { %672 = vmatpush1.bf16.msra.mxu1 %v1132_v23  ;;  %724 = vmatprep.subr.bf16.mxu0 %v1166_v32  ;;  %v1191_v61 = vld [vmem:[%s1312_s8] ss:$12 sps:$4 sm:$0xff]   ;;  %v1195_v62 = vld [vmem:[%s1312_s8 + $0x1c] ss:$12 sps:$4 sm:$0xff]   ;;  %v1197_v63 = vld [vmem:[%s1312_s8 + $0x18] ss:$12 sps:$4 sm:$0xff]  }
  0x3c   : > { %673 = vmatprep.subr.bf16.mxu1 %v1133_v24  ;;  %v329_v14 = vld [vmem:[#allocation2 + $0x10] sm:$0xff]  ;;  %v330_v18 = vld [vmem:[#allocation2 + $0x18] sm:$0xff]  ;;  %v331_v24 = vld [vmem:[#allocation2 + $0x20] sm:$0xff] }
  0x3d   : > { %v333_v30 = vld [vmem:[#allocation2 + $0x30] sm:$0xff] }
  0x3e   : > { %725 = vmatpush1.bf16.msra.mxu0 %v1168_v34  ;;  %v334_v34 = vld [vmem:[#allocation2 + $0x38] sm:$0xff] }
  0x3f   : > { %674 = vmatpush1.bf16.msra.mxu1 %v1135_v27  ;;  %726 = vmatprep.subr.bf16.mxu0 %v1172_v36  ;;  %v332_v27 = vld [vmem:[#allocation2 + $0x28] sm:$0xff] }
  0x40   : > { %675 = vmatprep.subr.bf16.mxu1 %v1136_v29 }
  0x42   : > { %727 = vmatpush1.bf16.msra.mxu0 %v1174_v38 }
  0x43   : > { %676 = vmatpush1.bf16.msra.mxu1 %v1138_v31  ;;  %728 = vmatprep.subr.bf16.mxu0 %v1178_v40  ;;  %v799_v40 = vlaneseq (!%p1051_p11) }
  0x44   : > { %677 = vmatprep.subr.bf16.mxu1 %v1139_v33 }
  0x46   : > { %729 = vmatpush1.bf16.msra.mxu0 %v1180_v43 }
  0x47   : > { %678 = vmatpush1.bf16.msra.mxu1 %v1141_v35  ;;  %730 = vmatprep.subr.bf16.mxu0 %v1184_v45 }
  0x48   : > { %679 = vmatprep.subr.bf16.mxu1 %v1145_v37 }
  0x4a   : > { %731 = vmatpush1.bf16.msra.mxu0 %v1186_v47 }
  0x4b   : > { %680 = vmatpush1.bf16.msra.mxu1 %v1147_v39 }
  0x4c   : > { %681 = vmatprep.subr.bf16.mxu1 %v1151_v41  ;;  %v800_v41 = vshrl.u32 (!%p1051_p11), %v799_v40, 7 }
  0x4d   : > { %749 = vmatmul.mubr.bf16.vlgmr.msra.gmra.mrb[0].mxu0 %v1190_v50 }
  0x4e   : > { %758 = vmatprep.mubr.bf16.mxu0 %v1239_v11  ;;  %v328_v11 = vld [vmem:[#allocation2 + $0x8] sm:$0xff]  ;;  %v801_v45 = vsub.s32 (!%p1051_p11), 0, %v800_v41 }
  0x4f   : > { %682 = vmatpush1.bf16.msra.mxu1 %v1153_v42  ;;  %v797_v42 = vld [vmem:[%s1404_s2] sm:$0x3] (!%p1051_p11) }
  0x50   : > { %683 = vmatprep.subr.bf16.mxu1 %v1157_v46  ;;  %v805_v46 = vsub.s32 (!%p1051_p11), 1, %v800_v41  ;;  %v802_v50 = vrot.slane (!%p1051_p11), %v797_v42, %v801_v45 }
  0x53   : > { %684 = vmatpush1.bf16.msra.mxu1 %v1159_v48 }
  0x54   : > { %685 = vmatprep.subr.bf16.mxu1 %v1163_v49 }
  0x55   : > { %759 = vmatmul.mubr.bf16.gmra.mrb[4].mxu0 %v1194_v55 }
  0x57   : > { %686 = vmatpush1.bf16.msra.mxu1 %v1165_v51  ;;  %v806_v51 = vrot.slane (!%p1051_p11), %v797_v42, %v805_v46 }
  0x58   : > { %687 = vmatprep.subr.bf16.mxu1 %v1169_v52 }
  0x5b   : > { %688 = vmatpush1.bf16.msra.mxu1 %v1171_v53 }
  0x5c   : > { %689 = vmatprep.subr.bf16.mxu1 %v1175_v54 }
  0x5f   : > { %690 = vmatpush1.bf16.msra.mxu1 %v1177_v56 }
  0x60   : > { %691 = vmatprep.subr.bf16.mxu1 %v1181_v57 }
  0x63   : > { %692 = vmatpush1.bf16.msra.mxu1 %v1183_v58 }
  0x64   : > { %693 = vmatprep.subr.bf16.mxu1 %v1187_v59 }
  0x67   : > { %694 = vmatpush1.bf16.msra.mxu1 %v1189_v60 }
  0x6a   : > { %696 = vmatmul.mubr.bf16.vlgmr.msra.gmra.mrb[0].mxu1 %v1191_v61 }
  0x6b   : > { %705 = vmatprep.mubr.bf16.mxu1 %v1195_v62 }
  0x72   : > { %706 = vmatmul.mubr.bf16.gmra.mrb[4].mxu1 %v1197_v63 }
 0x120   : > { %v750_v0 = vpop.f32.mrb[0].mxu0 }
 0x121   : > { %v752_v1 = vpop.f32.mrb[1].mxu0 }
 0x122   : > { %v754_v2 = vpop.f32.mrb[2].mxu0 }
 0x123   : > { %v756_v3 = vpop.f32.mrb[3].mxu0 }
 0x128   : > { %v760_v4 = vpop.f32.mrb[4].mxu0 }
 0x129   : > { %v762_v5 = vpop.f32.mrb[5].mxu0 }
 0x12a   : > { %v764_v6 = vpop.f32.mrb[6].mxu0 }
 0x12b   : > { %v766_v7 = vpop.f32.mrb[7].mxu0 }
 0x13d   : > { %v697_v9 = vpop.f32.mrb[0].mxu1 }
 0x13e   : > { %v751_v10 = vadd.f32 %v750_v0, %v697_v9  ;;  %v699_v12 = vpop.f32.mrb[1].mxu1 }
 0x13f   : > { %v753_v13 = vadd.f32 %v752_v1, %v699_v12  ;;  %v701_v15 = vpop.f32.mrb[2].mxu1 }
 0x140   : > { %v769_v16 = vadd.f32 %v751_v10, %v327_v8  ;;  %v755_v17 = vadd.f32 %v754_v2, %v701_v15  ;;  %v703_v19 = vpop.f32.mrb[3].mxu1 }
 0x141   : > { %v770_v20 = vadd.f32 %v753_v13, %v328_v11  ;;  %v757_v21 = vadd.f32 %v756_v3, %v703_v19 }
 0x142   : > { %777 = vst [vmem:[#allocation2] sm:$0xff] %v769_v16  ;;  %v771_v22 = vadd.f32 %v755_v17, %v329_v14 }
 0x143   : > { %778 = vst [vmem:[#allocation2 + $0x8] sm:$0xff] %v770_v20  ;;  %v772_v23 = vadd.f32 %v757_v21, %v330_v18 }
 0x144   : > { %779 = vst [vmem:[#allocation2 + $0x10] sm:$0xff] %v771_v22 }
 0x145   : > { %780 = vst [vmem:[#allocation2 + $0x18] sm:$0xff] %v772_v23  ;;  %v707_v25 = vpop.f32.mrb[4].mxu1 }
 0x146   : > { %v761_v26 = vadd.f32 %v760_v4, %v707_v25  ;;  %v709_v28 = vpop.f32.mrb[5].mxu1 }
 0x147   : > { %v763_v29 = vadd.f32 %v762_v5, %v709_v28  ;;  %v711_v31 = vpop.f32.mrb[6].mxu1  ;;  %788 = sbr.rel (%p1051_p11) target bundleno = 348 (0x15c), region = 66 }
 0x148   : > { %v773_v32 = vadd.f32 %v761_v26, %v331_v24  ;;  %v765_v33 = vadd.f32 %v764_v6, %v711_v31  ;;  %v713_v35 = vpop.f32.mrb[7].mxu1 }
 0x149   : > { %v774_v36 = vadd.f32 %v763_v29, %v332_v27  ;;  %v767_v37 = vadd.f32 %v766_v7, %v713_v35  ;;  %v789_v43 = vld [vmem:[#allocation2] sm:$0xff] (!%p1051_p11) }
 0x14a   : > { %781 = vst [vmem:[#allocation2 + $0x20] sm:$0xff] %v773_v32  ;;  %v775_v38 = vadd.f32 %v765_v33, %v333_v30  ;;  %v790_v44 = vld [vmem:[#allocation2 + $0x8] sm:$0xff] (!%p1051_p11)  ;;  %v809_v55 = vadd.f32 (!%p1051_p11), %v802_v50, %v789_v43 }
 0x14b   : > { %782 = vst [vmem:[#allocation2 + $0x28] sm:$0xff] %v774_v36  ;;  %v776_v39 = vadd.f32 %v767_v37, %v334_v34  ;;  %v791_v47 = vld [vmem:[#allocation2 + $0x10] sm:$0xff] (!%p1051_p11)  ;;  %v810_v56 = vadd.f32 (!%p1051_p11), %v806_v51, %v790_v44 }
 0x14c   : > { %783 = vst [vmem:[#allocation2 + $0x30] sm:$0xff] %v775_v38  ;;  %v792_v48 = vld [vmem:[#allocation2 + $0x18] sm:$0xff] (!%p1051_p11)  ;;  %v811_v57 = vadd.f32 (!%p1051_p11), %v802_v50, %v791_v47  ;;  %v817_v63 = vmax.f32 (!%p1051_p11), %v809_v55, 0.0 }
 0x14d   : > { %784 = vst [vmem:[#allocation2 + $0x38] sm:$0xff] %v776_v39  ;;  %v812_v58 = vadd.f32 (!%p1051_p11), %v806_v51, %v792_v48  ;;  %v818_v0 = vmax.f32 (!%p1051_p11), %v810_v56, 0.0 }
 0x14e   : > { %v819_v1 = vmax.f32 %v811_v57, 0.0 }
 0x14f   : > { %v820_v2 = vmax.f32 %v812_v58, 0.0  ;;  %v1062_v7 = vpack.c.bf16 %v818_v0, %v817_v63 }
 0x151   : > { %v793_v49 = vld [vmem:[#allocation2 + $0x20] sm:$0xff]  ;;  %v1063_v8 = vpack.c.bf16 %v820_v2, %v819_v1  ;;  %849 = vst [vmem:[%s1405_s3] sm:$0xff] %v1062_v7 }
 0x152   : > { %v794_v52 = vld [vmem:[#allocation2 + $0x28] sm:$0xff]  ;;  %v813_v59 = vadd.f32 %v802_v50, %v793_v49 }
 0x153   : > { %v795_v53 = vld [vmem:[#allocation2 + $0x30] sm:$0xff]  ;;  %v814_v60 = vadd.f32 %v806_v51, %v794_v52  ;;  %850 = vst [vmem:[%s1405_s3 + $0x8] sm:$0xff] %v1063_v8 }
 0x154   : > { %v796_v54 = vld [vmem:[#allocation2 + $0x38] sm:$0xff]  ;;  %v815_v61 = vadd.f32 %v802_v50, %v795_v53  ;;  %v821_v3 = vmax.f32 %v813_v59, 0.0 }
 0x155   : > { %v816_v62 = vadd.f32 %v806_v51, %v796_v54  ;;  %v822_v4 = vmax.f32 %v814_v60, 0.0 }
 0x156   : > { %v823_v5 = vmax.f32 %v815_v61, 0.0 }
 0x157   : > { %v824_v6 = vmax.f32 %v816_v62, 0.0  ;;  %v1064_v9 = vpack.c.bf16 %v822_v4, %v821_v3 }
 0x159   : > { %v1065_v10 = vpack.c.bf16 %v824_v6, %v823_v5  ;;  %851 = vst [vmem:[%s1405_s3 + $0x10] sm:$0xff] %v1064_v9 }
 0x15b   : > { %852 = vst [vmem:[%s1405_s3 + $0x18] sm:$0xff] %v1065_v10 }
 0x15c PF: > { %s13_s16 = sadd.s32 1, %s1236_s16   ;;  %s1406_s12 = smov %s1224_s13 }
 0x15d   : > { %p10_p12 = scmp.ge.s32.totalorder %s13_s16, 8   ;;  %s1407_s13 = smov %s1295_s20 }
 0x15e   : > { %s1408_s14 = smov %s1232_s15  ;;  %s1409_s15 = smov %s1411_s17 }
 0x15f   :  { %12 = sbr.rel (!%p10_p12) target bundleno = 3 (0x3), region = 113 }

// kernel: alexnet_forward.14
= control target key start
LH: loop header
LB: loop body
LE: loop exit
PB: predicated region body
PF: predicated region fallthrough
CT: control target
= control target key end

     0   :  { %s1260_s12 = smov 0   ;;  %s1262_s13 = smov 0   ;;  %s1402_s0 = inlined_call_operand.vmem [shape: bf16[32,3456], index: 0, kind: input, shape index: {}]   ;;  %s1403_s1 = inlined_call_operand.vmem [shape: bf16[3456,256], index: 1, kind: input, shape index: {}]   ;;  %s1404_s2 = inlined_call_operand.vmem [shape: f32[1,256], index: 2, kind: input, shape index: {}]   ;;  %s1405_s3 = inlined_call_operand.vmem [shape: bf16[32,256], index: 3, kind: output, shape index: {}]  }
   0x1   :  { %s1264_s14 = smov 0   ;;  %s1266_s15 = smov 0  }
   0x2   :  { %s1268_s16 = smov 0  }
   0x3 LB: > { %s25_s17 = sadd.s32 1, %s1232_s15  ;;  %p48_p1 = scmp.ne.s32.totalorder %s1224_s13, %s1220_s12  ;;  %s1236_s16 = sphi %s1268_s16, %s13_s16   ;;  %s1232_s15 = sphi %s1266_s15, %s1409_s15   ;;  %s1228_s14 = sphi %s1264_s14, %s1408_s14   ;;  %s1224_s13 = sphi %s1262_s13, %s1407_s13   ;;  %s1220_s12 = sphi %s1260_s12, %s1406_s12  }
   0x4   : > { %p26_p0 = scmp.ge.s32.totalorder %s25_s17, 9  ;;  %p49_p2 = scmp.eq.s32.totalorder %s1236_s16, 0 }
   0x5   : > { %s41_s19 = sadd.s32 1, %s1224_s13  ;;  %p983_p5 = scmp.ge.s32.totalorder %s1236_s16, 9 }
   0x6   : > { %s1411_s17 = smov (%p26_p0, %s25_s17), 0  ;;  %p50_p3 = por %p49_p2, %p48_p1 }
   0x7   : > { %s37_s18 = ssub.s32 %s1232_s15, %s1411_s17  ;;  %164 = sbr.rel (%p983_p5) target bundleno = 23 (0x17), region = 20 }
   0x8   : > { %p39_p4 = scmp.eq.s32.totalorder %s37_s18, 0 }
   0xa   : > { %s1295_s20 = scalar_select %p39_p4, %s1224_s13, %s41_s19  }
   0xe   : > { %167 = sbr.rel (!%p50_p3) target bundleno = 23 (0x17), region = 24  ;;  %s169_s21 = sand.u32 (%p50_p3), 1, %s1224_s13  }
   0xf   : > { %s1060_s22 = smul.u32 (%p50_p3), 12, %s1232_s15 }
  0x10   : > { %s1074_s23 = smul.u32 (%p50_p3), 48, %s169_s21 }
  0x11   : > { %s177_s26 = scalar_lea.vmem (%p50_p3), %s1402_s0, %s1060_s22 }
  0x12   : > { %v192_v0 = vld [vmem:[%s177_s26] sm:$0xff] (%p50_p3)  ;;  %v194_v1 = vld [vmem:[%s177_s26 + $0x6c] sm:$0xff] (%p50_p3)  ;;  %v196_v2 = vld [vmem:[%s177_s26 + $0xd8] sm:$0xff] (%p50_p3)  ;;  %s171_s27 = scalar_lea.vmem (%p50_p3), [#allocation3], %s1074_s23 }
  0x13   : > { %193 = vst [vmem:[%s171_s27] sm:$0xff] (%p50_p3), %v192_v0  ;;  %195 = vst [vmem:[%s171_s27 + $0xc] sm:$0xff] (%p50_p3), %v194_v1  ;;  %v198_v3 = vld [vmem:[%s177_s26 + $0x144] sm:$0xff] (%p50_p3)  ;;  %v987_v5 = vld [vmem:[%s177_s26 + $0x74] sm:$0xf] (%p50_p3) }
  0x14   : > { %197 = vst [vmem:[%s171_s27 + $0x18] sm:$0xff] (%p50_p3), %v196_v2  ;;  %v985_v4 = vld [vmem:[%s177_s26 + $0x8] sm:$0xf] (%p50_p3)  ;;  %199 = vst [vmem:[%s171_s27 + $0x24] sm:$0xff] (%p50_p3), %v198_v3  ;;  %v989_v6 = vld [vmem:[%s177_s26 + $0xe0] sm:$0xf] (%p50_p3) }
  0x15   : > { %986 = vst [vmem:[%s171_s27 + $0x8] sm:$0xf] %v985_v4  ;;  %988 = vst [vmem:[%s171_s27 + $0x14] sm:$0xf] %v987_v5  ;;  %v991_v7 = vld [vmem:[%s177_s26 + $0x14c] sm:$0xf] }
  0x16   : > { %990 = vst [vmem:[%s171_s27 + $0x20] sm:$0xf] %v989_v6  ;;  %992 = vst [vmem:[%s171_s27 + $0x2c] sm:$0xf] %v991_v7 }
  0x17 PF: > { %p993_p6 = scmp.ge.s32.totalorder %s1236_s16, 1  ;;  %p234_p7 = scmp.lt.s32.totalorder %s1236_s16, 10 }
  0x19   : > { %p235_p8 = pnand %p993_p6, %p234_p7 }
  0x1a   : > { %s241_s28 = sand.u32 (!%p235_p8), 1, %s1220_s12   ;;  %s285_s29 = smul.u32 (!%p235_p8), 48, %s1228_s14 }
  0x1b   : > { %238 = sbr.rel (%p235_p8) target bundleno = 348 (0x15c), region = 54  ;;  %p996_p10 = scmp.ne.s32.totalorder (!%p235_p8), %s1228_s14, 0 }
  0x1c   : > { %s1075_s30 = smul.u32 (!%p235_p8), 48, %s241_s28  ;;  %p287_p9 = scmp.lt.s32.totalorder (!%p235_p8), %s285_s29, 431 }
  0x1e   : > { %s1312_s8 = scalar_lea.vmem (!%p235_p8), [#allocation3], %s1075_s30 }
  0x22   : > { %s1413_s29 = smov (!%p287_p9, %s285_s29), 431  ;;  %318 = sbr.rel (%p996_p10) target bundleno = 41 (0x29), region = 62 }
  0x23   : > { %s1061_s4 = sshll.u32 %s1413_s29, 3  ;;  %v1238_v8 = vmov (!%p996_p10), 0.0  }
  0x24   : > { %s1310_s7 = scalar_lea.vmem %s1403_s1, %s1061_s4  ;;  %319 = vst [vmem:[#allocation2] sm:$0xff] (!%p996_p10), %v1238_v8  ;;  %320 = vst [vmem:[#allocation2 + $0x8] sm:$0xff] (!%p996_p10), %v1238_v8 }
  0x25   : > { %321 = vst [vmem:[#allocation2 + $0x10] sm:$0xff] (!%p996_p10), %v1238_v8  ;;  %322 = vst [vmem:[#allocation2 + $0x18] sm:$0xff] (!%p996_p10), %v1238_v8 }
  0x26   : > { %323 = vst [vmem:[#allocation2 + $0x20] sm:$0xff] (!%p996_p10), %v1238_v8  ;;  %324 = vst [vmem:[#allocation2 + $0x28] sm:$0xff] (!%p996_p10), %v1238_v8 }
  0x27   : > { %325 = vst [vmem:[#allocation2 + $0x30] sm:$0xff] (!%p996_p10), %v1238_v8  ;;  %326 = vst [vmem:[#allocation2 + $0x38] sm:$0xff] (!%p996_p10), %v1238_v8 }
  0x29 PF: > { %v1118_v9 = vld [vmem:[%s1310_s7 + $0x4] ss:$8 sps:$4 sm:$0xff]   ;;  %v1120_v10 = vld [vmem:[%s1310_s7] ss:$8 sps:$4 sm:$0xff]   ;;  %v1239_v11 = vmov 0   ;;  %p1051_p11 = scmp.ne.s32.totalorder %s1228_s14, 8 }
  0x2a   : > { %748 = vmatprep.mubr.bf16.mxu0 %v1239_v11  ;;  %663 = vmatprep.subr.bf16.mxu1 %v1118_v9  ;;  %v1121_v12 = vld [vmem:[%s1310_s7 + $0x14] ss:$8 sps:$4 sm:$0xff]   ;;  %v1123_v13 = vld [vmem:[%s1310_s7 + $0x10] ss:$8 sps:$4 sm:$0xff]   ;;  %v1124_v14 = vld [vmem:[%s1310_s7 + $0x24] ss:$8 sps:$4 sm:$0xff]  }
  0x2b   : > { %664 = vmatpush1.bf16.msra.mxu1 %v1120_v10  ;;  %v1126_v15 = vld [vmem:[%s1310_s7 + $0x20] ss:$8 sps:$4 sm:$0xff]   ;;  %v1127_v16 = vld [vmem:[%s1310_s7 + $0x34] ss:$8 sps:$4 sm:$0xff]   ;;  %v1129_v17 = vld [vmem:[%s1310_s7 + $0x30] ss:$8 sps:$4 sm:$0xff]  }
  0x2c   : > { %665 = vmatprep.subr.bf16.mxu1 %v1121_v12  ;;  %v1142_v18 = vld [vmem:[%s1310_s7 + $0x104] ss:$8 sps:$4 sm:$0xff]   ;;  %v1144_v19 = vld [vmem:[%s1310_s7 + $0x100] ss:$8 sps:$4 sm:$0xff]   ;;  %v1148_v21 = vld [vmem:[%s1310_s7 + $0x114] ss:$8 sps:$4 sm:$0xff]  }
  0x2d   : > { %v1130_v20 = vld [vmem:[%s1310_s7 + $0x44] ss:$8 sps:$4 sm:$0xff]   ;;  %716 = vmatprep.subr.bf16.mxu0 %v1142_v18  ;;  %v1150_v22 = vld [vmem:[%s1310_s7 + $0x110] ss:$8 sps:$4 sm:$0xff]   ;;  %v1132_v23 = vld [vmem:[%s1310_s7 + $0x40] ss:$8 sps:$4 sm:$0xff]  }
  0x2e   : > { %717 = vmatpush1.bf16.msra.mxu0 %v1144_v19  ;;  %v1133_v24 = vld [vmem:[%s1310_s7 + $0x54] ss:$8 sps:$4 sm:$0xff]   ;;  %v1154_v25 = vld [vmem:[%s1310_s7 + $0x124] ss:$8 sps:$4 sm:$0xff]   ;;  %v1156_v26 = vld [vmem:[%s1310_s7 + $0x120] ss:$8 sps:$4 sm:$0xff]  }
  0x2f   : > { %666 = vmatpush1.bf16.msra.mxu1 %v1123_v13  ;;  %718 = vmatprep.subr.bf16.mxu0 %v1148_v21  ;;  %v1135_v27 = vld [vmem:[%s1310_s7 + $0x50] ss:$8 sps:$4 sm:$0xff]   ;;  %v1160_v28 = vld [vmem:[%s1310_s7 + $0x134] ss:$8 sps:$4 sm:$0xff]   ;;  %v1136_v29 = vld [vmem:[%s1310_s7 + $0x64] ss:$8 sps:$4 sm:$0xff]  }
  0x30   : > { %667 = vmatprep.subr.bf16.mxu1 %v1124_v14  ;;  %v1162_v30 = vld [vmem:[%s1310_s7 + $0x130] ss:$8 sps:$4 sm:$0xff]   ;;  %v1138_v31 = vld [vmem:[%s1310_s7 + $0x60] ss:$8 sps:$4 sm:$0xff]   ;;  %v1166_v32 = vld [vmem:[%s1310_s7 + $0x144] ss:$8 sps:$4 sm:$0xff]  }
  0x31   : > { %v1139_v33 = vld [vmem:[%s1310_s7 + $0x74] ss:$8 sps:$4 sm:$0xff]   ;;  %v1168_v34 = vld [vmem:[%s1310_s7 + $0x140] ss:$8 sps:$4 sm:$0xff]   ;;  %v1141_v35 = vld [vmem:[%s1310_s7 + $0x70] ss:$8 sps:$4 sm:$0xff]  }
  0x32   : > { %719 = vmatpush1.bf16.msra.mxu0 %v1150_v22  ;;  %v1172_v36 = vld [vmem:[%s1310_s7 + $0x154] ss:$8 sps:$4 sm:$0xff]   ;;  %v1145_v37 = vld [vmem:[%s1310_s7 + $0x84] ss:$8 sps:$4 sm:$0xff]   ;;  %v1174_v38 = vld [vmem:[%s1310_s7 + $0x150] ss:$8 sps:$4 sm:$0xff]  }
  0x33   : > { %668 = vmatpush1.bf16.msra.mxu1 %v1126_v15  ;;  %720 = vmatprep.subr.bf16.mxu0 %v1154_v25  ;;  %v1147_v39 = vld [vmem:[%s1310_s7 + $0x80] ss:$8 sps:$4 sm:$0xff]   ;;  %v1178_v40 = vld [vmem:[%s1310_s7 + $0x164] ss:$8 sps:$4 sm:$0xff]   ;;  %v1151_v41 = vld [vmem:[%s1310_s7 + $0x94] ss:$8 sps:$4 sm:$0xff]  }
  0x34   : > { %669 = vmatprep.subr.bf16.mxu1 %v1127_v16  ;;  %v1153_v42 = vld [vmem:[%s1310_s7 + $0x90] ss:$8 sps:$4 sm:$0xff]   ;;  %v1180_v43 = vld [vmem:[%s1310_s7 + $0x160] ss:$8 sps:$4 sm:$0xff]   ;;  %v1184_v45 = vld [vmem:[%s1310_s7 + $0x174] ss:$8 sps:$4 sm:$0xff]  }
  0x35   : > { %v1193_v44 = vld [vmem:[%s1312_s8 + $0x4] ss:$12 sps:$4 sm:$0xff]   ;;  %v1190_v50 = vld [vmem:[%s1312_s8 + $0x8] ss:$12 sps:$4 sm:$0xff]   ;;  %v1194_v55 = vld [vmem:[%s1312_s8 + $0x20] ss:$12 sps:$4 sm:$0xff]  }
  0x36   : > { %721 = vmatpush1.bf16.msra.mxu0 %v1156_v26  ;;  %v1157_v46 = vld [vmem:[%s1310_s7 + $0xa4] ss:$8 sps:$4 sm:$0xff]   ;;  %695 = vmatprep.mubr.bf16.mxu1 %v1193_v44  ;;  %v1186_v47 = vld [vmem:[%s1310_s7 + $0x170] ss:$8 sps:$4 sm:$0xff]   ;;  %v1159_v48 = vld [vmem:[%s1310_s7 + $0xa0] ss:$8 sps:$4 sm:$0xff]  }
  0x37   : > { %670 = vmatpush1.bf16.msra.mxu1 %v1129_v17  ;;  %722 = vmatprep.subr.bf16.mxu0 %v1160_v28  ;;  %v1163_v49 = vld [vmem:[%s1310_s7 + $0xb4] ss:$8 sps:$4 sm:$0xff]   ;;  %v1165_v51 = vld [vmem:[%s1310_s7 + $0xb0] ss:$8 sps:$4 sm:$0xff]   ;;  %v1169_v52 = vld [vmem:[%s1310_s7 + $0xc4] ss:$8 sps:$4 sm:$0xff]  }
  0x38   : > { %671 = vmatprep.subr.bf16.mxu1 %v1130_v20  ;;  %v1171_v53 = vld [vmem:[%s1310_s7 + $0xc0] ss:$8 sps:$4 sm:$0xff]   ;;  %v1175_v54 = vld [vmem:[%s1310_s7 + $0xd4] ss:$8 sps:$4 sm:$0xff]   ;;  %v1177_v56 = vld [vmem:[%s1310_s7 + $0xd0] ss:$8 sps:$4 sm:$0xff]  }
  0x39   : > { %v1181_v57 = vld [vmem:[%s1310_s7 + $0xe4] ss:$8 sps:$4 sm:$0xff]   ;;  %v1183_v58 = vld [vmem:[%s1310_s7 + $0xe0] ss:$8 sps:$4 sm:$0xff]   ;;  %v1187_v59 = vld [vmem:[%s1310_s7 + $0xf4] ss:$8 sps:$4 sm:$0xff]  }
  0x3a   : > { %723 = vmatpush1.bf16.msra.mxu0 %v1162_v30  ;;  %v1189_v60 = vld [vmem:[%s1310_s7 + $0xf0] ss:$8 sps:$4 sm:$0xff]   ;;  %v327_v8 = vld [vmem:[#allocation2] sm:$0xff] }
  0x3b   : > { %672 = vmatpush1.bf16.msra.mxu1 %v1132_v23  ;;  %724 = vmatprep.subr.bf16.mxu0 %v1166_v32  ;;  %v1191_v61 = vld [vmem:[%s1312_s8] ss:$12 sps:$4 sm:$0xff]   ;;  %v1195_v62 = vld [vmem:[%s1312_s8 + $0x1c] ss:$12 sps:$4 sm:$0xff]   ;;  %v1197_v63 = vld [vmem:[%s1312_s8 + $0x18] ss:$12 sps:$4 sm:$0xff]  }
  0x3c   : > { %673 = vmatprep.subr.bf16.mxu1 %v1133_v24  ;;  %v329_v14 = vld [vmem:[#allocation2 + $0x10] sm:$0xff]  ;;  %v330_v18 = vld [vmem:[#allocation2 + $0x18] sm:$0xff]  ;;  %v331_v24 = vld [vmem:[#allocation2 + $0x20] sm:$0xff] }
  0x3d   : > { %v333_v30 = vld [vmem:[#allocation2 + $0x30] sm:$0xff] }
  0x3e   : > { %725 = vmatpush1.bf16.msra.mxu0 %v1168_v34  ;;  %v334_v34 = vld [vmem:[#allocation2 + $0x38] sm:$0xff] }
  0x3f   : > { %674 = vmatpush1.bf16.msra.mxu1 %v1135_v27  ;;  %726 = vmatprep.subr.bf16.mxu0 %v1172_v36  ;;  %v332_v27 = vld [vmem:[#allocation2 + $0x28] sm:$0xff] }
  0x40   : > { %675 = vmatprep.subr.bf16.mxu1 %v1136_v29 }
  0x42   : > { %727 = vmatpush1.bf16.msra.mxu0 %v1174_v38 }
  0x43   : > { %676 = vmatpush1.bf16.msra.mxu1 %v1138_v31  ;;  %728 = vmatprep.subr.bf16.mxu0 %v1178_v40  ;;  %v799_v40 = vlaneseq (!%p1051_p11) }
  0x44   : > { %677 = vmatprep.subr.bf16.mxu1 %v1139_v33 }
  0x46   : > { %729 = vmatpush1.bf16.msra.mxu0 %v1180_v43 }
  0x47   : > { %678 = vmatpush1.bf16.msra.mxu1 %v1141_v35  ;;  %730 = vmatprep.subr.bf16.mxu0 %v1184_v45 }
  0x48   : > { %679 = vmatprep.subr.bf16.mxu1 %v1145_v37 }
  0x4a   : > { %731 = vmatpush1.bf16.msra.mxu0 %v1186_v47 }
  0x4b   : > { %680 = vmatpush1.bf16.msra.mxu1 %v1147_v39 }
  0x4c   : > { %681 = vmatprep.subr.bf16.mxu1 %v1151_v41  ;;  %v800_v41 = vshrl.u32 (!%p1051_p11), %v799_v40, 7 }
  0x4d   : > { %749 = vmatmul.mubr.bf16.vlgmr.msra.gmra.mrb[0].mxu0 %v1190_v50 }
  0x4e   : > { %758 = vmatprep.mubr.bf16.mxu0 %v1239_v11  ;;  %v328_v11 = vld [vmem:[#allocation2 + $0x8] sm:$0xff]  ;;  %v801_v45 = vsub.s32 (!%p1051_p11), 0, %v800_v41 }
  0x4f   : > { %682 = vmatpush1.bf16.msra.mxu1 %v1153_v42  ;;  %v797_v42 = vld [vmem:[%s1404_s2] sm:$0x3] (!%p1051_p11) }
  0x50   : > { %683 = vmatprep.subr.bf16.mxu1 %v1157_v46  ;;  %v805_v46 = vsub.s32 (!%p1051_p11), 1, %v800_v41  ;;  %v802_v50 = vrot.slane (!%p1051_p11), %v797_v42, %v801_v45 }
  0x53   : > { %684 = vmatpush1.bf16.msra.mxu1 %v1159_v48 }
  0x54   : > { %685 = vmatprep.subr.bf16.mxu1 %v1163_v49 }
  0x55   : > { %759 = vmatmul.mubr.bf16.gmra.mrb[4].mxu0 %v1194_v55 }
  0x57   : > { %686 = vmatpush1.bf16.msra.mxu1 %v1165_v51  ;;  %v806_v51 = vrot.slane (!%p1051_p11), %v797_v42, %v805_v46 }
  0x58   : > { %687 = vmatprep.subr.bf16.mxu1 %v1169_v52 }
  0x5b   : > { %688 = vmatpush1.bf16.msra.mxu1 %v1171_v53 }
  0x5c   : > { %689 = vmatprep.subr.bf16.mxu1 %v1175_v54 }
  0x5f   : > { %690 = vmatpush1.bf16.msra.mxu1 %v1177_v56 }
  0x60   : > { %691 = vmatprep.subr.bf16.mxu1 %v1181_v57 }
  0x63   : > { %692 = vmatpush1.bf16.msra.mxu1 %v1183_v58 }
  0x64   : > { %693 = vmatprep.subr.bf16.mxu1 %v1187_v59 }
  0x67   : > { %694 = vmatpush1.bf16.msra.mxu1 %v1189_v60 }
  0x6a   : > { %696 = vmatmul.mubr.bf16.vlgmr.msra.gmra.mrb[0].mxu1 %v1191_v61 }
  0x6b   : > { %705 = vmatprep.mubr.bf16.mxu1 %v1195_v62 }
  0x72   : > { %706 = vmatmul.mubr.bf16.gmra.mrb[4].mxu1 %v1197_v63 }
 0x120   : > { %v750_v0 = vpop.f32.mrb[0].mxu0 }
 0x121   : > { %v752_v1 = vpop.f32.mrb[1].mxu0 }
 0x122   : > { %v754_v2 = vpop.f32.mrb[2].mxu0 }
 0x123   : > { %v756_v3 = vpop.f32.mrb[3].mxu0 }
 0x128   : > { %v760_v4 = vpop.f32.mrb[4].mxu0 }
 0x129   : > { %v762_v5 = vpop.f32.mrb[5].mxu0 }
 0x12a   : > { %v764_v6 = vpop.f32.mrb[6].mxu0 }
 0x12b   : > { %v766_v7 = vpop.f32.mrb[7].mxu0 }
 0x13d   : > { %v697_v9 = vpop.f32.mrb[0].mxu1 }
 0x13e   : > { %v751_v10 = vadd.f32 %v750_v0, %v697_v9  ;;  %v699_v12 = vpop.f32.mrb[1].mxu1 }
 0x13f   : > { %v753_v13 = vadd.f32 %v752_v1, %v699_v12  ;;  %v701_v15 = vpop.f32.mrb[2].mxu1 }
 0x140   : > { %v769_v16 = vadd.f32 %v751_v10, %v327_v8  ;;  %v755_v17 = vadd.f32 %v754_v2, %v701_v15  ;;  %v703_v19 = vpop.f32.mrb[3].mxu1 }
 0x141   : > { %v770_v20 = vadd.f32 %v753_v13, %v328_v11  ;;  %v757_v21 = vadd.f32 %v756_v3, %v703_v19 }
 0x142   : > { %777 = vst [vmem:[#allocation2] sm:$0xff] %v769_v16  ;;  %v771_v22 = vadd.f32 %v755_v17, %v329_v14 }
 0x143   : > { %778 = vst [vmem:[#allocation2 + $0x8] sm:$0xff] %v770_v20  ;;  %v772_v23 = vadd.f32 %v757_v21, %v330_v18 }
 0x144   : > { %779 = vst [vmem:[#allocation2 + $0x10] sm:$0xff] %v771_v22 }
 0x145   : > { %780 = vst [vmem:[#allocation2 + $0x18] sm:$0xff] %v772_v23  ;;  %v707_v25 = vpop.f32.mrb[4].mxu1 }
 0x146   : > { %v761_v26 = vadd.f32 %v760_v4, %v707_v25  ;;  %v709_v28 = vpop.f32.mrb[5].mxu1 }
 0x147   : > { %v763_v29 = vadd.f32 %v762_v5, %v709_v28  ;;  %v711_v31 = vpop.f32.mrb[6].mxu1  ;;  %788 = sbr.rel (%p1051_p11) target bundleno = 348 (0x15c), region = 66 }
 0x148   : > { %v773_v32 = vadd.f32 %v761_v26, %v331_v24  ;;  %v765_v33 = vadd.f32 %v764_v6, %v711_v31  ;;  %v713_v35 = vpop.f32.mrb[7].mxu1 }
 0x149   : > { %v774_v36 = vadd.f32 %v763_v29, %v332_v27  ;;  %v767_v37 = vadd.f32 %v766_v7, %v713_v35  ;;  %v789_v43 = vld [vmem:[#allocation2] sm:$0xff] (!%p1051_p11) }
 0x14a   : > { %781 = vst [vmem:[#allocation2 + $0x20] sm:$0xff] %v773_v32  ;;  %v775_v38 = vadd.f32 %v765_v33, %v333_v30  ;;  %v790_v44 = vld [vmem:[#allocation2 + $0x8] sm:$0xff] (!%p1051_p11)  ;;  %v809_v55 = vadd.f32 (!%p1051_p11), %v802_v50, %v789_v43 }
 0x14b   : > { %782 = vst [vmem:[#allocation2 + $0x28] sm:$0xff] %v774_v36  ;;  %v776_v39 = vadd.f32 %v767_v37, %v334_v34  ;;  %v791_v47 = vld [vmem:[#allocation2 + $0x10] sm:$0xff] (!%p1051_p11)  ;;  %v810_v56 = vadd.f32 (!%p1051_p11), %v806_v51, %v790_v44 }
 0x14c   : > { %783 = vst [vmem:[#allocation2 + $0x30] sm:$0xff] %v775_v38  ;;  %v792_v48 = vld [vmem:[#allocation2 + $0x18] sm:$0xff] (!%p1051_p11)  ;;  %v811_v57 = vadd.f32 (!%p1051_p11), %v802_v50, %v791_v47  ;;  %v817_v63 = vmax.f32 (!%p1051_p11), %v809_v55, 0.0 }
 0x14d   : > { %784 = vst [vmem:[#allocation2 + $0x38] sm:$0xff] %v776_v39  ;;  %v812_v58 = vadd.f32 (!%p1051_p11), %v806_v51, %v792_v48  ;;  %v818_v0 = vmax.f32 (!%p1051_p11), %v810_v56, 0.0 }
 0x14e   : > { %v819_v1 = vmax.f32 %v811_v57, 0.0 }
 0x14f   : > { %v820_v2 = vmax.f32 %v812_v58, 0.0  ;;  %v1062_v7 = vpack.c.bf16 %v818_v0, %v817_v63 }
 0x151   : > { %v793_v49 = vld [vmem:[#allocation2 + $0x20] sm:$0xff]  ;;  %v1063_v8 = vpack.c.bf16 %v820_v2, %v819_v1  ;;  %849 = vst [vmem:[%s1405_s3] sm:$0xff] %v1062_v7 }
 0x152   : > { %v794_v52 = vld [vmem:[#allocation2 + $0x28] sm:$0xff]  ;;  %v813_v59 = vadd.f32 %v802_v50, %v793_v49 }
 0x153   : > { %v795_v53 = vld [vmem:[#allocation2 + $0x30] sm:$0xff]  ;;  %v814_v60 = vadd.f32 %v806_v51, %v794_v52  ;;  %850 = vst [vmem:[%s1405_s3 + $0x8] sm:$0xff] %v1063_v8 }
 0x154   : > { %v796_v54 = vld [vmem:[#allocation2 + $0x38] sm:$0xff]  ;;  %v815_v61 = vadd.f32 %v802_v50, %v795_v53  ;;  %v821_v3 = vmax.f32 %v813_v59, 0.0 }
 0x155   : > { %v816_v62 = vadd.f32 %v806_v51, %v796_v54  ;;  %v822_v4 = vmax.f32 %v814_v60, 0.0 }
 0x156   : > { %v823_v5 = vmax.f32 %v815_v61, 0.0 }
 0x157   : > { %v824_v6 = vmax.f32 %v816_v62, 0.0  ;;  %v1064_v9 = vpack.c.bf16 %v822_v4, %v821_v3 }
 0x159   : > { %v1065_v10 = vpack.c.bf16 %v824_v6, %v823_v5  ;;  %851 = vst [vmem:[%s1405_s3 + $0x10] sm:$0xff] %v1064_v9 }
 0x15b   : > { %852 = vst [vmem:[%s1405_s3 + $0x18] sm:$0xff] %v1065_v10 }
 0x15c PF: > { %s13_s16 = sadd.s32 1, %s1236_s16   ;;  %s1406_s12 = smov %s1224_s13 }
 0x15d   : > { %p10_p12 = scmp.ge.s32.totalorder %s13_s16, 11   ;;  %s1407_s13 = smov %s1295_s20 }
 0x15e   : > { %s1408_s14 = smov %s1232_s15  ;;  %s1409_s15 = smov %s1411_s17 }
 0x15f   :  { %12 = sbr.rel (!%p10_p12) target bundleno = 3 (0x3), region = 113 }

// kernel: alexnet_forward.16
= control target key start
LH: loop header
LB: loop body
LE: loop exit
PB: predicated region body
PF: predicated region fallthrough
CT: control target
= control target key end

     0   :  { %s95_s0 = inlined_call_operand.vmem [shape: bf16[4,2,2,512], index: 0, kind: input, shape index: {}]   ;;  %s96_s1 = inlined_call_operand.vmem [shape: bf16[4,2,256], index: 1, kind: output, shape index: {}]  }
   0x1   :  { %v8_v0 = vld [vmem:[%s95_s0] sm:$0xf]  ;;  %v45_v1 = vld [vmem:[%s95_s0 + $0x4] sm:$0xf]  ;;  %v9_v2 = vld [vmem:[%s95_s0 + $0x8] sm:$0xf] }
   0x2   :  { %v17_v3 = vmax.bf16 %v45_v1, %v8_v0  ;;  %v46_v4 = vld [vmem:[%s95_s0 + $0xc] sm:$0xf]  ;;  %v10_v5 = vld [vmem:[%s95_s0 + $0x10] sm:$0xf]  ;;  %v47_v6 = vld [vmem:[%s95_s0 + $0x14] sm:$0xf] }
   0x3   :  { %v18_v7 = vmax.bf16 %v46_v4, %v9_v2  ;;  %v19_v8 = vmax.bf16 %v47_v6, %v10_v5  ;;  %v11_v9 = vld [vmem:[%s95_s0 + $0x18] sm:$0xf]  ;;  %v48_v10 = vld [vmem:[%s95_s0 + $0x1c] sm:$0xf] }
   0x4   :  { %v25_v11 = vrot.slane %v17_v3, 2  ;;  %v20_v12 = vmax.bf16 %v48_v10, %v11_v9 }
   0x5   :  { %v26_v13 = vrot.slane %v18_v7, 2  ;;  %v27_v14 = vrot.slane %v19_v8, 2 }
   0x6   :  { %v33_v15 = vmax.bf16 %v25_v11, %v17_v3  ;;  %v28_v16 = vrot.slane %v20_v12, 2 }
   0x7   :  { %v34_v17 = vmax.bf16 %v26_v13, %v18_v7  ;;  %v35_v18 = vmax.bf16 %v27_v14, %v19_v8 }
   0x8   :  { %37 = vst [vmem:[%s96_s1] sm:$0x3] %v33_v15  ;;  %v36_v19 = vmax.bf16 %v28_v16, %v20_v12 }
   0x9   :  { %38 = vst [vmem:[%s96_s1 + $0x2] sm:$0x3] %v34_v17  ;;  %39 = vst [vmem:[%s96_s1 + $0x4] sm:$0x3] %v35_v18 }
   0xa   :  { %40 = vst [vmem:[%s96_s1 + $0x6] sm:$0x3] %v36_v19 }

// kernel: alexnet_forward.17
= control target key start
LH: loop header
LB: loop body
LE: loop exit
PB: predicated region body
PF: predicated region fallthrough
CT: control target
= control target key end

     0   :  { %s2529_s1 = inlined_call_operand.vmem [shape: bf16[1024,256], index: 1, kind: input, shape index: {}]   ;;  %s2530_s0 = inlined_call_operand.vmem [shape: bf16[8,1024], index: 0, kind: input, shape index: {}]   ;;  %s2531_s3 = inlined_call_operand.vmem [shape: bf16[256,256], index: 3, kind: input, shape index: {}]   ;;  %s2532_s5 = inlined_call_operand.vmem [shape: bf16[256,128], index: 5, kind: input, shape index: {}]   ;;  %s2533_s2 = inlined_call_operand.vmem [shape: f32[1,256], index: 2, kind: input, shape index: {}]   ;;  %s2534_s4 = inlined_call_operand.vmem [shape: f32[1,256], index: 4, kind: input, shape index: {}]   ;;  %s2535_s6 = inlined_call_operand.vmem [shape: f32[1,128], index: 6, kind: input, shape index: {}]   ;;  %s2536_s7 = inlined_call_operand.vmem [shape: f32[8,128], index: 7, kind: output, shape index: {}]  }
   0x1   :  { %v1655_v0 = vld [vmem:[%s2529_s1 + $0x104] ss:$8 sps:$4 sm:$0xff]   ;;  %v1657_v1 = vld [vmem:[%s2529_s1 + $0x100] ss:$8 sps:$4 sm:$0xff]   ;;  %v1658_v2 = vld [vmem:[%s2529_s1 + $0x114] ss:$8 sps:$4 sm:$0xff]  }
   0x2   :  { %880 = vmatprep.subr.bf16.mxu0 %v1655_v0  ;;  %v1660_v3 = vld [vmem:[%s2529_s1 + $0x110] ss:$8 sps:$4 sm:$0xff]   ;;  %v1661_v4 = vld [vmem:[%s2529_s1 + $0x124] ss:$8 sps:$4 sm:$0xff]   ;;  %v1663_v5 = vld [vmem:[%s2529_s1 + $0x120] ss:$8 sps:$4 sm:$0xff]  }
   0x3   :  { %881 = vmatpush1.bf16.msra.mxu0 %v1657_v1  ;;  %v1664_v6 = vld [vmem:[%s2529_s1 + $0x134] ss:$8 sps:$4 sm:$0xff]   ;;  %v1666_v7 = vld [vmem:[%s2529_s1 + $0x130] ss:$8 sps:$4 sm:$0xff]   ;;  %v1667_v8 = vld [vmem:[%s2529_s1 + $0x144] ss:$8 sps:$4 sm:$0xff]  }
   0x4   :  { %882 = vmatprep.subr.bf16.mxu0 %v1658_v2  ;;  %v1669_v9 = vld [vmem:[%s2529_s1 + $0x140] ss:$8 sps:$4 sm:$0xff]   ;;  %v1670_v10 = vld [vmem:[%s2529_s1 + $0x154] ss:$8 sps:$4 sm:$0xff]   ;;  %v1672_v11 = vld [vmem:[%s2529_s1 + $0x150] ss:$8 sps:$4 sm:$0xff]  }
   0x5   :  { %v1673_v12 = vld [vmem:[%s2529_s1 + $0x164] ss:$8 sps:$4 sm:$0xff]   ;;  %v1675_v15 = vld [vmem:[%s2529_s1 + $0x160] ss:$8 sps:$4 sm:$0xff]   ;;  %v1676_v16 = vld [vmem:[%s2529_s1 + $0x174] ss:$8 sps:$4 sm:$0xff]  }
   0x6   :  { %v2001_v13 = vld [vmem:[%s2530_s0 + $0x8] sm:$0xff]  ;;  %v1678_v17 = vld [vmem:[%s2529_s1 + $0x170] ss:$8 sps:$4 sm:$0xff]   ;;  %v1682_v20 = vld [vmem:[%s2529_s1 + $0x194] ss:$8 sps:$4 sm:$0xff]  }
   0x7   :  { %883 = vmatpush1.bf16.msra.mxu0 %v1660_v3  ;;  %v1439_v14 = vcombine.high %v2001_v13, %v2001_v13  ;;  %v1679_v18 = vld [vmem:[%s2529_s1 + $0x184] ss:$8 sps:$4 sm:$0xff]   ;;  %v1681_v19 = vld [vmem:[%s2529_s1 + $0x180] ss:$8 sps:$4 sm:$0xff]   ;;  %v1684_v21 = vld [vmem:[%s2529_s1 + $0x190] ss:$8 sps:$4 sm:$0xff]   ;;  %v1438_v48 = vcombine.low %v2001_v13, %v2001_v13 }
   0x8   :  { %884 = vmatprep.subr.bf16.mxu0 %v1661_v4  ;;  %v1685_v22 = vld [vmem:[%s2529_s1 + $0x1a4] ss:$8 sps:$4 sm:$0xff]   ;;  %v1687_v23 = vld [vmem:[%s2529_s1 + $0x1a0] ss:$8 sps:$4 sm:$0xff]   ;;  %v1688_v24 = vld [vmem:[%s2529_s1 + $0x1b4] ss:$8 sps:$4 sm:$0xff]  }
   0x9   :  { %912 = vmatprep.mubr.bf16.mxu0 %v1439_v14  ;;  %v1750_v25 = vld [vmem:[%s2529_s1 + $0x4] ss:$8 sps:$4 sm:$0xff]   ;;  %v1752_v26 = vld [vmem:[%s2529_s1] ss:$8 sps:$4 sm:$0xff]   ;;  %v1690_v27 = vld [vmem:[%s2529_s1 + $0x1b0] ss:$8 sps:$4 sm:$0xff]  }
   0xa   :  { %v1691_v28 = vld [vmem:[%s2529_s1 + $0x1c4] ss:$8 sps:$4 sm:$0xff]   ;;  %839 = vmatprep.subr.bf16.mxu1 %v1750_v25  ;;  %v1756_v29 = vld [vmem:[%s2529_s1 + $0x14] ss:$8 sps:$4 sm:$0xff]   ;;  %v1758_v30 = vld [vmem:[%s2529_s1 + $0x10] ss:$8 sps:$4 sm:$0xff]  }
   0xb   :  { %885 = vmatpush1.bf16.msra.mxu0 %v1663_v5  ;;  %840 = vmatpush1.bf16.msra.mxu1 %v1752_v26  ;;  %v1693_v31 = vld [vmem:[%s2529_s1 + $0x1c0] ss:$8 sps:$4 sm:$0xff]   ;;  %v1694_v32 = vld [vmem:[%s2529_s1 + $0x1d4] ss:$8 sps:$4 sm:$0xff]   ;;  %v1764_v33 = vld [vmem:[%s2529_s1 + $0x24] ss:$8 sps:$4 sm:$0xff]  }
   0xc   :  { %886 = vmatprep.subr.bf16.mxu0 %v1664_v6  ;;  %841 = vmatprep.subr.bf16.mxu1 %v1756_v29  ;;  %v1766_v34 = vld [vmem:[%s2529_s1 + $0x20] ss:$8 sps:$4 sm:$0xff]   ;;  %v1770_v35 = vld [vmem:[%s2529_s1 + $0x34] ss:$8 sps:$4 sm:$0xff]   ;;  %v1696_v36 = vld [vmem:[%s2529_s1 + $0x1d0] ss:$8 sps:$4 sm:$0xff]  }
   0xd   :  { %v1697_v37 = vld [vmem:[%s2529_s1 + $0x1e4] ss:$8 sps:$4 sm:$0xff]   ;;  %v1772_v38 = vld [vmem:[%s2529_s1 + $0x30] ss:$8 sps:$4 sm:$0xff]   ;;  %v1699_v40 = vld [vmem:[%s2529_s1 + $0x1e0] ss:$8 sps:$4 sm:$0xff]  }
   0xe   :  { %v1776_v39 = vld [vmem:[%s2529_s1 + $0x44] ss:$8 sps:$4 sm:$0xff]   ;;  %v1700_v41 = vld [vmem:[%s2529_s1 + $0x1f4] ss:$8 sps:$4 sm:$0xff]   ;;  %v1778_v42 = vld [vmem:[%s2529_s1 + $0x40] ss:$8 sps:$4 sm:$0xff]  }
   0xf   :  { %887 = vmatpush1.bf16.msra.mxu0 %v1666_v7  ;;  %842 = vmatpush1.bf16.msra.mxu1 %v1758_v30  ;;  %v1782_v43 = vld [vmem:[%s2529_s1 + $0x54] ss:$8 sps:$4 sm:$0xff]   ;;  %v1702_v44 = vld [vmem:[%s2529_s1 + $0x1f0] ss:$8 sps:$4 sm:$0xff]   ;;  %v1707_v45 = vld [vmem:[%s2529_s1 + $0x204] ss:$8 sps:$4 sm:$0xff]  }
  0x10   :  { %888 = vmatprep.subr.bf16.mxu0 %v1667_v8  ;;  %843 = vmatprep.subr.bf16.mxu1 %v1764_v33  ;;  %v2101_v46 = vld [vmem:[%s2530_s0 + $0x10] sm:$0xff]  ;;  %v1788_v49 = vld [vmem:[%s2529_s1 + $0x64] ss:$8 sps:$4 sm:$0xff]   ;;  %v1705_v50 = vld [vmem:[%s2529_s1 + $0x200] ss:$8 sps:$4 sm:$0xff]  }
  0x11   :  { %v1784_v47 = vld [vmem:[%s2529_s1 + $0x50] ss:$8 sps:$4 sm:$0xff]   ;;  %v1441_v51 = vcombine.high %v2101_v46, %v2101_v46  ;;  %v1710_v52 = vld [vmem:[%s2529_s1 + $0x214] ss:$8 sps:$4 sm:$0xff]   ;;  %v1790_v53 = vld [vmem:[%s2529_s1 + $0x60] ss:$8 sps:$4 sm:$0xff]  }
  0x12   :  { %v1794_v54 = vld [vmem:[%s2529_s1 + $0x74] ss:$8 sps:$4 sm:$0xff]   ;;  %v1708_v55 = vld [vmem:[%s2529_s1 + $0x210] ss:$8 sps:$4 sm:$0xff]   ;;  %v1713_v56 = vld [vmem:[%s2529_s1 + $0x224] ss:$8 sps:$4 sm:$0xff]  }
  0x13   :  { %889 = vmatpush1.bf16.msra.mxu0 %v1669_v9  ;;  %844 = vmatpush1.bf16.msra.mxu1 %v1766_v34  ;;  %v1796_v57 = vld [vmem:[%s2529_s1 + $0x70] ss:$8 sps:$4 sm:$0xff]   ;;  %v1800_v58 = vld [vmem:[%s2529_s1 + $0x84] ss:$8 sps:$4 sm:$0xff]   ;;  %v1711_v59 = vld [vmem:[%s2529_s1 + $0x220] ss:$8 sps:$4 sm:$0xff]  }
  0x14   :  { %890 = vmatprep.subr.bf16.mxu0 %v1670_v10  ;;  %845 = vmatprep.subr.bf16.mxu1 %v1770_v35  ;;  %v1716_v60 = vld [vmem:[%s2529_s1 + $0x234] ss:$8 sps:$4 sm:$0xff]   ;;  %v1802_v61 = vld [vmem:[%s2529_s1 + $0x80] ss:$8 sps:$4 sm:$0xff]   ;;  %v1714_v63 = vld [vmem:[%s2529_s1 + $0x230] ss:$8 sps:$4 sm:$0xff]  }
  0x15   :  { %v1806_v62 = vld [vmem:[%s2529_s1 + $0x94] ss:$8 sps:$4 sm:$0xff]   ;;  %v1719_v0 = vld [vmem:[%s2529_s1 + $0x244] ss:$8 sps:$4 sm:$0xff]   ;;  %v1808_v1 = vld [vmem:[%s2529_s1 + $0x90] ss:$8 sps:$4 sm:$0xff]  }
  0x16   :  { %v1812_v2 = vld [vmem:[%s2529_s1 + $0xa4] ss:$8 sps:$4 sm:$0xff]   ;;  %v1717_v3 = vld [vmem:[%s2529_s1 + $0x240] ss:$8 sps:$4 sm:$0xff]   ;;  %v1722_v4 = vld [vmem:[%s2529_s1 + $0x254] ss:$8 sps:$4 sm:$0xff]  }
  0x17   :  { %891 = vmatpush1.bf16.msra.mxu0 %v1672_v11  ;;  %846 = vmatpush1.bf16.msra.mxu1 %v1772_v38  ;;  %v1814_v5 = vld [vmem:[%s2529_s1 + $0xa0] ss:$8 sps:$4 sm:$0xff]   ;;  %v1818_v6 = vld [vmem:[%s2529_s1 + $0xb4] ss:$8 sps:$4 sm:$0xff]   ;;  %v1720_v7 = vld [vmem:[%s2529_s1 + $0x250] ss:$8 sps:$4 sm:$0xff]  }
  0x18   :  { %892 = vmatprep.subr.bf16.mxu0 %v1673_v12  ;;  %847 = vmatprep.subr.bf16.mxu1 %v1776_v39  ;;  %v1725_v8 = vld [vmem:[%s2529_s1 + $0x264] ss:$8 sps:$4 sm:$0xff]   ;;  %v1820_v10 = vld [vmem:[%s2529_s1 + $0xb0] ss:$8 sps:$4 sm:$0xff]   ;;  %v1723_v13 = vld [vmem:[%s2529_s1 + $0x260] ss:$8 sps:$4 sm:$0xff]  }
  0x19   :  { %v27_v9 = vld [vmem:[%s2530_s0] sm:$0xff]  ;;  %v1728_v14 = vld [vmem:[%s2529_s1 + $0x274] ss:$8 sps:$4 sm:$0xff]   ;;  %v1732_v25 = vld [vmem:[%s2529_s1 + $0x290] ss:$8 sps:$4 sm:$0xff]  }
  0x1a   :  { %v1437_v11 = vcombine.high %v27_v9, %v27_v9  ;;  %v1824_v12 = vld [vmem:[%s2529_s1 + $0xc4] ss:$8 sps:$4 sm:$0xff]   ;;  %v1735_v29 = vld [vmem:[%s2529_s1 + $0x2a0] ss:$8 sps:$4 sm:$0xff]   ;;  %v1740_v30 = vld [vmem:[%s2529_s1 + $0x2b4] ss:$8 sps:$4 sm:$0xff]  }
  0x1b   :  { %893 = vmatpush1.bf16.msra.mxu0 %v1675_v15  ;;  %848 = vmatpush1.bf16.msra.mxu1 %v1778_v42  ;;  %v1826_v15 = vld [vmem:[%s2529_s1 + $0xc0] ss:$8 sps:$4 sm:$0xff]   ;;  %v1737_v26 = vld [vmem:[%s2529_s1 + $0x2a4] ss:$8 sps:$4 sm:$0xff]   ;;  %v1860_v33 = vld [vmem:[%s2531_s3 + $0x14] ss:$8 sps:$4 sm:$0xff]  }
  0x1c   :  { %894 = vmatprep.subr.bf16.mxu0 %v1676_v16  ;;  %849 = vmatprep.subr.bf16.mxu1 %v1782_v43  ;;  %v1830_v16 = vld [vmem:[%s2529_s1 + $0xd4] ss:$8 sps:$4 sm:$0xff]   ;;  %v1738_v34 = vld [vmem:[%s2529_s1 + $0x2b0] ss:$8 sps:$4 sm:$0xff]   ;;  %v1743_v35 = vld [vmem:[%s2529_s1 + $0x2c4] ss:$8 sps:$4 sm:$0xff]  }
  0x1d   :  { %871 = vmatprep.mubr.bf16.mxu1 %v1437_v11  ;;  %v1741_v38 = vld [vmem:[%s2529_s1 + $0x2c0] ss:$8 sps:$4 sm:$0xff]   ;;  %v1746_v39 = vld [vmem:[%s2529_s1 + $0x2d4] ss:$8 sps:$4 sm:$0xff]   ;;  %v1744_v42 = vld [vmem:[%s2529_s1 + $0x2d0] ss:$8 sps:$4 sm:$0xff]  }
  0x1e   :  { %v1749_v43 = vld [vmem:[%s2529_s1 + $0x2e4] ss:$8 sps:$4 sm:$0xff]   ;;  %v1885_v11 = vld [vmem:[%s2531_s3 + $0xa0] ss:$8 sps:$4 sm:$0xff]  }
  0x1f   :  { %895 = vmatpush1.bf16.msra.mxu0 %v1678_v17  ;;  %850 = vmatpush1.bf16.msra.mxu1 %v1784_v47  ;;  %v1726_v17 = vld [vmem:[%s2529_s1 + $0x270] ss:$8 sps:$4 sm:$0xff]   ;;  %v1747_v47 = vld [vmem:[%s2529_s1 + $0x2e0] ss:$8 sps:$4 sm:$0xff]  }
  0x20   :  { %896 = vmatprep.subr.bf16.mxu0 %v1679_v18  ;;  %851 = vmatprep.subr.bf16.mxu1 %v1788_v49  ;;  %v1731_v18 = vld [vmem:[%s2529_s1 + $0x284] ss:$8 sps:$4 sm:$0xff]   ;;  %v1867_v49 = vld [vmem:[%s2531_s3 + $0x40] ss:$8 sps:$4 sm:$0xff]  }
  0x23   :  { %897 = vmatpush1.bf16.msra.mxu0 %v1681_v19  ;;  %852 = vmatpush1.bf16.msra.mxu1 %v1790_v53  ;;  %v1832_v19 = vld [vmem:[%s2529_s1 + $0xd0] ss:$8 sps:$4 sm:$0xff]  }
  0x24   :  { %898 = vmatprep.subr.bf16.mxu0 %v1682_v20  ;;  %853 = vmatprep.subr.bf16.mxu1 %v1794_v54  ;;  %v1836_v20 = vld [vmem:[%s2529_s1 + $0xe4] ss:$8 sps:$4 sm:$0xff]   ;;  %v2305_v53 = vld [vmem:[%s2530_s0 + $0x18] sm:$0xff] }
  0x25   :  { %v1870_v54 = vld [vmem:[%s2531_s3 + $0x50] ss:$8 sps:$4 sm:$0xff]  }
  0x27   :  { %899 = vmatpush1.bf16.msra.mxu0 %v1684_v21  ;;  %854 = vmatpush1.bf16.msra.mxu1 %v1796_v57  ;;  %v1729_v21 = vld [vmem:[%s2529_s1 + $0x280] ss:$8 sps:$4 sm:$0xff]  }
  0x28   :  { %900 = vmatprep.subr.bf16.mxu0 %v1685_v22  ;;  %855 = vmatprep.subr.bf16.mxu1 %v1800_v58  ;;  %v1734_v22 = vld [vmem:[%s2529_s1 + $0x294] ss:$8 sps:$4 sm:$0xff]   ;;  %v1761_v57 = vld [vmem:[%s2529_s1 + $0x300] ss:$8 sps:$4 sm:$0xff]   ;;  %v1443_v58 = vcombine.high %v2305_v53, %v2305_v53 }
  0x2b   :  { %901 = vmatpush1.bf16.msra.mxu0 %v1687_v23  ;;  %856 = vmatpush1.bf16.msra.mxu1 %v1802_v61  ;;  %v1838_v23 = vld [vmem:[%s2529_s1 + $0xe0] ss:$8 sps:$4 sm:$0xff]   ;;  %v1767_v61 = vld [vmem:[%s2529_s1 + $0x310] ss:$8 sps:$4 sm:$0xff]  }
  0x2c   :  { %902 = vmatprep.subr.bf16.mxu0 %v1688_v24  ;;  %857 = vmatprep.subr.bf16.mxu1 %v1806_v62  ;;  %v1842_v24 = vld [vmem:[%s2529_s1 + $0xf4] ss:$8 sps:$4 sm:$0xff]   ;;  %v1775_v62 = vld [vmem:[%s2529_s1 + $0x324] ss:$8 sps:$4 sm:$0xff]  }
  0x2f   :  { %903 = vmatpush1.bf16.msra.mxu0 %v1690_v27  ;;  %858 = vmatpush1.bf16.msra.mxu1 %v1808_v1  ;;  %v1844_v27 = vld [vmem:[%s2529_s1 + $0xf0] ss:$8 sps:$4 sm:$0xff]   ;;  %v1773_v1 = vld [vmem:[%s2529_s1 + $0x320] ss:$8 sps:$4 sm:$0xff]  }
  0x30   :  { %904 = vmatprep.subr.bf16.mxu0 %v1691_v28  ;;  %859 = vmatprep.subr.bf16.mxu1 %v1812_v2  ;;  %v1857_v28 = vld [vmem:[%s2531_s3 + $0x4] ss:$8 sps:$4 sm:$0xff]   ;;  %v1781_v2 = vld [vmem:[%s2529_s1 + $0x334] ss:$8 sps:$4 sm:$0xff]  }
  0x33   :  { %905 = vmatpush1.bf16.msra.mxu0 %v1693_v31  ;;  %860 = vmatpush1.bf16.msra.mxu1 %v1814_v5  ;;  %v1436_v31 = vcombine.low %v27_v9, %v27_v9  ;;  %v1779_v5 = vld [vmem:[%s2529_s1 + $0x330] ss:$8 sps:$4 sm:$0xff]   ;;  %v1785_v9 = vld [vmem:[%s2529_s1 + $0x340] ss:$8 sps:$4 sm:$0xff]  }
  0x34   :  { %906 = vmatprep.subr.bf16.mxu0 %v1694_v32  ;;  %861 = vmatprep.subr.bf16.mxu1 %v1818_v6  ;;  %v1855_v32 = vld [vmem:[%s2531_s3] ss:$8 sps:$4 sm:$0xff]   ;;  %v1787_v6 = vld [vmem:[%s2529_s1 + $0x344] ss:$8 sps:$4 sm:$0xff]  }
  0x37   :  { %907 = vmatpush1.bf16.msra.mxu0 %v1696_v36  ;;  %862 = vmatpush1.bf16.msra.mxu1 %v1820_v10  ;;  %v1858_v36 = vld [vmem:[%s2531_s3 + $0x10] ss:$8 sps:$4 sm:$0xff]   ;;  %v1793_v10 = vld [vmem:[%s2529_s1 + $0x354] ss:$8 sps:$4 sm:$0xff]  }
  0x38   :  { %908 = vmatprep.subr.bf16.mxu0 %v1697_v37  ;;  %863 = vmatprep.subr.bf16.mxu1 %v1824_v12  ;;  %v1863_v37 = vld [vmem:[%s2531_s3 + $0x24] ss:$8 sps:$4 sm:$0xff]   ;;  %v1890_v12 = vld [vmem:[%s2531_s3 + $0xb4] ss:$8 sps:$4 sm:$0xff]  }
  0x3b   :  { %909 = vmatpush1.bf16.msra.mxu0 %v1699_v40  ;;  %864 = vmatpush1.bf16.msra.mxu1 %v1826_v15  ;;  %v1861_v40 = vld [vmem:[%s2531_s3 + $0x20] ss:$8 sps:$4 sm:$0xff]   ;;  %v1888_v15 = vld [vmem:[%s2531_s3 + $0xb0] ss:$8 sps:$4 sm:$0xff]  }
  0x3c   :  { %910 = vmatprep.subr.bf16.mxu0 %v1700_v41  ;;  %865 = vmatprep.subr.bf16.mxu1 %v1830_v16  ;;  %v1866_v41 = vld [vmem:[%s2531_s3 + $0x34] ss:$8 sps:$4 sm:$0xff]   ;;  %v1893_v16 = vld [vmem:[%s2531_s3 + $0xc4] ss:$8 sps:$4 sm:$0xff]  }
  0x3f   :  { %911 = vmatpush1.bf16.msra.mxu0 %v1702_v44  ;;  %866 = vmatpush1.bf16.msra.mxu1 %v1832_v19  ;;  %v1864_v44 = vld [vmem:[%s2531_s3 + $0x30] ss:$8 sps:$4 sm:$0xff]   ;;  %v1891_v19 = vld [vmem:[%s2531_s3 + $0xc0] ss:$8 sps:$4 sm:$0xff]  }
  0x40   :  { %921 = vmatprep.subr.bf16.mxu0 %v1707_v45  ;;  %867 = vmatprep.subr.bf16.mxu1 %v1836_v20  ;;  %v1869_v45 = vld [vmem:[%s2531_s3 + $0x44] ss:$8 sps:$4 sm:$0xff]   ;;  %v1803_v20 = vld [vmem:[%s2529_s1 + $0x370] ss:$8 sps:$4 sm:$0xff]  }
  0x42   :  { %913 = vmatmul.mubr.bf16.vlgmr.msra.gmra.mrb[0].mxu0 %v1438_v48  ;;  %v1755_v48 = vld [vmem:[%s2529_s1 + $0x2f4] ss:$8 sps:$4 sm:$0xff]  }
  0x43   :  { %922 = vmatpush1.bf16.msra.mxu0 %v1705_v50  ;;  %953 = vmatprep.mubr.bf16.mxu0 %v1441_v51  ;;  %v1872_v50 = vld [vmem:[%s2531_s3 + $0x54] ss:$8 sps:$4 sm:$0xff]   ;;  %v1753_v51 = vld [vmem:[%s2529_s1 + $0x2f0] ss:$8 sps:$4 sm:$0xff]  }
  0x44   :  { %923 = vmatprep.subr.bf16.mxu0 %v1710_v52  ;;  %868 = vmatpush1.bf16.msra.mxu1 %v1838_v23  ;;  %v1763_v52 = vld [vmem:[%s2529_s1 + $0x304] ss:$8 sps:$4 sm:$0xff]   ;;  %v1817_v23 = vld [vmem:[%s2529_s1 + $0x394] ss:$8 sps:$4 sm:$0xff]  }
  0x45   :  { %869 = vmatprep.subr.bf16.mxu1 %v1842_v24  ;;  %v1815_v24 = vld [vmem:[%s2529_s1 + $0x390] ss:$8 sps:$4 sm:$0xff]  }
  0x47   :  { %924 = vmatpush1.bf16.msra.mxu0 %v1708_v55  ;;  %v1440_v55 = vcombine.low %v2101_v46, %v2101_v46  ;;  %v1873_v46 = vld [vmem:[%s2531_s3 + $0x60] ss:$8 sps:$4 sm:$0xff]  }
  0x48   :  { %925 = vmatprep.subr.bf16.mxu0 %v1713_v56  ;;  %870 = vmatpush1.bf16.msra.mxu1 %v1844_v27  ;;  %v1875_v56 = vld [vmem:[%s2531_s3 + $0x64] ss:$8 sps:$4 sm:$0xff]   ;;  %v1829_v27 = vld [vmem:[%s2529_s1 + $0x3b4] ss:$8 sps:$4 sm:$0xff]  }
  0x49   :  { %1211 = vmatprep.subr.bf16.mxu1 %v1857_v28  ;;  %v1827_v28 = vld [vmem:[%s2529_s1 + $0x3b0] ss:$8 sps:$4 sm:$0xff]  }
  0x4b   :  { %926 = vmatpush1.bf16.msra.mxu0 %v1711_v59  ;;  %872 = vmatmul.mubr.bf16.vlgmr.msra.gmra.mrb[0].mxu1 %v1436_v31  ;;  %v1769_v59 = vld [vmem:[%s2529_s1 + $0x314] ss:$8 sps:$4 sm:$0xff]  }
  0x4c   :  { %927 = vmatprep.subr.bf16.mxu0 %v1716_v60  ;;  %1212 = vmatpush1.bf16.msra.mxu1 %v1855_v32  ;;  %v1878_v60 = vld [vmem:[%s2531_s3 + $0x74] ss:$8 sps:$4 sm:$0xff]   ;;  %v1839_v32 = vld [vmem:[%s2529_s1 + $0x3d0] ss:$8 sps:$4 sm:$0xff]  }
  0x4d   :  { %1213 = vmatprep.subr.bf16.mxu1 %v1860_v33  ;;  %v1841_v31 = vld [vmem:[%s2529_s1 + $0x3d4] ss:$8 sps:$4 sm:$0xff]   ;;  %v1847_v33 = vld [vmem:[%s2529_s1 + $0x3e4] ss:$8 sps:$4 sm:$0xff]  }
  0x4f   :  { %928 = vmatpush1.bf16.msra.mxu0 %v1714_v63  ;;  %v1876_v63 = vld [vmem:[%s2531_s3 + $0x70] ss:$8 sps:$4 sm:$0xff]  }
  0x50   :  { %929 = vmatprep.subr.bf16.mxu0 %v1719_v0  ;;  %1214 = vmatpush1.bf16.msra.mxu1 %v1858_v36  ;;  %v1881_v0 = vld [vmem:[%s2531_s3 + $0x84] ss:$8 sps:$4 sm:$0xff]   ;;  %v1850_v36 = vld [vmem:[%s2529_s1 + $0x3f0] ss:$8 sps:$4 sm:$0xff]  }
  0x51   :  { %1215 = vmatprep.subr.bf16.mxu1 %v1863_v37  ;;  %v1442_v37 = vcombine.low %v2305_v53, %v2305_v53  ;;  %v159_v53 = vld [vmem:[%s2533_s2] sm:$0x3] }
  0x53   :  { %930 = vmatpush1.bf16.msra.mxu0 %v1717_v3  ;;  %v1879_v3 = vld [vmem:[%s2531_s3 + $0x80] ss:$8 sps:$4 sm:$0xff]  }
  0x54   :  { %931 = vmatprep.subr.bf16.mxu0 %v1722_v4  ;;  %1216 = vmatpush1.bf16.msra.mxu1 %v1861_v40  ;;  %v1884_v4 = vld [vmem:[%s2531_s3 + $0x94] ss:$8 sps:$4 sm:$0xff]   ;;  %v1899_v40 = vld [vmem:[%s2531_s3 + $0xe4] ss:$8 sps:$4 sm:$0xff]  }
  0x55   :  { %1217 = vmatprep.subr.bf16.mxu1 %v1866_v41  ;;  %v1897_v41 = vld [vmem:[%s2531_s3 + $0xe0] ss:$8 sps:$4 sm:$0xff]  }
  0x57   :  { %932 = vmatpush1.bf16.msra.mxu0 %v1720_v7  ;;  %v1882_v7 = vld [vmem:[%s2531_s3 + $0x90] ss:$8 sps:$4 sm:$0xff]  }
  0x58   :  { %933 = vmatprep.subr.bf16.mxu0 %v1725_v8  ;;  %1218 = vmatpush1.bf16.msra.mxu1 %v1864_v44  ;;  %v1887_v8 = vld [vmem:[%s2531_s3 + $0xa4] ss:$8 sps:$4 sm:$0xff]  }
  0x59   :  { %1219 = vmatprep.subr.bf16.mxu1 %v1869_v45  ;;  %v1903_v44 = vld [vmem:[%s2532_s5 + $0x40] sm:$0xff]  }
  0x5b   :  { %934 = vmatpush1.bf16.msra.mxu0 %v1723_v13  ;;  %v1791_v13 = vld [vmem:[%s2529_s1 + $0x350] ss:$8 sps:$4 sm:$0xff]  }
  0x5c   :  { %935 = vmatprep.subr.bf16.mxu0 %v1728_v14  ;;  %1220 = vmatpush1.bf16.msra.mxu1 %v1867_v49  ;;  %v1799_v14 = vld [vmem:[%s2529_s1 + $0x364] ss:$8 sps:$4 sm:$0xff]  }
  0x5d   :  { %1221 = vmatprep.subr.bf16.mxu1 %v1872_v50  ;;  %v161_v50 = vlaneseq }
  0x5f   :  { %936 = vmatpush1.bf16.msra.mxu0 %v1726_v17  ;;  %v1797_v17 = vld [vmem:[%s2529_s1 + $0x360] ss:$8 sps:$4 sm:$0xff]  }
  0x60   :  { %937 = vmatprep.subr.bf16.mxu0 %v1731_v18  ;;  %1222 = vmatpush1.bf16.msra.mxu1 %v1870_v54  ;;  %v1805_v18 = vld [vmem:[%s2529_s1 + $0x374] ss:$8 sps:$4 sm:$0xff]  }
  0x61   :  { %1223 = vmatprep.subr.bf16.mxu1 %v1875_v56 }
  0x63   :  { %938 = vmatpush1.bf16.msra.mxu0 %v1729_v21  ;;  %v1811_v21 = vld [vmem:[%s2529_s1 + $0x384] ss:$8 sps:$4 sm:$0xff]  }
  0x64   :  { %939 = vmatprep.subr.bf16.mxu0 %v1734_v22  ;;  %1224 = vmatpush1.bf16.msra.mxu1 %v1873_v46  ;;  %v1809_v22 = vld [vmem:[%s2529_s1 + $0x380] ss:$8 sps:$4 sm:$0xff]  }
  0x65   :  { %1225 = vmatprep.subr.bf16.mxu1 %v1878_v60 }
  0x67   :  { %940 = vmatpush1.bf16.msra.mxu0 %v1732_v25  ;;  %v1823_v25 = vld [vmem:[%s2529_s1 + $0x3a4] ss:$8 sps:$4 sm:$0xff]  }
  0x68   :  { %941 = vmatprep.subr.bf16.mxu0 %v1737_v26  ;;  %1226 = vmatpush1.bf16.msra.mxu1 %v1876_v63  ;;  %v1821_v26 = vld [vmem:[%s2529_s1 + $0x3a0] ss:$8 sps:$4 sm:$0xff]  }
  0x69   :  { %1227 = vmatprep.subr.bf16.mxu1 %v1881_v0 }
  0x6b   :  { %942 = vmatpush1.bf16.msra.mxu0 %v1735_v29  ;;  %v1835_v29 = vld [vmem:[%s2529_s1 + $0x3c4] ss:$8 sps:$4 sm:$0xff]  }
  0x6c   :  { %943 = vmatprep.subr.bf16.mxu0 %v1740_v30  ;;  %1228 = vmatpush1.bf16.msra.mxu1 %v1879_v3  ;;  %v1833_v30 = vld [vmem:[%s2529_s1 + $0x3c0] ss:$8 sps:$4 sm:$0xff]  }
  0x6d   :  { %1229 = vmatprep.subr.bf16.mxu1 %v1884_v4  ;;  %v1904_v3 = vld [vmem:[%s2532_s5] sm:$0xff]  }
  0x6f   :  { %944 = vmatpush1.bf16.msra.mxu0 %v1738_v34  ;;  %v1845_v34 = vld [vmem:[%s2529_s1 + $0x3e0] ss:$8 sps:$4 sm:$0xff]  }
  0x70   :  { %945 = vmatprep.subr.bf16.mxu0 %v1743_v35  ;;  %1230 = vmatpush1.bf16.msra.mxu1 %v1882_v7  ;;  %v1852_v35 = vld [vmem:[%s2529_s1 + $0x3f4] ss:$8 sps:$4 sm:$0xff]  }
  0x71   :  { %1231 = vmatprep.subr.bf16.mxu1 %v1887_v8  ;;  %v1907_v7 = vld [vmem:[%s2532_s5 + $0x50] sm:$0xff]  }
  0x72   :  { %v1908_v8 = vld [vmem:[%s2532_s5 + $0x10] sm:$0xff]  }
  0x73   :  { %946 = vmatpush1.bf16.msra.mxu0 %v1741_v38  ;;  %v1894_v38 = vld [vmem:[%s2531_s3 + $0xd0] ss:$8 sps:$4 sm:$0xff]  }
  0x74   :  { %947 = vmatprep.subr.bf16.mxu0 %v1746_v39  ;;  %1232 = vmatpush1.bf16.msra.mxu1 %v1885_v11  ;;  %v1896_v39 = vld [vmem:[%s2531_s3 + $0xd4] ss:$8 sps:$4 sm:$0xff]   ;;  %v1911_v11 = vld [vmem:[%s2532_s5 + $0x60] sm:$0xff]  }
  0x75   :  { %1233 = vmatprep.subr.bf16.mxu1 %v1890_v12  ;;  %v1912_v12 = vld [vmem:[%s2532_s5 + $0x20] sm:$0xff]  }
  0x77   :  { %948 = vmatpush1.bf16.msra.mxu0 %v1744_v42  ;;  %v1902_v42 = vld [vmem:[%s2531_s3 + $0xf4] ss:$8 sps:$4 sm:$0xff]  }
  0x78   :  { %949 = vmatprep.subr.bf16.mxu0 %v1749_v43  ;;  %1234 = vmatpush1.bf16.msra.mxu1 %v1888_v15  ;;  %v1900_v43 = vld [vmem:[%s2531_s3 + $0xf0] ss:$8 sps:$4 sm:$0xff]  }
  0x79   :  { %1235 = vmatprep.subr.bf16.mxu1 %v1893_v16  ;;  %v1915_v15 = vld [vmem:[%s2532_s5 + $0x70] sm:$0xff]  }
  0x7a   :  { %v1916_v16 = vld [vmem:[%s2532_s5 + $0x30] sm:$0xff]  }
  0x7b   :  { %950 = vmatpush1.bf16.msra.mxu0 %v1747_v47 }
  0x7c   :  { %951 = vmatprep.subr.bf16.mxu0 %v1755_v48  ;;  %1236 = vmatpush1.bf16.msra.mxu1 %v1891_v19  ;;  %v1039_v19 = vld [vmem:[%s2534_s4] sm:$0x3] }
  0x7d   :  { %1237 = vmatprep.subr.bf16.mxu1 %v1896_v39 }
  0x7f   :  { %952 = vmatpush1.bf16.msra.mxu0 %v1753_v51  ;;  %v162_v51 = vshrl.u32 %v161_v50, 7 }
  0x80   :  { %962 = vmatprep.subr.bf16.mxu0 %v1763_v52  ;;  %1238 = vmatpush1.bf16.msra.mxu1 %v1894_v38 }
  0x81   :  { %1239 = vmatprep.subr.bf16.mxu1 %v1899_v40  ;;  %v163_v52 = vsub.s32 0, %v162_v51  ;;  %v167_v54 = vsub.s32 1, %v162_v51 }
  0x82   :  { %954 = vmatmul.mubr.bf16.vlgmr.msra.gmra.mrb[0].mxu0 %v1440_v55 }
  0x83   :  { %963 = vmatpush1.bf16.msra.mxu0 %v1761_v57  ;;  %994 = vmatprep.mubr.bf16.mxu0 %v1443_v58  ;;  %v164_v55 = vrot.slane %v159_v53, %v163_v52  ;;  %v168_v56 = vrot.slane %v159_v53, %v167_v54 }
  0x84   :  { %964 = vmatprep.subr.bf16.mxu0 %v1769_v59  ;;  %1240 = vmatpush1.bf16.msra.mxu1 %v1897_v41 }
  0x85   :  { %1241 = vmatprep.subr.bf16.mxu1 %v1902_v42 }
  0x87   :  { %965 = vmatpush1.bf16.msra.mxu0 %v1767_v61 }
  0x88   :  { %966 = vmatprep.subr.bf16.mxu0 %v1775_v62  ;;  %1242 = vmatpush1.bf16.msra.mxu1 %v1900_v43 }
  0x89   :  { %1621 = vmatprep.subr.bf16.mxu1 %v1903_v44 }
  0x8b   :  { %967 = vmatpush1.bf16.msra.mxu0 %v1773_v1 }
  0x8c   :  { %968 = vmatprep.subr.bf16.mxu0 %v1781_v2 }
  0x8f   :  { %969 = vmatpush1.bf16.msra.mxu0 %v1779_v5  ;;  %v1905_v5 = vld [vmem:[%s2532_s5 + $0x48] sm:$0xff]  }
  0x90   :  { %970 = vmatprep.subr.bf16.mxu0 %v1787_v6  ;;  %v1906_v6 = vld [vmem:[%s2532_s5 + $0x8] sm:$0xff]  }
  0x93   :  { %971 = vmatpush1.bf16.msra.mxu0 %v1785_v9  ;;  %v1909_v9 = vld [vmem:[%s2532_s5 + $0x58] sm:$0xff]  }
  0x94   :  { %972 = vmatprep.subr.bf16.mxu0 %v1793_v10  ;;  %v1910_v10 = vld [vmem:[%s2532_s5 + $0x18] sm:$0xff]  }
  0x97   :  { %973 = vmatpush1.bf16.msra.mxu0 %v1791_v13  ;;  %v1913_v13 = vld [vmem:[%s2532_s5 + $0x68] sm:$0xff]  }
  0x98   :  { %974 = vmatprep.subr.bf16.mxu0 %v1799_v14  ;;  %v1914_v14 = vld [vmem:[%s2532_s5 + $0x28] sm:$0xff]  }
  0x9b   :  { %975 = vmatpush1.bf16.msra.mxu0 %v1797_v17  ;;  %v1917_v17 = vld [vmem:[%s2532_s5 + $0x78] sm:$0xff]  }
  0x9c   :  { %976 = vmatprep.subr.bf16.mxu0 %v1805_v18  ;;  %v1918_v18 = vld [vmem:[%s2532_s5 + $0x38] sm:$0xff]  }
  0x9f   :  { %977 = vmatpush1.bf16.msra.mxu0 %v1803_v20  ;;  %v1044_v20 = vrot.slane %v1039_v19, %v163_v52 }
  0xa0   :  { %978 = vmatprep.subr.bf16.mxu0 %v1811_v21  ;;  %v1048_v21 = vrot.slane %v1039_v19, %v167_v54 }
  0xa3   :  { %979 = vmatpush1.bf16.msra.mxu0 %v1809_v22 }
  0xa4   :  { %980 = vmatprep.subr.bf16.mxu0 %v1817_v23 }
  0xa7   :  { %981 = vmatpush1.bf16.msra.mxu0 %v1815_v24 }
  0xa8   :  { %982 = vmatprep.subr.bf16.mxu0 %v1823_v25 }
  0xab   :  { %983 = vmatpush1.bf16.msra.mxu0 %v1821_v26 }
  0xac   :  { %984 = vmatprep.subr.bf16.mxu0 %v1829_v27 }
  0xaf   :  { %985 = vmatpush1.bf16.msra.mxu0 %v1827_v28 }
  0xb0   :  { %986 = vmatprep.subr.bf16.mxu0 %v1835_v29 }
  0xb3   :  { %987 = vmatpush1.bf16.msra.mxu0 %v1833_v30 }
  0xb4   :  { %988 = vmatprep.subr.bf16.mxu0 %v1841_v31 }
  0xb7   :  { %989 = vmatpush1.bf16.msra.mxu0 %v1839_v32 }
  0xb8   :  { %990 = vmatprep.subr.bf16.mxu0 %v1847_v33  ;;  %v1604_v33 = vld [vmem:[%s2535_s6] ss:$0 sm:$0xff] }
  0xbb   :  { %991 = vmatpush1.bf16.msra.mxu0 %v1845_v34 }
  0xbc   :  { %992 = vmatprep.subr.bf16.mxu0 %v1852_v35 }
  0xbf   :  { %993 = vmatpush1.bf16.msra.mxu0 %v1850_v36 }
  0xc2   :  { %995 = vmatmul.mubr.bf16.vlgmr.msra.gmra.mrb[0].mxu0 %v1442_v37 }
 0x11e   :  { %v873_v45 = vpop.f32.mrb[0].mxu1 }
 0x11f   :  { %v875_v47 = vpop.f32.mrb[1].mxu1  ;;  %v874_v57 = vadd.f32 %v873_v45, %v164_v55 }
 0x120   :  { %v877_v48 = vpop.f32.mrb[2].mxu1  ;;  %v876_v58 = vadd.f32 %v875_v47, %v168_v56 }
 0x121   :  { %v878_v49 = vpop.f32.mrb[3].mxu1 }
 0x195   :  { %v996_v59 = vpop.f32.mrb[0].mxu0 }
 0x196   :  { %v1644_v46 = vadd.f32 %v996_v59, %v874_v57  ;;  %v998_v60 = vpop.f32.mrb[1].mxu0 }
 0x197   :  { %v1646_v61 = vadd.f32 %v998_v60, %v876_v58  ;;  %v1000_v62 = vpop.f32.mrb[2].mxu0 }
 0x198   :  { %v1003_v63 = vmax.f32 %v1644_v46, 0.0  ;;  %v1001_v0 = vpop.f32.mrb[3].mxu0 }
 0x199   :  { %v1004_v1 = vmax.f32 %v1646_v61, 0.0 }
 0x19a   :  { %v1005_v4 = vpack.c.bf16 %v1003_v63, %v1003_v63 }
 0x19b   :  { %v1006_v2 = vpack.c.bf16 %v1004_v1, %v1004_v1 }
 0x19d   :  { %1243 = vmatprep.mubr.bf16.mxu1 %v1006_v2 }
 0x19e   :  { %1244 = vmatmul.mubr.bf16.vlgmr.msra.gmra.mrb[4].mxu1 %v1005_v4 }
 0x19f   :  { %1622 = vmatpush3.bf16.msra.mxu1 %v1904_v3 }
 0x1a0   :  { %1623 = vmatprep.subr.bf16.mxu1 %v1905_v5 }
 0x1a3   :  { %1624 = vmatpush3.bf16.msra.mxu1 %v1906_v6 }
 0x1a4   :  { %1625 = vmatprep.subr.bf16.mxu1 %v1907_v7 }
 0x1a7   :  { %1626 = vmatpush3.bf16.msra.mxu1 %v1908_v8 }
 0x1a8   :  { %1627 = vmatprep.subr.bf16.mxu1 %v1909_v9 }
 0x1ab   :  { %1628 = vmatpush3.bf16.msra.mxu1 %v1910_v10 }
 0x1ac   :  { %1629 = vmatprep.subr.bf16.mxu1 %v1911_v11 }
 0x1af   :  { %1630 = vmatpush3.bf16.msra.mxu1 %v1912_v12 }
 0x1b0   :  { %1631 = vmatprep.subr.bf16.mxu1 %v1913_v13 }
 0x1b3   :  { %1632 = vmatpush3.bf16.msra.mxu1 %v1914_v14 }
 0x1b4   :  { %1633 = vmatprep.subr.bf16.mxu1 %v1915_v15 }
 0x1b7   :  { %1634 = vmatpush3.bf16.msra.mxu1 %v1916_v16 }
 0x1b8   :  { %1635 = vmatprep.subr.bf16.mxu1 %v1917_v17 }
 0x1bb   :  { %1636 = vmatpush3.bf16.msra.mxu1 %v1918_v18 }
 0x271   :  { %v1245_v22 = vpop.f32.mrb[4].mxu1 }
 0x272   :  { %v1246_v23 = vadd.f32 %v1245_v22, %v1044_v20  ;;  %v1247_v24 = vpop.f32.mrb[5].mxu1 }
 0x273   :  { %v1248_v25 = vadd.f32 %v1247_v24, %v1048_v21  ;;  %v1249_v26 = vpop.f32.mrb[6].mxu1 }
 0x274   :  { %v1252_v27 = vmax.f32 %v1246_v23, 0.0  ;;  %v1250_v28 = vpop.f32.mrb[7].mxu1 }
 0x275   :  { %v1253_v29 = vmax.f32 %v1248_v25, 0.0 }
 0x276   :  { %v1254_v31 = vpack.c.bf16 %v1252_v27, %v1252_v27 }
 0x277   :  { %v1255_v30 = vpack.c.bf16 %v1253_v29, %v1253_v29 }
 0x279   :  { %1423 = vmatprep.mubr.bf16.mxu1 %v1255_v30 }
 0x27a   :  { %1424 = vmatmul.mubr.bf16.vlgmr.msra.gmra.mrb[8].mxu1 %v1254_v31 }
 0x34d   :  { %v1637_v32 = vpop.f32.mrb[8].mxu1 }
 0x34e   :  { %v1638_v34 = vpop.f32.mrb[9].mxu1 }
 0x34f   :  { %v1639_v35 = vadd.f32 %v1638_v34, %v1637_v32  ;;  %v1640_v36 = vpop.f32.mrb[10].mxu1 }
 0x350   :  { %v1641_v37 = vpop.f32.mrb[11].mxu1 }
 0x351   :  { %v1426_v38 = vadd.f32 %v1639_v35, %v1604_v33 }
 0x353   :  { %1431 = vst [vmem:[%s2536_s7] sm:$0xff] %v1426_v38 }

</bundles_post_ra>
